<compile_context>
chip_gen: v5e
topology: v5e:2x2
jax: 0.10.0
libtpu: 0.0.40
codegen_flags: <defaults>
</compile_context>

<pallas_src>
import functools

import jax
import jax.numpy as jnp
from jax.experimental import pallas as pl
from jax.experimental.pallas import tpu as pltpu

_LANE = 128
_SUBLANE = 8
_MAX_LANE_TILE = 2048                  # cap on the spatial (reduction) lane tile
_IN_BUF_BUDGET = 8 * 1024 * 1024       # bytes for ONE input buffer (x2 double-buffered)


def _round_up(a, m):
    return ((a + m - 1) // m) * m


def _cdiv(a, b):
    return (a + b - 1) // b


def _choose_tiles(bc, hw, itemsize):
    """Returns (row tile over B*C, lane tile over H*W, accumulator lane width)."""
    # Spatial tile: one full-dim tile when it fits (legal for any HW, no mask),
    # otherwise balanced multiple-of-128 tiles over a cdiv grid.
    if hw <= _MAX_LANE_TILE:
        thw = hw
    else:
        n_steps = _cdiv(hw, _MAX_LANE_TILE)
        thw = _round_up(_cdiv(hw, n_steps), _LANE)
    acc_w = _LANE if thw % _LANE == 0 else thw

    # Row tile over B*C: as large as the VMEM budget allows, but keep >= 2 row
    # tiles when possible so the "parallel" axis can shard across v7x's 2 TCs.
    max_rows = max(_SUBLANE,
                   (_IN_BUF_BUDGET // (thw * itemsize)) // _SUBLANE * _SUBLANE)
    if bc <= _SUBLANE:
        tbc = bc                               # tiny: single full-dim row tile
    else:
        half = _round_up(_cdiv(bc, 2), _SUBLANE)
        tbc = max(_SUBLANE, min(half, max_rows))
    return tbc, thw, acc_w


def _gem_kernel(p_ref, x_ref, o_ref, acc_ref, *, eps, inv_hw, hw, thw, chunk,
                mask_last):
    """One (row-tile, HW-tile) step of GeM pooling.

    p_ref  : SMEM f32[1]            learnable exponent p
    x_ref  : VMEM [tbc, thw]        feature tile (rows=B*C on sublanes, spatial on lanes)
    o_ref  : VMEM [tbc, 1]          pooled output tile (resident across the HW axis)
    acc_ref: VMEM f32[tbc, chunk]   lane-chunk accumulator of clamp(x, eps)**p
    """
    k = pl.program_id(1)
    n_k = pl.num_programs(1)

    @pl.when(k == 0)
    def _init():
        acc_ref[...] = jnp.zeros_like(acc_ref)

    p = p_ref[0]
    n_chunks = thw // chunk
    for j in range(n_chunks):                          # static, lane-aligned chunks
        xc = x_ref[:, j * chunk:(j + 1) * chunk].astype(jnp.float32)
        xc = jnp.maximum(xc, eps)                      # clamp(min=eps) -> positive
        xpc = jnp.exp(p * jnp.log(xc))                 # x**p on the EUP
        if mask_last:                                  # zero padded lanes (cdiv grid)
            col = k * thw + j * chunk + jax.lax.broadcasted_iota(
                jnp.int32, xpc.shape, dimension=1)
            xpc = jnp.where(col < hw, xpc, 0.0)
        acc_ref[...] += xpc                            # VPU add; no cross-lane work

    @pl.when(k == n_k - 1)
    def _finalize():
        total = jnp.sum(acc_ref[...], axis=-1, keepdims=True)   # single XLU reduce
        mean = total * inv_hw                                   # * 1/(H*W)
        o_ref[...] = jnp.exp(jnp.log(mean) * (1.0 / p)).astype(o_ref.dtype)


def gem_forward(x, p, *, eps=1e-6):
    """GeM pooling: (mean_{H,W} clamp(x, eps)**p) ** (1/p).

    x : [B, C, H, W]  (NCHW)     p : f32[1]     returns [B, C, 1, 1] in x.dtype
    """
    B, C, H, W = x.shape
    HW = H * W
    BC = B * C
    x2 = x.reshape(BC, HW)                        # contiguous reshape, no data movement

    itemsize = jnp.dtype(x.dtype).itemsize
    tbc, thw, acc_w = _choose_tiles(BC, HW, itemsize)
    grid = (pl.cdiv(BC, tbc), pl.cdiv(HW, thw))   # reduction (HW) axis last
    mask_last = (HW % thw) != 0                   # only possible when HW > cap

    kernel = functools.partial(
        _gem_kernel, eps=float(eps), inv_hw=1.0 / float(HW),
        hw=HW, thw=thw, chunk=acc_w, mask_last=mask_last)

    # Explicit VMEM budget: double-buffered input tile + accumulator + output.
    footprint = 2 * tbc * thw * itemsize + tbc * acc_w * 4 + 2 * tbc * itemsize
    vmem_limit = int(min(max(footprint + (4 << 20), 16 << 20), 48 << 20))

    pooled = pl.pallas_call(
        kernel,
        out_shape=jax.ShapeDtypeStruct((BC, 1), x.dtype),
        grid=grid,
        in_specs=[
            pl.BlockSpec(memory_space=pltpu.MemorySpace.SMEM),    # p (scalar)
            pl.BlockSpec((tbc, thw), lambda i, k: (i, k)),        # x tile
        ],
        out_specs=pl.BlockSpec((tbc, 1), lambda i, k: (i, 0)),
        scratch_shapes=[pltpu.VMEM((tbc, acc_w), jnp.float32)],
        compiler_params=pltpu.CompilerParams(
            dimension_semantics=("parallel", "arbitrary"),
            vmem_limit_bytes=vmem_limit),
        cost_estimate=pl.CostEstimate(
            flops=4 * BC * HW,                    # clamp + p*log mul + accumulate (+mask)
            transcendentals=2 * BC * HW,          # log + exp per element
            bytes_accessed=BC * HW * itemsize + BC * itemsize + 4),
    )(p.astype(jnp.float32), x2)

    return pooled.reshape(B, C, 1, 1)


if __name__ == "__main__":
    EPS = 1e-6

    def reference(x, p, eps):
        xc = jnp.maximum(x.astype(jnp.float32), eps)
        m = jnp.mean(xc ** p[0], axis=(2, 3)) ** (1.0 / p[0])
        return m.reshape(x.shape[0], x.shape[1], 1, 1).astype(x.dtype)

    key = jax.random.PRNGKey(0)
    p = jnp.ones((1,), dtype=jnp.float32) * 3.0       # nn.Parameter(torch.ones(1) * 3)
    fwd = jax.jit(lambda x, p: gem_forward(x, p, eps=EPS))

    # Exercise the three code paths:
    #  (2,384,32,32): single-step reduction, 2 parallel row tiles, chunked acc
    #  (2,384,47,47): multi-step reduction with a masked partial last HW tile
    #  (2,  4, 7, 7): tiny HW < 128 (full-dim lane tile), tiny row count
    for shape in [(2, 384, 32, 32), (2, 384, 47, 47), (2, 4, 7, 7)]:
        key, sub = jax.random.split(key)
        x = jax.random.normal(sub, shape, dtype=jnp.float32)
        out = fwd(x, p)
        out = jax.block_until_ready(out)
        assert out.shape == (shape[0], shape[1], 1, 1)
        ref = reference(x, p, EPS)
        err = float(jnp.max(jnp.abs(out.astype(jnp.float32) - ref.astype(jnp.float32))))
        assert jnp.allclose(out, ref, atol=1e-4, rtol=1e-4), (shape, err)

    print("KERNEL_OK")
</pallas_src>

<mosaic_0001>
module attributes {stable_mosaic.version = 11 : i64} {
  func.func @_gem_kernel(%arg0: i32, %arg1: i32, %arg2: memref<1xf32, #tpu.memory_space<smem>>, %arg3: memref<384x1024xf32, #tpu.memory_space<vmem>>, %arg4: memref<384x1xf32, #tpu.memory_space<vmem>>, %arg5: memref<384x128xf32, #tpu.memory_space<vmem>>) attributes {dimension_semantics = [#tpu.dimension_semantics<parallel>, #tpu.dimension_semantics<arbitrary>], iteration_bounds = array<i64: 2, 1>, scalar_prefetch = 0 : i64, scratch_operands = 1 : i64, tpu.core_type = #tpu.core_type<tc>, window_params = [{transform_indices = @transform_0, window_bounds = array<i64: 1>}, {transform_indices = @transform_1, window_bounds = array<i64: 384, 1024>}, {transform_indices = @transform_2, window_bounds = array<i64: 384, 1>}]} {
    %c0_i32 = arith.constant 0 : i32
    %0 = arith.cmpi eq, %arg1, %c0_i32 : i32
    %1 = arith.extui %0 : i1 to i32
    %c0_i32_0 = arith.constant 0 : i32
    %2 = arith.cmpi ne, %1, %c0_i32_0 : i32
    scf.if %2 {
      %cst_51 = arith.constant 0.000000e+00 : f32
      %87 = vector.broadcast %cst_51 : f32 to vector<384x128xf32>
      %c0_52 = arith.constant 0 : index
      %c0_53 = arith.constant 0 : index
      %88 = vector.load %arg5[%c0_52, %c0_53] : memref<384x128xf32, #tpu.memory_space<vmem>>, vector<384x128xf32>
      tpu.vector_store %arg5[%c0_52, %c0_53], %87 {strides = array<i32>} : memref<384x128xf32, #tpu.memory_space<vmem>>, vector<384x128xf32>,
    } else {
    }
    %c0 = arith.constant 0 : index
    %3 = memref.load %arg2[%c0] : memref<1xf32, #tpu.memory_space<smem>>
    %c0_1 = arith.constant 0 : index
    %c0_2 = arith.constant 0 : index
    %4 = vector.load %arg3[%c0_1, %c0_2] : memref<384x1024xf32, #tpu.memory_space<vmem>>, vector<384x128xf32>
    %cst = arith.constant 9.99999997E-7 : f32
    %5 = vector.broadcast %cst : f32 to vector<384x128xf32>
    %6 = arith.maximumf %4, %5 : vector<384x128xf32>
    %7 = math.log %6 : vector<384x128xf32>
    %8 = vector.broadcast %3 : f32 to vector<384x128xf32>
    %9 = arith.mulf %8, %7 : vector<384x128xf32>
    %10 = math.exp %9 : vector<384x128xf32>
    %c0_3 = arith.constant 0 : index
    %c0_4 = arith.constant 0 : index
    %11 = vector.load %arg5[%c0_3, %c0_4] : memref<384x128xf32, #tpu.memory_space<vmem>>, vector<384x128xf32>
    %12 = arith.addf %11, %10 : vector<384x128xf32>
    %c0_5 = arith.constant 0 : index
    %c0_6 = arith.constant 0 : index
    %13 = vector.load %arg5[%c0_5, %c0_6] : memref<384x128xf32, #tpu.memory_space<vmem>>, vector<384x128xf32>
    tpu.vector_store %arg5[%c0_5, %c0_6], %12 {strides = array<i32>} : memref<384x128xf32, #tpu.memory_space<vmem>>, vector<384x128xf32>,
    %c0_7 = arith.constant 0 : index
    %c128 = arith.constant 128 : index
    %14 = vector.load %arg3[%c0_7, %c128] : memref<384x1024xf32, #tpu.memory_space<vmem>>, vector<384x128xf32>
    %cst_8 = arith.constant 9.99999997E-7 : f32
    %15 = vector.broadcast %cst_8 : f32 to vector<384x128xf32>
    %16 = arith.maximumf %14, %15 : vector<384x128xf32>
    %17 = math.log %16 : vector<384x128xf32>
    %18 = vector.broadcast %3 : f32 to vector<384x128xf32>
    %19 = arith.mulf %18, %17 : vector<384x128xf32>
    %20 = math.exp %19 : vector<384x128xf32>
    %c0_9 = arith.constant 0 : index
    %c0_10 = arith.constant 0 : index
    %21 = vector.load %arg5[%c0_9, %c0_10] : memref<384x128xf32, #tpu.memory_space<vmem>>, vector<384x128xf32>
    %22 = arith.addf %21, %20 : vector<384x128xf32>
    %c0_11 = arith.constant 0 : index
    %c0_12 = arith.constant 0 : index
    %23 = vector.load %arg5[%c0_11, %c0_12] : memref<384x128xf32, #tpu.memory_space<vmem>>, vector<384x128xf32>
    tpu.vector_store %arg5[%c0_11, %c0_12], %22 {strides = array<i32>} : memref<384x128xf32, #tpu.memory_space<vmem>>, vector<384x128xf32>,
    %c0_13 = arith.constant 0 : index
    %c256 = arith.constant 256 : index
    %24 = vector.load %arg3[%c0_13, %c256] : memref<384x1024xf32, #tpu.memory_space<vmem>>, vector<384x128xf32>
    %cst_14 = arith.constant 9.99999997E-7 : f32
    %25 = vector.broadcast %cst_14 : f32 to vector<384x128xf32>
    %26 = arith.maximumf %24, %25 : vector<384x128xf32>
    %27 = math.log %26 : vector<384x128xf32>
    %28 = vector.broadcast %3 : f32 to vector<384x128xf32>
    %29 = arith.mulf %28, %27 : vector<384x128xf32>
    %30 = math.exp %29 : vector<384x128xf32>
    %c0_15 = arith.constant 0 : index
    %c0_16 = arith.constant 0 : index
    %31 = vector.load %arg5[%c0_15, %c0_16] : memref<384x128xf32, #tpu.memory_space<vmem>>, vector<384x128xf32>
    %32 = arith.addf %31, %30 : vector<384x128xf32>
    %c0_17 = arith.constant 0 : index
    %c0_18 = arith.constant 0 : index
    %33 = vector.load %arg5[%c0_17, %c0_18] : memref<384x128xf32, #tpu.memory_space<vmem>>, vector<384x128xf32>
    tpu.vector_store %arg5[%c0_17, %c0_18], %32 {strides = array<i32>} : memref<384x128xf32, #tpu.memory_space<vmem>>, vector<384x128xf32>,
    %c0_19 = arith.constant 0 : index
    %c384 = arith.constant 384 : index
    %34 = vector.load %arg3[%c0_19, %c384] : memref<384x1024xf32, #tpu.memory_space<vmem>>, vector<384x128xf32>
    %cst_20 = arith.constant 9.99999997E-7 : f32
    %35 = vector.broadcast %cst_20 : f32 to vector<384x128xf32>
    %36 = arith.maximumf %34, %35 : vector<384x128xf32>
    %37 = math.log %36 : vector<384x128xf32>
    %38 = vector.broadcast %3 : f32 to vector<384x128xf32>
    %39 = arith.mulf %38, %37 : vector<384x128xf32>
    %40 = math.exp %39 : vector<384x128xf32>
    %c0_21 = arith.constant 0 : index
    %c0_22 = arith.constant 0 : index
    %41 = vector.load %arg5[%c0_21, %c0_22] : memref<384x128xf32, #tpu.memory_space<vmem>>, vector<384x128xf32>
    %42 = arith.addf %41, %40 : vector<384x128xf32>
    %c0_23 = arith.constant 0 : index
    %c0_24 = arith.constant 0 : index
    %43 = vector.load %arg5[%c0_23, %c0_24] : memref<384x128xf32, #tpu.memory_space<vmem>>, vector<384x128xf32>
    tpu.vector_store %arg5[%c0_23, %c0_24], %42 {strides = array<i32>} : memref<384x128xf32, #tpu.memory_space<vmem>>, vector<384x128xf32>,
    %c0_25 = arith.constant 0 : index
    %c512 = arith.constant 512 : index
    %44 = vector.load %arg3[%c0_25, %c512] : memref<384x1024xf32, #tpu.memory_space<vmem>>, vector<384x128xf32>
    %cst_26 = arith.constant 9.99999997E-7 : f32
    %45 = vector.broadcast %cst_26 : f32 to vector<384x128xf32>
    %46 = arith.maximumf %44, %45 : vector<384x128xf32>
    %47 = math.log %46 : vector<384x128xf32>
    %48 = vector.broadcast %3 : f32 to vector<384x128xf32>
    %49 = arith.mulf %48, %47 : vector<384x128xf32>
    %50 = math.exp %49 : vector<384x128xf32>
    %c0_27 = arith.constant 0 : index
    %c0_28 = arith.constant 0 : index
    %51 = vector.load %arg5[%c0_27, %c0_28] : memref<384x128xf32, #tpu.memory_space<vmem>>, vector<384x128xf32>
    %52 = arith.addf %51, %50 : vector<384x128xf32>
    %c0_29 = arith.constant 0 : index
    %c0_30 = arith.constant 0 : index
    %53 = vector.load %arg5[%c0_29, %c0_30] : memref<384x128xf32, #tpu.memory_space<vmem>>, vector<384x128xf32>
    tpu.vector_store %arg5[%c0_29, %c0_30], %52 {strides = array<i32>} : memref<384x128xf32, #tpu.memory_space<vmem>>, vector<384x128xf32>,
    %c0_31 = arith.constant 0 : index
    %c640 = arith.constant 640 : index
    %54 = vector.load %arg3[%c0_31, %c640] : memref<384x1024xf32, #tpu.memory_space<vmem>>, vector<384x128xf32>
    %cst_32 = arith.constant 9.99999997E-7 : f32
    %55 = vector.broadcast %cst_32 : f32 to vector<384x128xf32>
    %56 = arith.maximumf %54, %55 : vector<384x128xf32>
    %57 = math.log %56 : vector<384x128xf32>
    %58 = vector.broadcast %3 : f32 to vector<384x128xf32>
    %59 = arith.mulf %58, %57 : vector<384x128xf32>
    %60 = math.exp %59 : vector<384x128xf32>
    %c0_33 = arith.constant 0 : index
    %c0_34 = arith.constant 0 : index
    %61 = vector.load %arg5[%c0_33, %c0_34] : memref<384x128xf32, #tpu.memory_space<vmem>>, vector<384x128xf32>
    %62 = arith.addf %61, %60 : vector<384x128xf32>
    %c0_35 = arith.constant 0 : index
    %c0_36 = arith.constant 0 : index
    %63 = vector.load %arg5[%c0_35, %c0_36] : memref<384x128xf32, #tpu.memory_space<vmem>>, vector<384x128xf32>
    tpu.vector_store %arg5[%c0_35, %c0_36], %62 {strides = array<i32>} : memref<384x128xf32, #tpu.memory_space<vmem>>, vector<384x128xf32>,
    %c0_37 = arith.constant 0 : index
    %c768 = arith.constant 768 : index
    %64 = vector.load %arg3[%c0_37, %c768] : memref<384x1024xf32, #tpu.memory_space<vmem>>, vector<384x128xf32>
    %cst_38 = arith.constant 9.99999997E-7 : f32
    %65 = vector.broadcast %cst_38 : f32 to vector<384x128xf32>
    %66 = arith.maximumf %64, %65 : vector<384x128xf32>
    %67 = math.log %66 : vector<384x128xf32>
    %68 = vector.broadcast %3 : f32 to vector<384x128xf32>
    %69 = arith.mulf %68, %67 : vector<384x128xf32>
    %70 = math.exp %69 : vector<384x128xf32>
    %c0_39 = arith.constant 0 : index
    %c0_40 = arith.constant 0 : index
    %71 = vector.load %arg5[%c0_39, %c0_40] : memref<384x128xf32, #tpu.memory_space<vmem>>, vector<384x128xf32>
    %72 = arith.addf %71, %70 : vector<384x128xf32>
    %c0_41 = arith.constant 0 : index
    %c0_42 = arith.constant 0 : index
    %73 = vector.load %arg5[%c0_41, %c0_42] : memref<384x128xf32, #tpu.memory_space<vmem>>, vector<384x128xf32>
    tpu.vector_store %arg5[%c0_41, %c0_42], %72 {strides = array<i32>} : memref<384x128xf32, #tpu.memory_space<vmem>>, vector<384x128xf32>,
    %c0_43 = arith.constant 0 : index
    %c896 = arith.constant 896 : index
    %74 = vector.load %arg3[%c0_43, %c896] : memref<384x1024xf32, #tpu.memory_space<vmem>>, vector<384x128xf32>
    %cst_44 = arith.constant 9.99999997E-7 : f32
    %75 = vector.broadcast %cst_44 : f32 to vector<384x128xf32>
    %76 = arith.maximumf %74, %75 : vector<384x128xf32>
    %77 = math.log %76 : vector<384x128xf32>
    %78 = vector.broadcast %3 : f32 to vector<384x128xf32>
    %79 = arith.mulf %78, %77 : vector<384x128xf32>
    %80 = math.exp %79 : vector<384x128xf32>
    %c0_45 = arith.constant 0 : index
    %c0_46 = arith.constant 0 : index
    %81 = vector.load %arg5[%c0_45, %c0_46] : memref<384x128xf32, #tpu.memory_space<vmem>>, vector<384x128xf32>
    %82 = arith.addf %81, %80 : vector<384x128xf32>
    %c0_47 = arith.constant 0 : index
    %c0_48 = arith.constant 0 : index
    %83 = vector.load %arg5[%c0_47, %c0_48] : memref<384x128xf32, #tpu.memory_space<vmem>>, vector<384x128xf32>
    tpu.vector_store %arg5[%c0_47, %c0_48], %82 {strides = array<i32>} : memref<384x128xf32, #tpu.memory_space<vmem>>, vector<384x128xf32>,
    %c0_i32_49 = arith.constant 0 : i32
    %84 = arith.cmpi eq, %arg1, %c0_i32_49 : i32
    %85 = arith.extui %84 : i1 to i32
    %c0_i32_50 = arith.constant 0 : i32
    %86 = arith.cmpi ne, %85, %c0_i32_50 : i32
    scf.if %86 {
      %c0_51 = arith.constant 0 : index
      %c0_52 = arith.constant 0 : index
      %87 = vector.load %arg5[%c0_51, %c0_52] : memref<384x128xf32, #tpu.memory_space<vmem>>, vector<384x128xf32>
      %cst_53 = arith.constant dense<0.000000e+00> : vector<384xf32>
      %88 = vector.multi_reduction <add>, %87, %cst_53 [1] : vector<384x128xf32> to vector<384xf32>
      %89 = vector.shape_cast %88 : vector<384xf32> to vector<384x1xf32>
      %cst_54 = arith.constant 9.765625E-4 : f32
      %90 = vector.broadcast %cst_54 : f32 to vector<384x1xf32>
      %91 = arith.mulf %89, %90 : vector<384x1xf32>
      %92 = math.log %91 : vector<384x1xf32>
      %cst_55 = arith.constant 1.000000e+00 : f32
      %93 = arith.divf %cst_55, %3 : f32
      %94 = vector.broadcast %93 : f32 to vector<384x1xf32>
      %95 = arith.mulf %92, %94 : vector<384x1xf32>
      %96 = math.exp %95 : vector<384x1xf32>
      %c0_56 = arith.constant 0 : index
      %c0_57 = arith.constant 0 : index
      %97 = vector.load %arg4[%c0_56, %c0_57] : memref<384x1xf32, #tpu.memory_space<vmem>>, vector<384x1xf32>
      tpu.vector_store %arg4[%c0_56, %c0_57], %96 {strides = array<i32>} : memref<384x1xf32, #tpu.memory_space<vmem>>, vector<384x1xf32>,
    } else {
    }
    return
  }
  func.func @transform_0(%arg0: i32, %arg1: i32) -> i32 {
    %c0_i32 = arith.constant 0 : i32
    %c0_i32_0 = arith.constant 0 : i32
    return %c0_i32 : i32
  }
  func.func @transform_1(%arg0: i32, %arg1: i32) -> (i32, i32) {
    %c0_i32 = arith.constant 0 : i32
    return %arg0, %arg1 : i32, i32
  }
  func.func @transform_2(%arg0: i32, %arg1: i32) -> (i32, i32) {
    %c0_i32 = arith.constant 0 : i32
    %c0_i32_0 = arith.constant 0 : i32
    return %arg0, %c0_i32 : i32, i32
  }
}

</mosaic_0001>

<bundles_post_ra>
// kernel: _lambda_.1
= control target key start
LH: loop header
LB: loop body
LE: loop exit
PB: predicated region body
PF: predicated region fallthrough
CT: control target
= control target key end

     0   :  { %s6454_s11 = smov 0   ;;  %s6456_s12 = smov 0   ;;  %s7457_s0 = inlined_call_operand.<no memory space> [shape: f32[1], index: 0, kind: input, shape index: {}]   ;;  %s7458_s1 = inlined_call_operand.vmem [shape: f32[768,1024], index: 1, kind: input, shape index: {}]   ;;  %s7459_s2 = inlined_call_operand.vmem [shape: f32[768,1], index: 2, kind: output, shape index: {}]  }
   0x1   :  { %7 = sst [smem:[#allocation3]] %s7457_s0  ;;  %s6458_s13 = smov 0  }
   0x2 LB: > { %s25_s0 = sadd.s32 1, %s6430_s12  ;;  %p4649_p0 = scmp.ge.s32.totalorder %s6434_s13, 1  ;;  %s6434_s13 = sphi %s6458_s13, %s13_s13   ;;  %s6430_s12 = sphi %s6456_s12, %s7465_s12   ;;  %s6426_s11 = sphi %s6454_s11, %s7464_s11  }
   0x3   : > { %p27_p1 = scmp.ge.s32.totalorder %s25_s0, 2  ;;  %p134_p2 = scmp.lt.s32.totalorder %s6434_s13, 3 }
   0x5   : > { %s7467_s0 = smov (%p27_p1, %s25_s0), 0  ;;  %p135_p3 = pnand %p4649_p0, %p134_p2 }
   0x6   : > { %s161_s14 = smul.u32 (!%p135_p3), 48, %s6426_s11  ;;  %s6480_s19 = sld [smem:[#allocation3]] (!%p135_p3) }
   0x7   : > { %138 = sbr.rel (%p135_p3) target bundleno = 954 (0x3ba), region = 28 }
   0x8   : > { %p163_p4 = scmp.lt.s32.totalorder (!%p135_p3), %s161_s14, 95 }
   0xc   : > { %s7469_s14 = smov (!%p163_p4, %s161_s14), 95  ;;  %v6496_v24 = vstv %s6480_s19  ;;  %vm4525_vm4 = vcmask 7168  }
   0xd   : > { %s4655_s15 = sshll.u32 %s7469_s14, 6  ;;  %vm4370_vm0 = vweird.f32 %v6496_v24  ;;  %s4652_s21 = sshll.u32 %s7469_s14, 3 }
   0xe   : > { %s6478_s18 = scalar_lea.vmem %s7458_s1, %s4655_s15  ;;  %s7307_s24 = scalar_lea.vmem %s7459_s2, %s4652_s21 }
   0xf   : > { %v236_v0 = vld [vmem:[%s6478_s18 + $0x100] sm:$0xff]  ;;  %v717_v1 = vld [vmem:[%s6478_s18 + $0x108] sm:$0xff]  ;;  %v1197_v2 = vld [vmem:[%s6478_s18 + $0x110] sm:$0xff] }
  0x10   : > { %v284_v3 = vmax.f32 %v236_v0, 1e-06  ;;  %v765_v4 = vmax.f32 %v717_v1, 1e-06  ;;  %v1245_v5 = vmax.f32 %v1197_v2, 1e-06 }
  0x11   : > { %v1677_v6 = vld [vmem:[%s6478_s18 + $0x118] sm:$0xff]  ;;  %v2157_v7 = vld [vmem:[%s6478_s18 + $0x120] sm:$0xff]  ;;  %v2637_v8 = vld [vmem:[%s6478_s18 + $0x128] sm:$0xff] }
  0x12   : > { %4682 = vlog2.f32 %v284_v3  ;;  %v1725_v9 = vmax.f32 %v1677_v6, 1e-06  ;;  %v2205_v10 = vmax.f32 %v2157_v7, 1e-06  ;;  %v2685_v11 = vmax.f32 %v2637_v8, 1e-06 }
  0x13   : > { %4684 = vlog2.f32 %v765_v4  ;;  %v3117_v12 = vld [vmem:[%s6478_s18 + $0x130] sm:$0xff]  ;;  %v3597_v13 = vld [vmem:[%s6478_s18 + $0x138] sm:$0xff]  ;;  %v234_v14 = vld [vmem:[%s6478_s18 + $0x80] sm:$0xff] }
  0x14   : > { %4686 = vlog2.f32 %v1245_v5  ;;  %v3165_v15 = vmax.f32 %v3117_v12, 1e-06  ;;  %v3645_v16 = vmax.f32 %v3597_v13, 1e-06  ;;  %v715_v17 = vld [vmem:[%s6478_s18 + $0x88] sm:$0xff]  ;;  %v1195_v18 = vld [vmem:[%s6478_s18 + $0x90] sm:$0xff] }
  0x15   : > { %4688 = vlog2.f32 %v1725_v9  ;;  %v282_v19 = vmax.f32 %v234_v14, 1e-06  ;;  %v1675_v20 = vld [vmem:[%s6478_s18 + $0x98] sm:$0xff]  ;;  %v763_v21 = vmax.f32 %v715_v17, 1e-06  ;;  %v2155_v22 = vld [vmem:[%s6478_s18 + $0xa0] sm:$0xff] }
  0x16   : > { %4690 = vlog2.f32 %v2205_v10  ;;  %v1243_v25 = vmax.f32 %v1195_v18, 1e-06  ;;  %v1723_v28 = vmax.f32 %v1675_v20, 1e-06  ;;  %v2203_v31 = vmax.f32 %v2155_v22, 1e-06 }
  0x17   : > { %4692 = vlog2.f32 %v2685_v11  ;;  %v2635_v10 = vld [vmem:[%s6478_s18 + $0xa8] sm:$0xff]  ;;  %v3115_v14 = vld [vmem:[%s6478_s18 + $0xb0] sm:$0xff] }
  0x18   : > { %v4683_v23 = vpop.eup %4682  ;;  %4694 = vlog2.f32 %v3165_v15  ;;  %v2683_v22 = vmax.f32 %v2635_v10, 1e-06 }
  0x19   : > { %v4685_v26 = vpop.eup %4684  ;;  %v337_v27 = vmul.f32 0.6931472, %v4683_v23  ;;  %4696 = vlog2.f32 %v3645_v16  ;;  %v232_v23 = vld [vmem:[%s6478_s18] sm:$0xff] }
  0x1a   : > { %v4687_v29 = vpop.eup %4686  ;;  %v818_v30 = vmul.f32 0.6931472, %v4685_v26  ;;  %4698 = vlog2.f32 %v282_v19  ;;  %v3595_v19 = vld [vmem:[%s6478_s18 + $0xb8] sm:$0xff] }
  0x1b   : > { %v4689_v32 = vpop.eup %4688  ;;  %v429_v33 = vmul.f32 %v6496_v24, %v337_v27  ;;  %v1298_v34 = vmul.f32 0.6931472, %v4687_v29  ;;  %4700 = vlog2.f32 %v763_v21  ;;  %v713_v29 = vld [vmem:[%s6478_s18 + $0x8] sm:$0xff] }
  0x1c   : > { %v4691_v35 = vpop.eup %4690  ;;  %v909_v36 = vmul.f32 %v818_v30, %v6496_v24  ;;  %v1778_v37 = vmul.f32 0.6931472, %v4689_v32  ;;  %4702 = vlog2.f32 %v1243_v25  ;;  %v1193_v32 = vld [vmem:[%s6478_s18 + $0x10] sm:$0xff] }
  0x1d   : > { %v4693_v38 = vpop.eup %4692  ;;  %v481_v39 = vmul.f32 1.442695, %v429_v33  ;;  %v1389_v40 = vmul.f32 %v1298_v34, %v6496_v24  ;;  %v2258_v41 = vmul.f32 0.6931472, %v4691_v35  ;;  %4704 = vlog2.f32 %v1723_v28 }
  0x1e   : > { %v4695_v42 = vpop.eup %4694  ;;  %v961_v43 = vmul.f32 1.442695, %v909_v36  ;;  %v1869_v44 = vmul.f32 %v1778_v37, %v6496_v24  ;;  %v2738_v45 = vmul.f32 0.6931472, %v4693_v38  ;;  %4706 = vlog2.f32 %v2203_v31  ;;  %v1673_v36 = vld [vmem:[%s6478_s18 + $0x18] sm:$0xff] }
  0x1f   : > { %v4697_v46 = vpop.eup %4696  ;;  %4708 = vpow2.f32 %v481_v39  ;;  %v1441_v47 = vmul.f32 1.442695, %v1389_v40  ;;  %v2349_v48 = vmul.f32 %v2258_v41, %v6496_v24  ;;  %v3218_v49 = vmul.f32 0.6931472, %v4695_v42  ;;  %v2153_v39 = vld [vmem:[%s6478_s18 + $0x20] sm:$0xff] }
  0x20   : > { %v4699_v50 = vpop.eup %4698  ;;  %4710 = vpow2.f32 %v961_v43  ;;  %v1921_v51 = vmul.f32 1.442695, %v1869_v44  ;;  %v2829_v52 = vmul.f32 %v2738_v45, %v6496_v24  ;;  %v3698_v53 = vmul.f32 0.6931472, %v4697_v46  ;;  %v2633_v43 = vld [vmem:[%s6478_s18 + $0x28] sm:$0xff]  ;;  %v3113_v46 = vld [vmem:[%s6478_s18 + $0x30] sm:$0xff] }
  0x21   : > { %v4701_v54 = vpop.eup %4700  ;;  %4712 = vpow2.f32 %v1441_v47  ;;  %v2401_v55 = vmul.f32 1.442695, %v2349_v48  ;;  %v3309_v56 = vmul.f32 %v3218_v49, %v6496_v24  ;;  %v333_v57 = vmul.f32 0.6931472, %v4699_v50 }
  0x22   : > { %v4703_v58 = vpop.eup %4702  ;;  %4714 = vpow2.f32 %v1921_v51  ;;  %v2881_v59 = vmul.f32 1.442695, %v2829_v52  ;;  %v3789_v60 = vmul.f32 %v3698_v53, %v6496_v24  ;;  %v814_v61 = vmul.f32 0.6931472, %v4701_v54  ;;  %v3593_v51 = vld [vmem:[%s6478_s18 + $0x38] sm:$0xff]  ;;  %v237_v52 = vld [vmem:[%s6478_s18 + $0x140] sm:$0xff] }
  0x23   : > { %v4705_v62 = vpop.eup %4704  ;;  %4716 = vpow2.f32 %v2401_v55  ;;  %v3361_v63 = vmul.f32 1.442695, %v3309_v56  ;;  %v427_v0 = vmul.f32 %v6496_v24, %v333_v57  ;;  %v1294_v1 = vmul.f32 0.6931472, %v4703_v58 }
  0x24   : > { %v4707_v2 = vpop.eup %4706  ;;  %4718 = vpow2.f32 %v2881_v59  ;;  %v3841_v3 = vmul.f32 1.442695, %v3789_v60  ;;  %v907_v4 = vmul.f32 %v814_v61, %v6496_v24  ;;  %v1774_v5 = vmul.f32 0.6931472, %v4705_v62  ;;  %v718_v59 = vld [vmem:[%s6478_s18 + $0x148] sm:$0xff] }
  0x25   : > { %v4709_v6 = vpop.eup %4708  ;;  %4720 = vpow2.f32 %v3361_v63  ;;  %v477_v7 = vmul.f32 1.442695, %v427_v0  ;;  %v1387_v8 = vmul.f32 %v1294_v1, %v6496_v24  ;;  %v2254_v9 = vmul.f32 0.6931472, %v4707_v2 }
  0x26   : > { %v4711_v11 = vpop.eup %4710  ;;  %4722 = vpow2.f32 %v3841_v3  ;;  %v957_v12 = vmul.f32 1.442695, %v907_v4  ;;  %v1867_v13 = vmul.f32 %v1774_v5, %v6496_v24  ;;  %v3163_v28 = vmax.f32 %v3115_v14, 1e-06 }
  0x27   : > { %v4713_v15 = vpop.eup %4712  ;;  %v1101_v16 = vadd.f32 %v4711_v11, %v4709_v6  ;;  %4724 = vpow2.f32 %v477_v7  ;;  %v1437_v17 = vmul.f32 1.442695, %v1387_v8  ;;  %v2347_v18 = vmul.f32 %v2254_v9, %v6496_v24 }
  0x28   : > { %v4715_v20 = vpop.eup %4714  ;;  %4726 = vpow2.f32 %v957_v12  ;;  %v1917_v21 = vmul.f32 1.442695, %v1867_v13  ;;  %v3643_v31 = vmax.f32 %v3595_v19, 1e-06  ;;  %v280_v35 = vmax.f32 %v232_v23, 1e-06 }
  0x29   : > { %v4717_v25 = vpop.eup %4716  ;;  %v1581_v26 = vadd.f32 %v4713_v15, %v1101_v16  ;;  %4728 = vpow2.f32 %v1437_v17  ;;  %v2397_v27 = vmul.f32 1.442695, %v2347_v18  ;;  %v761_v38 = vmax.f32 %v713_v29, 1e-06 }
  0x2a   : > { %v4719_v30 = vpop.eup %4718  ;;  %4730 = vpow2.f32 %v1917_v21  ;;  %v1241_v42 = vmax.f32 %v1193_v32, 1e-06  ;;  %v1721_v45 = vmax.f32 %v1673_v36, 1e-06  ;;  %v2201_v50 = vmax.f32 %v2153_v39, 1e-06 }
  0x2b   : > { %v4721_v33 = vpop.eup %4720  ;;  %v2061_v34 = vadd.f32 %v4715_v20, %v1581_v26  ;;  %4732 = vpow2.f32 %v2397_v27  ;;  %v2681_v54 = vmax.f32 %v2633_v43, 1e-06  ;;  %v3161_v58 = vmax.f32 %v3113_v46, 1e-06 }
  0x2c   : > { %v4723_v37 = vpop.eup %4722  ;;  %4734 = vlog2.f32 %v2683_v22  ;;  %v3641_v61 = vmax.f32 %v3593_v51, 1e-06  ;;  %v285_v62 = vmax.f32 %v237_v52, 1e-06  ;;  %v766_v5 = vmax.f32 %v718_v59, 1e-06 }
  0x2d   : > { %v4725_v40 = vpop.eup %4724  ;;  %v2541_v41 = vadd.f32 %v4717_v25, %v2061_v34  ;;  %4736 = vlog2.f32 %v3163_v28  ;;  %v2158_v59 = vld [vmem:[%s6478_s18 + $0x160] sm:$0xff] }
  0x2e   : > { %v4727_v44 = vpop.eup %4726  ;;  %4738 = vlog2.f32 %v3643_v31 }
  0x2f   : > { %v4729_v47 = vpop.eup %4728  ;;  %v3021_v48 = vadd.f32 %v4719_v30, %v2541_v41  ;;  %v1099_v49 = vadd.f32 %v4727_v44, %v4725_v40  ;;  %4740 = vlog2.f32 %v280_v35 }
  0x30   : > { %v4731_v53 = vpop.eup %4730  ;;  %4742 = vlog2.f32 %v761_v38 }
  0x31   : > { %v4733_v55 = vpop.eup %4732  ;;  %v3501_v56 = vadd.f32 %v4721_v33, %v3021_v48  ;;  %v1579_v57 = vadd.f32 %v4729_v47, %v1099_v49  ;;  %4744 = vlog2.f32 %v1241_v42 }
  0x32   : > { %v4735_v60 = vpop.eup %4734  ;;  %4746 = vlog2.f32 %v1721_v45 }
  0x33   : > { %v4737_v63 = vpop.eup %4736  ;;  %v3981_v0 = vadd.f32 %v4723_v37, %v3501_v56  ;;  %v2059_v1 = vadd.f32 %v4731_v53, %v1579_v57  ;;  %v2734_v2 = vmul.f32 0.6931472, %v4735_v60  ;;  %4748 = vlog2.f32 %v2201_v50  ;;  %v1198_v50 = vld [vmem:[%s6478_s18 + $0x150] sm:$0xff] }
  0x34   : > { %v4739_v3 = vpop.eup %4738  ;;  %v3214_v4 = vmul.f32 0.6931472, %v4737_v63  ;;  %4750 = vlog2.f32 %v2681_v54  ;;  %v1246_v63 = vmax.f32 %v1198_v50, 1e-06 }
  0x35   : > { %v4741_v6 = vpop.eup %4740  ;;  %4132 = vadd.xlane.f32.xlu2 %v3981_v0  ;;  %v2827_v7 = vmul.f32 %v2734_v2, %v6496_v24  ;;  %v3694_v8 = vmul.f32 0.6931472, %v4739_v3  ;;  %4752 = vlog2.f32 %v3161_v58  ;;  %v2539_v10 = vadd.f32 %v4733_v55, %v2059_v1  ;;  %v1678_v55 = vld [vmem:[%s6478_s18 + $0x158] sm:$0xff]  ;;  %v2638_v0 = vld [vmem:[%s6478_s18 + $0x168] sm:$0xff] }
  0x36   : > { %v4743_v9 = vpop.eup %4742  ;;  %v3307_v11 = vmul.f32 %v3214_v4, %v6496_v24  ;;  %v329_v12 = vmul.f32 0.6931472, %v4741_v6  ;;  %4754 = vlog2.f32 %v3641_v61  ;;  %v1726_v3 = vmax.f32 %v1678_v55, 1e-06  ;;  %v3118_v4 = vld [vmem:[%s6478_s18 + $0x170] sm:$0xff] }
  0x37   : > { %v4745_v13 = vpop.eup %4744  ;;  %v2877_v14 = vmul.f32 1.442695, %v2827_v7  ;;  %v3787_v15 = vmul.f32 %v3694_v8, %v6496_v24  ;;  %v810_v16 = vmul.f32 0.6931472, %v4743_v9  ;;  %4756 = vlog2.f32 %v285_v62  ;;  %v3598_v9 = vld [vmem:[%s6478_s18 + $0x178] sm:$0xff] }
  0x38   : > { %v4747_v17 = vpop.eup %4746  ;;  %v3357_v18 = vmul.f32 1.442695, %v3307_v11  ;;  %v425_v19 = vmul.f32 %v6496_v24, %v329_v12  ;;  %v1290_v20 = vmul.f32 0.6931472, %v4745_v13  ;;  %4758 = vlog2.f32 %v766_v5  ;;  %v235_v12 = vld [vmem:[%s6478_s18 + $0xc0] sm:$0xff] }
  0x39   : > { %v4749_v21 = vpop.eup %4748  ;;  %4760 = vpow2.f32 %v2877_v14  ;;  %v3837_v22 = vmul.f32 1.442695, %v3787_v15  ;;  %v905_v23 = vmul.f32 %v810_v16, %v6496_v24  ;;  %v1770_v25 = vmul.f32 0.6931472, %v4747_v17  ;;  %v716_v16 = vld [vmem:[%s6478_s18 + $0xc8] sm:$0xff] }
  0x3a   : > { %v4751_v26 = vpop.eup %4750  ;;  %4762 = vpow2.f32 %v3357_v18  ;;  %v473_v27 = vmul.f32 1.442695, %v425_v19  ;;  %v1385_v28 = vmul.f32 %v1290_v20, %v6496_v24  ;;  %v2250_v29 = vmul.f32 0.6931472, %v4749_v21  ;;  %v1196_v19 = vld [vmem:[%s6478_s18 + $0xd0] sm:$0xff] }
  0x3b   : > { %v4753_v30 = vpop.eup %4752  ;;  %4764 = vpow2.f32 %v3837_v22  ;;  %v953_v31 = vmul.f32 1.442695, %v905_v23  ;;  %v1865_v32 = vmul.f32 %v1770_v25, %v6496_v24  ;;  %v2730_v33 = vmul.f32 0.6931472, %v4751_v26  ;;  %v1676_v23 = vld [vmem:[%s6478_s18 + $0xd8] sm:$0xff] }
  0x3c   : > { %v4755_v34 = vpop.eup %4754  ;;  %4766 = vpow2.f32 %v473_v27  ;;  %v1433_v35 = vmul.f32 1.442695, %v1385_v28  ;;  %v2345_v36 = vmul.f32 %v2250_v29, %v6496_v24  ;;  %v3210_v37 = vmul.f32 0.6931472, %v4753_v30  ;;  %v2156_v27 = vld [vmem:[%s6478_s18 + $0xe0] sm:$0xff] }
  0x3d   : > { %v4757_v38 = vpop.eup %4756  ;;  %4768 = vpow2.f32 %v953_v31  ;;  %v1913_v39 = vmul.f32 1.442695, %v1865_v32  ;;  %v2825_v40 = vmul.f32 %v2730_v33, %v6496_v24  ;;  %v3690_v41 = vmul.f32 0.6931472, %v4755_v34  ;;  %v2636_v31 = vld [vmem:[%s6478_s18 + $0xe8] sm:$0xff]  ;;  %v3116_v34 = vld [vmem:[%s6478_s18 + $0xf0] sm:$0xff] }
  0x3e   : > { %v4759_v42 = vpop.eup %4758  ;;  %4770 = vpow2.f32 %v1433_v35  ;;  %v2393_v43 = vmul.f32 1.442695, %v2345_v36  ;;  %v3305_v44 = vmul.f32 %v3210_v37, %v6496_v24  ;;  %v339_v45 = vmul.f32 0.6931472, %v4757_v38 }
  0x3f   : > { %v4761_v46 = vpop.eup %4760  ;;  %4772 = vpow2.f32 %v1913_v39  ;;  %v2873_v47 = vmul.f32 1.442695, %v2825_v40  ;;  %v3785_v48 = vmul.f32 %v3690_v41, %v6496_v24  ;;  %v820_v49 = vmul.f32 0.6931472, %v4759_v42 }
  0x40   : > { %v4763_v51 = vpop.eup %4762  ;;  %v3019_v52 = vadd.f32 %v4761_v46, %v2539_v10  ;;  %4774 = vpow2.f32 %v2393_v43  ;;  %v3353_v53 = vmul.f32 1.442695, %v3305_v44  ;;  %v430_v54 = vmul.f32 %v6496_v24, %v339_v45 }
  0x41   : > { %v4765_v56 = vpop.eup %4764  ;;  %4776 = vpow2.f32 %v2873_v47  ;;  %v3833_v57 = vmul.f32 1.442695, %v3785_v48  ;;  %v910_v58 = vmul.f32 %v820_v49, %v6496_v24  ;;  %v2206_v8 = vmax.f32 %v2158_v59, 1e-06 }
  0x42   : > { %v4767_v60 = vpop.eup %4766  ;;  %v3499_v61 = vadd.f32 %v4763_v51, %v3019_v52  ;;  %4778 = vpow2.f32 %v3353_v53  ;;  %v483_v62 = vmul.f32 1.442695, %v430_v54  ;;  %v2686_v11 = vmax.f32 %v2638_v0, 1e-06 }
  0x43   : > { %v4769_v1 = vpop.eup %4768  ;;  %4780 = vpow2.f32 %v3833_v57  ;;  %v963_v2 = vmul.f32 1.442695, %v910_v58  ;;  %v3166_v15 = vmax.f32 %v3118_v4, 1e-06  ;;  %v3646_v18 = vmax.f32 %v3598_v9, 1e-06 }
  0x44   : > { %v4771_v5 = vpop.eup %4770  ;;  %v3979_v6 = vadd.f32 %v4765_v56, %v3499_v61  ;;  %v1097_v7 = vadd.f32 %v4769_v1, %v4767_v60  ;;  %4782 = vpow2.f32 %v483_v62  ;;  %v283_v22 = vmax.f32 %v235_v12, 1e-06 }
  0x45   : > { %v4773_v10 = vpop.eup %4772  ;;  %4784 = vpow2.f32 %v963_v2  ;;  %v764_v26 = vmax.f32 %v716_v16, 1e-06  ;;  %v1244_v30 = vmax.f32 %v1196_v19, 1e-06  ;;  %v1724_v33 = vmax.f32 %v1676_v23, 1e-06 }
  0x46   : > { %v4775_v13 = vpop.eup %4774  ;;  %4128 = vadd.xlane.f32.xlu1 %v3979_v6  ;;  %v1577_v14 = vadd.f32 %v4771_v5, %v1097_v7  ;;  %4786 = vlog2.f32 %v1246_v63  ;;  %v2204_v37 = vmax.f32 %v2156_v27, 1e-06  ;;  %v2684_v40 = vmax.f32 %v2636_v31, 1e-06  ;;  %v233_v31 = vld [vmem:[%s6478_s18 + $0x40] sm:$0xff] }
  0x47   : > { %v4777_v17 = vpop.eup %4776  ;;  %4788 = vlog2.f32 %v1726_v3  ;;  %v3164_v44 = vmax.f32 %v3116_v34, 1e-06 }
  0x48   : > { %v4779_v20 = vpop.eup %4778  ;;  %v2057_v21 = vadd.f32 %v4773_v10, %v1577_v14  ;;  %4790 = vlog2.f32 %v2206_v8 }
  0x49   : > { %v4781_v25 = vpop.eup %4780  ;;  %4792 = vlog2.f32 %v2686_v11 }
  0x4a   : > { %v4783_v28 = vpop.eup %4782  ;;  %v2537_v29 = vadd.f32 %v4775_v13, %v2057_v21  ;;  %4794 = vlog2.f32 %v3166_v15 }
  0x4b   : > { %v4785_v32 = vpop.eup %4784  ;;  %4796 = vlog2.f32 %v3646_v18 }
  0x4c   : > { %v4787_v35 = vpop.eup %4786  ;;  %v3017_v36 = vadd.f32 %v4777_v17, %v2537_v29  ;;  %4798 = vlog2.f32 %v283_v22  ;;  %v1102_v46 = vadd.f32 %v4785_v32, %v4783_v28 }
  0x4d   : > { %v4789_v38 = vpop.eup %4788  ;;  %v1300_v39 = vmul.f32 0.6931472, %v4787_v35  ;;  %4800 = vlog2.f32 %v764_v26  ;;  %v3596_v26 = vld [vmem:[%s6478_s18 + $0xf8] sm:$0xff]  ;;  %v714_v35 = vld [vmem:[%s6478_s18 + $0x48] sm:$0xff] }
  0x4e   : > { %v4791_v41 = vpop.eup %4790  ;;  %v3497_v42 = vadd.f32 %v4779_v20, %v3017_v36  ;;  %v1780_v43 = vmul.f32 0.6931472, %v4789_v38  ;;  %4802 = vlog2.f32 %v1244_v30 }
  0x4f   : > { %v4793_v45 = vpop.eup %4792  ;;  %v1390_v47 = vmul.f32 %v1300_v39, %v6496_v24  ;;  %v2260_v48 = vmul.f32 0.6931472, %v4791_v41  ;;  %4804 = vlog2.f32 %v1724_v33  ;;  %v3644_v39 = vmax.f32 %v3596_v26, 1e-06 }
  0x50   : > { %v4795_v49 = vpop.eup %4794  ;;  %v3977_v50 = vadd.f32 %v4781_v25, %v3497_v42  ;;  %v1870_v51 = vmul.f32 %v1780_v43, %v6496_v24  ;;  %v2740_v52 = vmul.f32 0.6931472, %v4793_v45  ;;  %4806 = vlog2.f32 %v2204_v37 }
  0x51   : > { %v4797_v53 = vpop.eup %4796  ;;  %v1443_v54 = vmul.f32 1.442695, %v1390_v47  ;;  %v2350_v55 = vmul.f32 %v2260_v48, %v6496_v24  ;;  %v3220_v56 = vmul.f32 0.6931472, %v4795_v49  ;;  %4808 = vlog2.f32 %v2684_v40  ;;  %v1194_v40 = vld [vmem:[%s6478_s18 + $0x50] sm:$0xff]  ;;  %v2154_v48 = vld [vmem:[%s6478_s18 + $0x60] sm:$0xff] }
  0x52   : > { %v4799_v57 = vpop.eup %4798  ;;  %4124 = vadd.xlane.f32.xlu0 %v3977_v50  ;;  %v1923_v58 = vmul.f32 1.442695, %v1870_v51  ;;  %v2830_v59 = vmul.f32 %v2740_v52, %v6496_v24  ;;  %v3700_v60 = vmul.f32 0.6931472, %v4797_v53  ;;  %4810 = vlog2.f32 %v3164_v44  ;;  %v1674_v44 = vld [vmem:[%s6478_s18 + $0x58] sm:$0xff]  ;;  %v2634_v51 = vld [vmem:[%s6478_s18 + $0x68] sm:$0xff] }
  0x53   : > { %v4801_v61 = vpop.eup %4800  ;;  %4812 = vpow2.f32 %v1443_v54  ;;  %v2403_v62 = vmul.f32 1.442695, %v2350_v55  ;;  %v3310_v63 = vmul.f32 %v3220_v56, %v6496_v24  ;;  %v335_v0 = vmul.f32 0.6931472, %v4799_v57  ;;  %v3114_v55 = vld [vmem:[%s6478_s18 + $0x70] sm:$0xff] }
  0x54   : > { %v4803_v1 = vpop.eup %4802  ;;  %4814 = vpow2.f32 %v1923_v58  ;;  %v2883_v2 = vmul.f32 1.442695, %v2830_v59  ;;  %v3790_v3 = vmul.f32 %v3700_v60, %v6496_v24  ;;  %v816_v4 = vmul.f32 0.6931472, %v4801_v61  ;;  %v3594_v59 = vld [vmem:[%s6478_s18 + $0x78] sm:$0xff] }
  0x55   : > { %v4805_v5 = vpop.eup %4804  ;;  %4816 = vpow2.f32 %v2403_v62  ;;  %v3363_v6 = vmul.f32 1.442695, %v3310_v63  ;;  %v428_v7 = vmul.f32 %v6496_v24, %v335_v0  ;;  %v1296_v8 = vmul.f32 0.6931472, %v4803_v1  ;;  %v240_v63 = vld [vmem:[%s6478_s18 + $0x200] sm:$0xff] }
  0x56   : > { %v4807_v9 = vpop.eup %4806  ;;  %4818 = vpow2.f32 %v2883_v2  ;;  %v3843_v10 = vmul.f32 1.442695, %v3790_v3  ;;  %v908_v11 = vmul.f32 %v816_v4, %v6496_v24  ;;  %v1776_v12 = vmul.f32 0.6931472, %v4805_v5  ;;  %v721_v3 = vld [vmem:[%s6478_s18 + $0x208] sm:$0xff] }
  0x57   : > { %v4809_v13 = vpop.eup %4808  ;;  %4820 = vpow2.f32 %v3363_v6  ;;  %v479_v14 = vmul.f32 1.442695, %v428_v7  ;;  %v1388_v15 = vmul.f32 %v1296_v8, %v6496_v24  ;;  %v2256_v16 = vmul.f32 0.6931472, %v4807_v9 }
  0x58   : > { %v4811_v17 = vpop.eup %4810  ;;  %4822 = vpow2.f32 %v3843_v10  ;;  %v959_v18 = vmul.f32 1.442695, %v908_v11  ;;  %v1868_v19 = vmul.f32 %v1776_v12, %v6496_v24  ;;  %v2736_v20 = vmul.f32 0.6931472, %v4809_v13  ;;  %v1201_v10 = vld [vmem:[%s6478_s18 + $0x210] sm:$0xff] }
  0x59   : > { %v4813_v21 = vpop.eup %4812  ;;  %4824 = vpow2.f32 %v479_v14  ;;  %v1439_v22 = vmul.f32 1.442695, %v1388_v15  ;;  %v2348_v23 = vmul.f32 %v2256_v16, %v6496_v24  ;;  %v3216_v25 = vmul.f32 0.6931472, %v4811_v17 }
  0x5a   : > { %v4815_v27 = vpop.eup %4814  ;;  %v1582_v28 = vadd.f32 %v4813_v21, %v1102_v46  ;;  %4826 = vpow2.f32 %v959_v18  ;;  %v1919_v29 = vmul.f32 1.442695, %v1868_v19  ;;  %v2828_v30 = vmul.f32 %v2736_v20, %v6496_v24 }
  0x5b   : > { %v4817_v32 = vpop.eup %4816  ;;  %4828 = vpow2.f32 %v1439_v22  ;;  %v2399_v33 = vmul.f32 1.442695, %v2348_v23  ;;  %v3308_v34 = vmul.f32 %v3216_v25, %v6496_v24  ;;  %v281_v43 = vmax.f32 %v233_v31, 1e-06 }
  0x5c   : > { %v4819_v36 = vpop.eup %4818  ;;  %v2062_v37 = vadd.f32 %v4815_v27, %v1582_v28  ;;  %4830 = vpow2.f32 %v1919_v29  ;;  %v2879_v38 = vmul.f32 1.442695, %v2828_v30  ;;  %v762_v47 = vmax.f32 %v714_v35, 1e-06 }
  0x5d   : > { %v4821_v41 = vpop.eup %4820  ;;  %4832 = vpow2.f32 %v2399_v33  ;;  %v3359_v42 = vmul.f32 1.442695, %v3308_v34  ;;  %v1242_v50 = vmax.f32 %v1194_v40, 1e-06  ;;  %v1722_v54 = vmax.f32 %v1674_v44, 1e-06 }
  0x5e   : > { %v4823_v45 = vpop.eup %4822  ;;  %v2542_v46 = vadd.f32 %v4817_v32, %v2062_v37  ;;  %4834 = vpow2.f32 %v2879_v38  ;;  %v2202_v58 = vmax.f32 %v2154_v48, 1e-06  ;;  %v2682_v62 = vmax.f32 %v2634_v51, 1e-06 }
  0x5f   : > { %v4825_v49 = vpop.eup %4824  ;;  %4836 = vpow2.f32 %v3359_v42  ;;  %v3162_v2 = vmax.f32 %v3114_v55, 1e-06  ;;  %v3642_v6 = vmax.f32 %v3594_v59, 1e-06  ;;  %v288_v9 = vmax.f32 %v240_v63, 1e-06 }
  0x60   : > { %v4827_v52 = vpop.eup %4826  ;;  %v3022_v53 = vadd.f32 %v4819_v36, %v2542_v46  ;;  %4838 = vlog2.f32 %v3644_v39  ;;  %v769_v12 = vmax.f32 %v721_v3, 1e-06  ;;  %v1249_v18 = vmax.f32 %v1201_v10, 1e-06  ;;  %v1681_v55 = vld [vmem:[%s6478_s18 + $0x218] sm:$0xff]  ;;  %v2161_v63 = vld [vmem:[%s6478_s18 + $0x220] sm:$0xff] }
  0x61   : > { %v4829_v56 = vpop.eup %4828  ;;  %v1100_v57 = vadd.f32 %v4827_v52, %v4825_v49  ;;  %4840 = vlog2.f32 %v281_v43  ;;  %v1729_v3 = vmax.f32 %v1681_v55, 1e-06 }
  0x62   : > { %v4831_v60 = vpop.eup %4830  ;;  %v3502_v61 = vadd.f32 %v4821_v41, %v3022_v53  ;;  %4842 = vlog2.f32 %v762_v47 }
  0x63   : > { %v4833_v0 = vpop.eup %4832  ;;  %v1580_v1 = vadd.f32 %v4829_v56, %v1100_v57  ;;  %4844 = vlog2.f32 %v1242_v50 }
  0x64   : > { %v4835_v4 = vpop.eup %4834  ;;  %v3982_v5 = vadd.f32 %v4823_v45, %v3502_v61  ;;  %4846 = vlog2.f32 %v1722_v54 }
  0x65   : > { %v4837_v7 = vpop.eup %4836  ;;  %v2060_v8 = vadd.f32 %v4831_v60, %v1580_v1  ;;  %4848 = vlog2.f32 %v2202_v58 }
  0x66   : > { %v4839_v11 = vpop.eup %4838  ;;  %4134 = vadd.xlane.f32.xlu2 %v3982_v5  ;;  %4850 = vlog2.f32 %v2682_v62 }
  0x67   : > { %v4841_v13 = vpop.eup %4840  ;;  %v2540_v14 = vadd.f32 %v4833_v0, %v2060_v8  ;;  %v3696_v15 = vmul.f32 0.6931472, %v4839_v11  ;;  %4852 = vlog2.f32 %v3162_v2  ;;  %v3121_v8 = vld [vmem:[%s6478_s18 + $0x230] sm:$0xff]  ;;  %v2209_v11 = vmax.f32 %v2161_v63, 1e-06 }
  0x68   : > { %v4843_v16 = vpop.eup %4842  ;;  %v331_v17 = vmul.f32 0.6931472, %v4841_v13  ;;  %4854 = vlog2.f32 %v3642_v6 }
  0x69   : > { %v4845_v19 = vpop.eup %4844  ;;  %v3020_v20 = vadd.f32 %v4835_v4, %v2540_v14  ;;  %v3788_v21 = vmul.f32 %v3696_v15, %v6496_v24  ;;  %v812_v22 = vmul.f32 0.6931472, %v4843_v16  ;;  %4856 = vlog2.f32 %v288_v9  ;;  %v2641_v4 = vld [vmem:[%s6478_s18 + $0x228] sm:$0xff]  ;;  %v239_v16 = vld [vmem:[%s6478_s18 + $0x1c0] sm:$0xff] }
  0x6a   : > { %v4847_v23 = vpop.eup %4846  ;;  %v426_v25 = vmul.f32 %v6496_v24, %v331_v17  ;;  %v1292_v26 = vmul.f32 0.6931472, %v4845_v19  ;;  %4858 = vlog2.f32 %v769_v12  ;;  %v3601_v12 = vld [vmem:[%s6478_s18 + $0x238] sm:$0xff]  ;;  %v2689_v15 = vmax.f32 %v2641_v4, 1e-06 }
  0x6b   : > { %v4849_v27 = vpop.eup %4848  ;;  %v3500_v28 = vadd.f32 %v4837_v7, %v3020_v20  ;;  %v3839_v29 = vmul.f32 1.442695, %v3788_v21  ;;  %v906_v30 = vmul.f32 %v812_v22, %v6496_v24  ;;  %v1772_v31 = vmul.f32 0.6931472, %v4847_v23  ;;  %v720_v20 = vld [vmem:[%s6478_s18 + $0x1c8] sm:$0xff]  ;;  %v1200_v23 = vld [vmem:[%s6478_s18 + $0x1d0] sm:$0xff] }
  0x6c   : > { %v4851_v32 = vpop.eup %4850  ;;  %v475_v33 = vmul.f32 1.442695, %v426_v25  ;;  %v1386_v34 = vmul.f32 %v1292_v26, %v6496_v24  ;;  %v2252_v35 = vmul.f32 0.6931472, %v4849_v27  ;;  %4860 = vlog2.f32 %v1249_v18 }
  0x6d   : > { %v4853_v36 = vpop.eup %4852  ;;  %4862 = vpow2.f32 %v3839_v29  ;;  %v955_v37 = vmul.f32 1.442695, %v906_v30  ;;  %v1866_v38 = vmul.f32 %v1772_v31, %v6496_v24  ;;  %v2732_v39 = vmul.f32 0.6931472, %v4851_v32  ;;  %v2160_v31 = vld [vmem:[%s6478_s18 + $0x1e0] sm:$0xff] }
  0x6e   : > { %v4855_v40 = vpop.eup %4854  ;;  %4864 = vpow2.f32 %v475_v33  ;;  %v1435_v41 = vmul.f32 1.442695, %v1386_v34  ;;  %v2346_v42 = vmul.f32 %v2252_v35, %v6496_v24  ;;  %v3212_v43 = vmul.f32 0.6931472, %v4853_v36  ;;  %v2640_v35 = vld [vmem:[%s6478_s18 + $0x1e8] sm:$0xff] }
  0x6f   : > { %v4857_v44 = vpop.eup %4856  ;;  %4866 = vpow2.f32 %v955_v37  ;;  %v1915_v45 = vmul.f32 1.442695, %v1866_v38  ;;  %v2826_v46 = vmul.f32 %v2732_v39, %v6496_v24  ;;  %v3692_v47 = vmul.f32 0.6931472, %v4855_v40  ;;  %v3120_v38 = vld [vmem:[%s6478_s18 + $0x1f0] sm:$0xff] }
  0x70   : > { %v4859_v48 = vpop.eup %4858  ;;  %4868 = vpow2.f32 %v1435_v41  ;;  %v2395_v49 = vmul.f32 1.442695, %v2346_v42  ;;  %v3306_v50 = vmul.f32 %v3212_v43, %v6496_v24  ;;  %v345_v51 = vmul.f32 0.6931472, %v4857_v44 }
  0x71   : > { %4870 = vpow2.f32 %v1915_v45  ;;  %v2875_v52 = vmul.f32 1.442695, %v2826_v46  ;;  %v3786_v53 = vmul.f32 %v3692_v47, %v6496_v24  ;;  %v826_v54 = vmul.f32 0.6931472, %v4859_v48  ;;  %v3600_v45 = vld [vmem:[%s6478_s18 + $0x1f8] sm:$0xff] }
  0x72   : > { %v4861_v56 = vpop.eup %4860  ;;  %4872 = vpow2.f32 %v2395_v49  ;;  %v3355_v57 = vmul.f32 1.442695, %v3306_v50  ;;  %v433_v58 = vmul.f32 %v6496_v24, %v345_v51  ;;  %v3169_v19 = vmax.f32 %v3121_v8, 1e-06 }
  0x73   : > { %v4863_v59 = vpop.eup %4862  ;;  %4874 = vpow2.f32 %v2875_v52  ;;  %v3835_v60 = vmul.f32 1.442695, %v3786_v53  ;;  %v913_v61 = vmul.f32 %v826_v54, %v6496_v24  ;;  %v1306_v62 = vmul.f32 0.6931472, %v4861_v56 }
  0x74   : > { %v4865_v0 = vpop.eup %4864  ;;  %v3980_v1 = vadd.f32 %v4863_v59, %v3500_v28  ;;  %4876 = vpow2.f32 %v3355_v57  ;;  %v489_v2 = vmul.f32 1.442695, %v433_v58  ;;  %v3649_v22 = vmax.f32 %v3601_v12, 1e-06  ;;  %v1680_v28 = vld [vmem:[%s6478_s18 + $0x1d8] sm:$0xff] }
  0x75   : > { %v4867_v5 = vpop.eup %4866  ;;  %4878 = vpow2.f32 %v3835_v60  ;;  %v969_v6 = vmul.f32 1.442695, %v913_v61  ;;  %v1393_v7 = vmul.f32 %v1306_v62, %v6496_v24  ;;  %v287_v27 = vmax.f32 %v239_v16, 1e-06 }
  0x76   : > { %v4869_v9 = vpop.eup %4868  ;;  %4130 = vadd.xlane.f32.xlu1 %v3980_v1  ;;  %v1098_v10 = vadd.f32 %v4867_v5, %v4865_v0  ;;  %4880 = vpow2.f32 %v489_v2  ;;  %v768_v30 = vmax.f32 %v720_v20, 1e-06  ;;  %v1248_v34 = vmax.f32 %v1200_v23, 1e-06 }
  0x77   : > { %v4871_v13 = vpop.eup %4870  ;;  %4882 = vpow2.f32 %v969_v6  ;;  %v1449_v14 = vmul.f32 1.442695, %v1393_v7  ;;  %v1728_v37 = vmax.f32 %v1680_v28, 1e-06  ;;  %v2208_v41 = vmax.f32 %v2160_v31, 1e-06 }
  0x78   : > { %v4873_v17 = vpop.eup %4872  ;;  %v1578_v18 = vadd.f32 %v4869_v9, %v1098_v10  ;;  %4884 = vlog2.f32 %v1729_v3  ;;  %v2688_v44 = vmax.f32 %v2640_v35, 1e-06  ;;  %v3168_v49 = vmax.f32 %v3120_v38, 1e-06 }
  0x79   : > { %v4875_v21 = vpop.eup %4874  ;;  %4886 = vpow2.f32 %v1449_v14  ;;  %v3648_v56 = vmax.f32 %v3600_v45, 1e-06 }
  0x7a   : > { %v4877_v25 = vpop.eup %4876  ;;  %v2058_v26 = vadd.f32 %v4871_v13, %v1578_v18  ;;  %4888 = vlog2.f32 %v2209_v11 }
  0x7b   : > { %v4879_v29 = vpop.eup %4878  ;;  %4890 = vlog2.f32 %v2689_v15 }
  0x7c   : > { %v4881_v32 = vpop.eup %4880  ;;  %v2538_v33 = vadd.f32 %v4873_v17, %v2058_v26  ;;  %4892 = vlog2.f32 %v3169_v19 }
  0x7d   : > { %v4883_v36 = vpop.eup %4882  ;;  %4894 = vlog2.f32 %v3649_v22 }
  0x7e   : > { %v4885_v39 = vpop.eup %4884  ;;  %v3018_v40 = vadd.f32 %v4875_v21, %v2538_v33  ;;  %4896 = vlog2.f32 %v287_v27  ;;  %v1105_v48 = vadd.f32 %v4883_v36, %v4881_v32 }
  0x7f   : > { %v4887_v42 = vpop.eup %4886  ;;  %v1786_v43 = vmul.f32 0.6931472, %v4885_v39  ;;  %4898 = vlog2.f32 %v768_v30  ;;  %v238_v30 = vld [vmem:[%s6478_s18 + $0x180] sm:$0xff]  ;;  %v719_v39 = vld [vmem:[%s6478_s18 + $0x188] sm:$0xff] }
  0x80   : > { %v4889_v46 = vpop.eup %4888  ;;  %v3498_v47 = vadd.f32 %v4877_v25, %v3018_v40  ;;  %4900 = vlog2.f32 %v1248_v34  ;;  %v1585_v62 = vadd.f32 %v4887_v42, %v1105_v48  ;;  %v1679_v48 = vld [vmem:[%s6478_s18 + $0x198] sm:$0xff] }
  0x81   : > { %v4891_v50 = vpop.eup %4890  ;;  %v1873_v51 = vmul.f32 %v1786_v43, %v6496_v24  ;;  %v2266_v52 = vmul.f32 0.6931472, %v4889_v46  ;;  %4902 = vlog2.f32 %v1728_v37  ;;  %v286_v43 = vmax.f32 %v238_v30, 1e-06 }
  0x82   : > { %v4893_v53 = vpop.eup %4892  ;;  %v3978_v54 = vadd.f32 %v4879_v29, %v3498_v47  ;;  %v2746_v55 = vmul.f32 0.6931472, %v4891_v50  ;;  %4904 = vlog2.f32 %v2208_v41 }
  0x83   : > { %v4895_v57 = vpop.eup %4894  ;;  %v1929_v58 = vmul.f32 1.442695, %v1873_v51  ;;  %v2353_v59 = vmul.f32 %v2266_v52, %v6496_v24  ;;  %v3226_v60 = vmul.f32 0.6931472, %v4893_v53  ;;  %4906 = vlog2.f32 %v2688_v44  ;;  %v1199_v44 = vld [vmem:[%s6478_s18 + $0x190] sm:$0xff]  ;;  %v2159_v52 = vld [vmem:[%s6478_s18 + $0x1a0] sm:$0xff] }
  0x84   : > { %v4897_v61 = vpop.eup %4896  ;;  %4126 = vadd.xlane.f32.xlu0 %v3978_v54  ;;  %v2833_v63 = vmul.f32 %v2746_v55, %v6496_v24  ;;  %v3706_v0 = vmul.f32 0.6931472, %v4895_v57  ;;  %4908 = vlog2.f32 %v3168_v49  ;;  %v767_v51 = vmax.f32 %v719_v39, 1e-06 }
  0x85   : > { %v4899_v1 = vpop.eup %4898  ;;  %4910 = vpow2.f32 %v1929_v58  ;;  %v2409_v2 = vmul.f32 1.442695, %v2353_v59  ;;  %v3313_v3 = vmul.f32 %v3226_v60, %v6496_v24  ;;  %v343_v4 = vmul.f32 0.6931472, %v4897_v61  ;;  %v3119_v60 = vld [vmem:[%s6478_s18 + $0x1b0] sm:$0xff] }
  0x86   : > { %v4901_v5 = vpop.eup %4900  ;;  %v2889_v6 = vmul.f32 1.442695, %v2833_v63  ;;  %v3793_v7 = vmul.f32 %v3706_v0, %v6496_v24  ;;  %v824_v8 = vmul.f32 0.6931472, %v4899_v1  ;;  %4912 = vlog2.f32 %v3648_v56  ;;  %v2639_v56 = vld [vmem:[%s6478_s18 + $0x1a8] sm:$0xff]  ;;  %v3599_v0 = vld [vmem:[%s6478_s18 + $0x1b8] sm:$0xff] }
  0x87   : > { %v4903_v9 = vpop.eup %4902  ;;  %4914 = vpow2.f32 %v2409_v2  ;;  %v3369_v10 = vmul.f32 1.442695, %v3313_v3  ;;  %v432_v11 = vmul.f32 %v6496_v24, %v343_v4  ;;  %v1304_v12 = vmul.f32 0.6931472, %v4901_v5  ;;  %v243_v4 = vld [vmem:[%s6478_s18 + $0x2c0] sm:$0xff] }
  0x88   : > { %v4905_v13 = vpop.eup %4904  ;;  %4916 = vpow2.f32 %v2889_v6  ;;  %v3849_v14 = vmul.f32 1.442695, %v3793_v7  ;;  %v912_v15 = vmul.f32 %v824_v8, %v6496_v24  ;;  %v1784_v16 = vmul.f32 0.6931472, %v4903_v9  ;;  %v724_v8 = vld [vmem:[%s6478_s18 + $0x2c8] sm:$0xff] }
  0x89   : > { %v4907_v17 = vpop.eup %4906  ;;  %4918 = vpow2.f32 %v3369_v10  ;;  %v487_v18 = vmul.f32 1.442695, %v432_v11  ;;  %v1392_v19 = vmul.f32 %v1304_v12, %v6496_v24  ;;  %v2264_v20 = vmul.f32 0.6931472, %v4905_v13 }
  0x8a   : > { %v4909_v21 = vpop.eup %4908  ;;  %4920 = vpow2.f32 %v3849_v14  ;;  %v967_v22 = vmul.f32 1.442695, %v912_v15  ;;  %v1872_v23 = vmul.f32 %v1784_v16, %v6496_v24  ;;  %v2744_v25 = vmul.f32 0.6931472, %v4907_v17  ;;  %v1204_v14 = vld [vmem:[%s6478_s18 + $0x2d0] sm:$0xff] }
  0x8b   : > { %v4911_v26 = vpop.eup %4910  ;;  %4922 = vpow2.f32 %v487_v18  ;;  %v1447_v27 = vmul.f32 1.442695, %v1392_v19  ;;  %v2352_v28 = vmul.f32 %v2264_v20, %v6496_v24  ;;  %v3224_v29 = vmul.f32 0.6931472, %v4909_v21 }
  0x8c   : > { %v4913_v31 = vpop.eup %4912  ;;  %v2065_v32 = vadd.f32 %v4911_v26, %v1585_v62  ;;  %4924 = vpow2.f32 %v967_v22  ;;  %v1927_v33 = vmul.f32 1.442695, %v1872_v23  ;;  %v2832_v34 = vmul.f32 %v2744_v25, %v6496_v24 }
  0x8d   : > { %v4915_v35 = vpop.eup %4914  ;;  %4926 = vpow2.f32 %v1447_v27  ;;  %v2407_v36 = vmul.f32 1.442695, %v2352_v28  ;;  %v3312_v37 = vmul.f32 %v3224_v29, %v6496_v24  ;;  %v3704_v38 = vmul.f32 0.6931472, %v4913_v31 }
  0x8e   : > { %v4917_v40 = vpop.eup %4916  ;;  %v2545_v41 = vadd.f32 %v4915_v35, %v2065_v32  ;;  %4928 = vpow2.f32 %v1927_v33  ;;  %v2887_v42 = vmul.f32 1.442695, %v2832_v34  ;;  %v1247_v55 = vmax.f32 %v1199_v44, 1e-06 }
  0x8f   : > { %v4919_v45 = vpop.eup %4918  ;;  %4930 = vpow2.f32 %v2407_v36  ;;  %v3367_v46 = vmul.f32 1.442695, %v3312_v37  ;;  %v3792_v47 = vmul.f32 %v3704_v38, %v6496_v24  ;;  %v1727_v59 = vmax.f32 %v1679_v48, 1e-06 }
  0x90   : > { %v4921_v49 = vpop.eup %4920  ;;  %v3025_v50 = vadd.f32 %v4917_v40, %v2545_v41  ;;  %4932 = vpow2.f32 %v2887_v42  ;;  %v2207_v63 = vmax.f32 %v2159_v52, 1e-06  ;;  %v2687_v3 = vmax.f32 %v2639_v56, 1e-06 }
  0x91   : > { %v4923_v53 = vpop.eup %4922  ;;  %4934 = vpow2.f32 %v3367_v46  ;;  %v3847_v54 = vmul.f32 1.442695, %v3792_v47  ;;  %v3167_v7 = vmax.f32 %v3119_v60, 1e-06  ;;  %v3647_v10 = vmax.f32 %v3599_v0, 1e-06 }
  0x92   : > { %v4925_v57 = vpop.eup %4924  ;;  %v3505_v58 = vadd.f32 %v4919_v45, %v3025_v50  ;;  %4936 = vlog2.f32 %v286_v43  ;;  %v291_v13 = vmax.f32 %v243_v4, 1e-06  ;;  %v772_v16 = vmax.f32 %v724_v8, 1e-06  ;;  %v1684_v0 = vld [vmem:[%s6478_s18 + $0x2d8] sm:$0xff] }
  0x93   : > { %v4927_v61 = vpop.eup %4926  ;;  %v1104_v62 = vadd.f32 %v4925_v57, %v4923_v53  ;;  %4938 = vpow2.f32 %v3847_v54  ;;  %v1252_v21 = vmax.f32 %v1204_v14, 1e-06  ;;  %v3604_v14 = vld [vmem:[%s6478_s18 + $0x2f8] sm:$0xff] }
  0x94   : > { %v4929_v1 = vpop.eup %4928  ;;  %v3985_v2 = vadd.f32 %v4921_v49, %v3505_v58  ;;  %4940 = vlog2.f32 %v767_v51 }
  0x95   : > { %v4931_v5 = vpop.eup %4930  ;;  %v1584_v6 = vadd.f32 %v4927_v61, %v1104_v62  ;;  %4942 = vlog2.f32 %v1247_v55 }
  0x96   : > { %v4933_v9 = vpop.eup %4932  ;;  %4140 = vadd.xlane.f32.xlu2 %v3985_v2  ;;  %4944 = vlog2.f32 %v1727_v59 }
  0x97   : > { %v4935_v11 = vpop.eup %4934  ;;  %v2064_v12 = vadd.f32 %v4929_v1, %v1584_v6  ;;  %4946 = vlog2.f32 %v2207_v63  ;;  %v2164_v1 = vld [vmem:[%s6478_s18 + $0x2e0] sm:$0xff]  ;;  %v2644_v6 = vld [vmem:[%s6478_s18 + $0x2e8] sm:$0xff] }
  0x98   : > { %v4937_v15 = vpop.eup %4936  ;;  %4948 = vlog2.f32 %v2687_v3 }
  0x99   : > { %v4939_v17 = vpop.eup %4938  ;;  %v2544_v18 = vadd.f32 %v4931_v5, %v2064_v12  ;;  %v341_v19 = vmul.f32 0.6931472, %v4937_v15  ;;  %4950 = vlog2.f32 %v3167_v7 }
  0x9a   : > { %v4941_v20 = vpop.eup %4940  ;;  %4952 = vlog2.f32 %v3647_v10  ;;  %v3124_v10 = vld [vmem:[%s6478_s18 + $0x2f0] sm:$0xff] }
  0x9b   : > { %v4943_v22 = vpop.eup %4942  ;;  %v3024_v23 = vadd.f32 %v4933_v9, %v2544_v18  ;;  %v431_v25 = vmul.f32 %v6496_v24, %v341_v19  ;;  %v822_v26 = vmul.f32 0.6931472, %v4941_v20  ;;  %4954 = vlog2.f32 %v291_v13  ;;  %v242_v18 = vld [vmem:[%s6478_s18 + $0x280] sm:$0xff]  ;;  %v723_v20 = vld [vmem:[%s6478_s18 + $0x288] sm:$0xff] }
  0x9c   : > { %v4945_v27 = vpop.eup %4944  ;;  %v1302_v28 = vmul.f32 0.6931472, %v4943_v22  ;;  %4956 = vlog2.f32 %v772_v16  ;;  %v1732_v9 = vmax.f32 %v1684_v0, 1e-06  ;;  %v2212_v13 = vmax.f32 %v2164_v1, 1e-06 }
  0x9d   : > { %v4947_v29 = vpop.eup %4946  ;;  %v3504_v30 = vadd.f32 %v4935_v11, %v3024_v23  ;;  %v485_v31 = vmul.f32 1.442695, %v431_v25  ;;  %v911_v32 = vmul.f32 %v822_v26, %v6496_v24  ;;  %v1782_v33 = vmul.f32 0.6931472, %v4945_v27  ;;  %v1203_v25 = vld [vmem:[%s6478_s18 + $0x290] sm:$0xff] }
  0x9e   : > { %v4949_v34 = vpop.eup %4948  ;;  %v1391_v35 = vmul.f32 %v1302_v28, %v6496_v24  ;;  %v2262_v36 = vmul.f32 0.6931472, %v4947_v29  ;;  %4958 = vlog2.f32 %v1252_v21  ;;  %v3172_v19 = vmax.f32 %v3124_v10, 1e-06  ;;  %v1683_v28 = vld [vmem:[%s6478_s18 + $0x298] sm:$0xff] }
  0x9f   : > { %v4951_v37 = vpop.eup %4950  ;;  %v3984_v38 = vadd.f32 %v4939_v17, %v3504_v30  ;;  %4960 = vpow2.f32 %v485_v31  ;;  %v965_v39 = vmul.f32 1.442695, %v911_v32  ;;  %v1871_v40 = vmul.f32 %v1782_v33, %v6496_v24  ;;  %v2163_v32 = vld [vmem:[%s6478_s18 + $0x2a0] sm:$0xff] }
  0xa0   : > { %v4953_v41 = vpop.eup %4952  ;;  %v1445_v42 = vmul.f32 1.442695, %v1391_v35  ;;  %v2351_v43 = vmul.f32 %v2262_v36, %v6496_v24  ;;  %v2742_v44 = vmul.f32 0.6931472, %v4949_v34  ;;  %v3222_v45 = vmul.f32 0.6931472, %v4951_v37 }
  0xa1   : > { %v4955_v46 = vpop.eup %4954  ;;  %4138 = vadd.xlane.f32.xlu1 %v3984_v38  ;;  %4962 = vpow2.f32 %v965_v39  ;;  %v1925_v47 = vmul.f32 1.442695, %v1871_v40  ;;  %v3702_v48 = vmul.f32 0.6931472, %v4953_v41  ;;  %v2692_v17 = vmax.f32 %v2644_v6, 1e-06 }
  0xa2   : > { %v4957_v49 = vpop.eup %4956  ;;  %4964 = vpow2.f32 %v1445_v42  ;;  %v2405_v50 = vmul.f32 1.442695, %v2351_v43  ;;  %v2831_v51 = vmul.f32 %v2742_v44, %v6496_v24  ;;  %v3311_v52 = vmul.f32 %v3222_v45, %v6496_v24  ;;  %v2643_v35 = vld [vmem:[%s6478_s18 + $0x2a8] sm:$0xff]  ;;  %v3123_v39 = vld [vmem:[%s6478_s18 + $0x2b0] sm:$0xff]  ;;  %v3603_v42 = vld [vmem:[%s6478_s18 + $0x2b8] sm:$0xff] }
  0xa3   : > { %4966 = vpow2.f32 %v1925_v47  ;;  %v3791_v53 = vmul.f32 %v3702_v48, %v6496_v24  ;;  %v351_v54 = vmul.f32 0.6931472, %v4955_v46  ;;  %v832_v55 = vmul.f32 0.6931472, %v4957_v49 }
  0xa4   : > { %v4959_v56 = vpop.eup %4958  ;;  %4968 = vpow2.f32 %v2405_v50  ;;  %v2885_v57 = vmul.f32 1.442695, %v2831_v51  ;;  %v3365_v58 = vmul.f32 1.442695, %v3311_v52  ;;  %v3652_v23 = vmax.f32 %v3604_v14, 1e-06 }
  0xa5   : > { %v4961_v59 = vpop.eup %4960  ;;  %v3845_v60 = vmul.f32 1.442695, %v3791_v53  ;;  %v436_v61 = vmul.f32 %v6496_v24, %v351_v54  ;;  %v916_v62 = vmul.f32 %v832_v55, %v6496_v24  ;;  %v1312_v63 = vmul.f32 0.6931472, %v4959_v56 }
  0xa6   : > { %4970 = vpow2.f32 %v2885_v57  ;;  %v290_v27 = vmax.f32 %v242_v18, 1e-06  ;;  %v771_v31 = vmax.f32 %v723_v20, 1e-06  ;;  %v1251_v34 = vmax.f32 %v1203_v25, 1e-06 }
  0xa7   : > { %v4963_v2 = vpop.eup %4962  ;;  %4972 = vpow2.f32 %v3365_v58  ;;  %v495_v3 = vmul.f32 1.442695, %v436_v61  ;;  %v975_v4 = vmul.f32 1.442695, %v916_v62  ;;  %v1396_v5 = vmul.f32 %v1312_v63, %v6496_v24 }
  0xa8   : > { %v4965_v7 = vpop.eup %4964  ;;  %v1103_v8 = vadd.f32 %v4963_v2, %v4961_v59  ;;  %4974 = vpow2.f32 %v3845_v60  ;;  %v1731_v38 = vmax.f32 %v1683_v28, 1e-06  ;;  %v2211_v41 = vmax.f32 %v2163_v32, 1e-06 }
  0xa9   : > { %v4967_v11 = vpop.eup %4966  ;;  %4976 = vpow2.f32 %v495_v3  ;;  %v1455_v12 = vmul.f32 1.442695, %v1396_v5  ;;  %v2691_v46 = vmax.f32 %v2643_v35, 1e-06  ;;  %v3171_v49 = vmax.f32 %v3123_v39, 1e-06 }
  0xaa   : > { %v4969_v15 = vpop.eup %4968  ;;  %v1583_v16 = vadd.f32 %v4965_v7, %v1103_v8  ;;  %4978 = vpow2.f32 %v975_v4  ;;  %v3651_v53 = vmax.f32 %v3603_v42, 1e-06  ;;  %v722_v39 = vld [vmem:[%s6478_s18 + $0x248] sm:$0xff] }
  0xab   : > { %4980 = vpow2.f32 %v1455_v12 }
  0xac   : > { %v4971_v21 = vpop.eup %4970  ;;  %v2063_v22 = vadd.f32 %v4967_v11, %v1583_v16  ;;  %4982 = vlog2.f32 %v1732_v9 }
  0xad   : > { %v4973_v26 = vpop.eup %4972  ;;  %4984 = vlog2.f32 %v2212_v13 }
  0xae   : > { %v4975_v29 = vpop.eup %4974  ;;  %v2543_v30 = vadd.f32 %v4969_v15, %v2063_v22  ;;  %4986 = vlog2.f32 %v2692_v17 }
  0xaf   : > { %v4977_v33 = vpop.eup %4976  ;;  %4988 = vlog2.f32 %v3172_v19 }
  0xb0   : > { %v4979_v36 = vpop.eup %4978  ;;  %v3023_v37 = vadd.f32 %v4971_v21, %v2543_v30  ;;  %4990 = vlog2.f32 %v3652_v23 }
  0xb1   : > { %v4981_v40 = vpop.eup %4980  ;;  %4992 = vlog2.f32 %v290_v27  ;;  %v1108_v45 = vadd.f32 %v4979_v36, %v4977_v33 }
  0xb2   : > { %v4983_v43 = vpop.eup %4982  ;;  %v3503_v44 = vadd.f32 %v4973_v26, %v3023_v37  ;;  %4994 = vlog2.f32 %v771_v31 }
  0xb3   : > { %v4985_v47 = vpop.eup %4984  ;;  %v1792_v48 = vmul.f32 0.6931472, %v4983_v43  ;;  %4996 = vlog2.f32 %v1251_v34  ;;  %v1588_v58 = vadd.f32 %v4981_v40, %v1108_v45  ;;  %v241_v34 = vld [vmem:[%s6478_s18 + $0x240] sm:$0xff]  ;;  %v1202_v43 = vld [vmem:[%s6478_s18 + $0x250] sm:$0xff] }
  0xb4   : > { %v4987_v50 = vpop.eup %4986  ;;  %v3983_v51 = vadd.f32 %v4975_v29, %v3503_v44  ;;  %v2272_v52 = vmul.f32 0.6931472, %v4985_v47  ;;  %4998 = vlog2.f32 %v1731_v38  ;;  %v289_v47 = vmax.f32 %v241_v34, 1e-06 }
  0xb5   : > { %v4989_v54 = vpop.eup %4988  ;;  %v1876_v55 = vmul.f32 %v1792_v48, %v6496_v24  ;;  %v2752_v56 = vmul.f32 0.6931472, %v4987_v50  ;;  %5000 = vlog2.f32 %v2211_v41  ;;  %v1682_v48 = vld [vmem:[%s6478_s18 + $0x258] sm:$0xff] }
  0xb6   : > { %v4991_v57 = vpop.eup %4990  ;;  %4136 = vadd.xlane.f32.xlu0 %v3983_v51  ;;  %v2356_v59 = vmul.f32 %v2272_v52, %v6496_v24  ;;  %v3232_v60 = vmul.f32 0.6931472, %v4989_v54  ;;  %5002 = vlog2.f32 %v2691_v46  ;;  %v770_v51 = vmax.f32 %v722_v39, 1e-06  ;;  %v2162_v52 = vld [vmem:[%s6478_s18 + $0x260] sm:$0xff] }
  0xb7   : > { %v4993_v61 = vpop.eup %4992  ;;  %v1935_v62 = vmul.f32 1.442695, %v1876_v55  ;;  %v2836_v63 = vmul.f32 %v2752_v56, %v6496_v24  ;;  %v3712_v0 = vmul.f32 0.6931472, %v4991_v57  ;;  %5004 = vlog2.f32 %v3171_v49  ;;  %v2642_v56 = vld [vmem:[%s6478_s18 + $0x268] sm:$0xff] }
  0xb8   : > { %v4995_v1 = vpop.eup %4994  ;;  %v2415_v2 = vmul.f32 1.442695, %v2356_v59  ;;  %v3316_v3 = vmul.f32 %v3232_v60, %v6496_v24  ;;  %v349_v4 = vmul.f32 0.6931472, %v4993_v61  ;;  %5006 = vlog2.f32 %v3651_v53  ;;  %v3122_v59 = vld [vmem:[%s6478_s18 + $0x270] sm:$0xff] }
  0xb9   : > { %v4997_v5 = vpop.eup %4996  ;;  %5008 = vpow2.f32 %v1935_v62  ;;  %v2895_v6 = vmul.f32 1.442695, %v2836_v63  ;;  %v3796_v7 = vmul.f32 %v3712_v0, %v6496_v24  ;;  %v830_v8 = vmul.f32 0.6931472, %v4995_v1  ;;  %v3602_v0 = vld [vmem:[%s6478_s18 + $0x278] sm:$0xff] }
  0xba   : > { %v4999_v9 = vpop.eup %4998  ;;  %5010 = vpow2.f32 %v2415_v2  ;;  %v3375_v10 = vmul.f32 1.442695, %v3316_v3  ;;  %v435_v11 = vmul.f32 %v6496_v24, %v349_v4  ;;  %v1310_v12 = vmul.f32 0.6931472, %v4997_v5  ;;  %v246_v3 = vld [vmem:[%s6478_s18 + $0x380] sm:$0xff] }
  0xbb   : > { %v5001_v13 = vpop.eup %5000  ;;  %5012 = vpow2.f32 %v2895_v6  ;;  %v3855_v14 = vmul.f32 1.442695, %v3796_v7  ;;  %v915_v15 = vmul.f32 %v830_v8, %v6496_v24  ;;  %v1790_v16 = vmul.f32 0.6931472, %v4999_v9  ;;  %v727_v8 = vld [vmem:[%s6478_s18 + $0x388] sm:$0xff] }
  0xbc   : > { %v5003_v17 = vpop.eup %5002  ;;  %5014 = vpow2.f32 %v3375_v10  ;;  %v493_v18 = vmul.f32 1.442695, %v435_v11  ;;  %v1395_v19 = vmul.f32 %v1310_v12, %v6496_v24  ;;  %v2270_v20 = vmul.f32 0.6931472, %v5001_v13  ;;  %v1207_v11 = vld [vmem:[%s6478_s18 + $0x390] sm:$0xff] }
  0xbd   : > { %v5005_v21 = vpop.eup %5004  ;;  %5016 = vpow2.f32 %v3855_v14  ;;  %v973_v22 = vmul.f32 1.442695, %v915_v15  ;;  %v1875_v23 = vmul.f32 %v1790_v16, %v6496_v24  ;;  %v2750_v25 = vmul.f32 0.6931472, %v5003_v17  ;;  %v1687_v15 = vld [vmem:[%s6478_s18 + $0x398] sm:$0xff] }
  0xbe   : > { %v5007_v26 = vpop.eup %5006  ;;  %5018 = vpow2.f32 %v493_v18  ;;  %v1453_v27 = vmul.f32 1.442695, %v1395_v19  ;;  %v2355_v28 = vmul.f32 %v2270_v20, %v6496_v24  ;;  %v3230_v29 = vmul.f32 0.6931472, %v5005_v21 }
  0xbf   : > { %v5009_v30 = vpop.eup %5008  ;;  %5020 = vpow2.f32 %v973_v22  ;;  %v1933_v31 = vmul.f32 1.442695, %v1875_v23  ;;  %v2835_v32 = vmul.f32 %v2750_v25, %v6496_v24  ;;  %v3710_v33 = vmul.f32 0.6931472, %v5007_v26 }
  0xc0   : > { %v5011_v35 = vpop.eup %5010  ;;  %v2068_v36 = vadd.f32 %v5009_v30, %v1588_v58  ;;  %5022 = vpow2.f32 %v1453_v27  ;;  %v2413_v37 = vmul.f32 1.442695, %v2355_v28  ;;  %v3315_v38 = vmul.f32 %v3230_v29, %v6496_v24 }
  0xc1   : > { %v5013_v40 = vpop.eup %5012  ;;  %5024 = vpow2.f32 %v1933_v31  ;;  %v2893_v41 = vmul.f32 1.442695, %v2835_v32  ;;  %v3795_v42 = vmul.f32 %v3710_v33, %v6496_v24  ;;  %v1250_v55 = vmax.f32 %v1202_v43, 1e-06 }
  0xc2   : > { %v5015_v44 = vpop.eup %5014  ;;  %v2548_v45 = vadd.f32 %v5011_v35, %v2068_v36  ;;  %5026 = vpow2.f32 %v2413_v37  ;;  %v3373_v46 = vmul.f32 1.442695, %v3315_v38  ;;  %v1730_v58 = vmax.f32 %v1682_v48, 1e-06 }
  0xc3   : > { %v5017_v49 = vpop.eup %5016  ;;  %5028 = vpow2.f32 %v2893_v41  ;;  %v3853_v50 = vmul.f32 1.442695, %v3795_v42  ;;  %v2210_v63 = vmax.f32 %v2162_v52, 1e-06  ;;  %v2690_v2 = vmax.f32 %v2642_v56, 1e-06 }
  0xc4   : > { %v5019_v53 = vpop.eup %5018  ;;  %v3028_v54 = vadd.f32 %v5013_v40, %v2548_v45  ;;  %5030 = vpow2.f32 %v3373_v46  ;;  %v3170_v7 = vmax.f32 %v3122_v59, 1e-06  ;;  %v3650_v10 = vmax.f32 %v3602_v0, 1e-06 }
  0xc5   : > { %v5021_v57 = vpop.eup %5020  ;;  %5032 = vpow2.f32 %v3853_v50  ;;  %v294_v14 = vmax.f32 %v246_v3, 1e-06  ;;  %v775_v17 = vmax.f32 %v727_v8, 1e-06  ;;  %v1255_v20 = vmax.f32 %v1207_v11, 1e-06 }
  0xc6   : > { %v5023_v60 = vpop.eup %5022  ;;  %v3508_v61 = vadd.f32 %v5015_v44, %v3028_v54  ;;  %v1107_v62 = vadd.f32 %v5021_v57, %v5019_v53  ;;  %5034 = vlog2.f32 %v289_v47  ;;  %v1735_v23 = vmax.f32 %v1687_v15, 1e-06  ;;  %v2167_v3 = vld [vmem:[%s6478_s18 + $0x3a0] sm:$0xff]  ;;  %v3127_v11 = vld [vmem:[%s6478_s18 + $0x3b0] sm:$0xff] }
  0xc7   : > { %v5025_v1 = vpop.eup %5024  ;;  %5036 = vlog2.f32 %v770_v51  ;;  %v2215_v15 = vmax.f32 %v2167_v3, 1e-06 }
  0xc8   : > { %v5027_v4 = vpop.eup %5026  ;;  %v3988_v5 = vadd.f32 %v5017_v49, %v3508_v61  ;;  %v1587_v6 = vadd.f32 %v5023_v60, %v1107_v62  ;;  %5038 = vlog2.f32 %v1250_v55 }
  0xc9   : > { %v5029_v9 = vpop.eup %5028  ;;  %5040 = vlog2.f32 %v1730_v58 }
  0xca   : > { %v5031_v12 = vpop.eup %5030  ;;  %4146 = vadd.xlane.f32.xlu2 %v3988_v5  ;;  %v2067_v13 = vadd.f32 %v5025_v1, %v1587_v6  ;;  %5042 = vlog2.f32 %v2210_v63 }
  0xcb   : > { %v5033_v16 = vpop.eup %5032  ;;  %5044 = vlog2.f32 %v2690_v2 }
  0xcc   : > { %v5035_v18 = vpop.eup %5034  ;;  %v2547_v19 = vadd.f32 %v5027_v4, %v2067_v13  ;;  %5046 = vlog2.f32 %v3170_v7  ;;  %v2647_v7 = vld [vmem:[%s6478_s18 + $0x3a8] sm:$0xff] }
  0xcd   : > { %v5037_v21 = vpop.eup %5036  ;;  %v347_v22 = vmul.f32 0.6931472, %v5035_v18  ;;  %5048 = vlog2.f32 %v3650_v10 }
  0xce   : > { %v5039_v25 = vpop.eup %5038  ;;  %v3027_v26 = vadd.f32 %v5029_v9, %v2547_v19  ;;  %v828_v27 = vmul.f32 0.6931472, %v5037_v21  ;;  %5050 = vlog2.f32 %v294_v14  ;;  %v2695_v19 = vmax.f32 %v2647_v7, 1e-06 }
  0xcf   : > { %v5041_v28 = vpop.eup %5040  ;;  %v434_v29 = vmul.f32 %v6496_v24, %v347_v22  ;;  %v1308_v30 = vmul.f32 0.6931472, %v5039_v25  ;;  %5052 = vlog2.f32 %v775_v17  ;;  %v726_v25 = vld [vmem:[%s6478_s18 + $0x348] sm:$0xff] }
  0xd0   : > { %v5043_v31 = vpop.eup %5042  ;;  %v3507_v32 = vadd.f32 %v5031_v12, %v3027_v26  ;;  %v914_v33 = vmul.f32 %v828_v27, %v6496_v24  ;;  %v1788_v34 = vmul.f32 0.6931472, %v5041_v28  ;;  %5054 = vlog2.f32 %v1255_v20  ;;  %v245_v20 = vld [vmem:[%s6478_s18 + $0x340] sm:$0xff]  ;;  %v1206_v28 = vld [vmem:[%s6478_s18 + $0x350] sm:$0xff] }
  0xd1   : > { %v5045_v35 = vpop.eup %5044  ;;  %v491_v36 = vmul.f32 1.442695, %v434_v29  ;;  %v1394_v37 = vmul.f32 %v1308_v30, %v6496_v24  ;;  %v2268_v38 = vmul.f32 0.6931472, %v5043_v31  ;;  %5056 = vlog2.f32 %v1735_v23 }
  0xd2   : > { %v5047_v39 = vpop.eup %5046  ;;  %v3987_v40 = vadd.f32 %v5033_v16, %v3507_v32  ;;  %v971_v41 = vmul.f32 1.442695, %v914_v33  ;;  %v1874_v42 = vmul.f32 %v1788_v34, %v6496_v24  ;;  %v2748_v43 = vmul.f32 0.6931472, %v5045_v35  ;;  %v3607_v16 = vld [vmem:[%s6478_s18 + $0x3b8] sm:$0xff]  ;;  %v2166_v35 = vld [vmem:[%s6478_s18 + $0x360] sm:$0xff] }
  0xd3   : > { %v5049_v44 = vpop.eup %5048  ;;  %5058 = vpow2.f32 %v491_v36  ;;  %v1451_v45 = vmul.f32 1.442695, %v1394_v37  ;;  %v2354_v46 = vmul.f32 %v2268_v38, %v6496_v24  ;;  %v3228_v47 = vmul.f32 0.6931472, %v5047_v39  ;;  %v1686_v32 = vld [vmem:[%s6478_s18 + $0x358] sm:$0xff]  ;;  %v2646_v39 = vld [vmem:[%s6478_s18 + $0x368] sm:$0xff] }
  0xd4   : > { %v5051_v48 = vpop.eup %5050  ;;  %4144 = vadd.xlane.f32.xlu1 %v3987_v40  ;;  %5060 = vpow2.f32 %v971_v41  ;;  %v1931_v49 = vmul.f32 1.442695, %v1874_v42  ;;  %v2834_v50 = vmul.f32 %v2748_v43, %v6496_v24  ;;  %v3708_v51 = vmul.f32 0.6931472, %v5049_v44  ;;  %v3126_v42 = vld [vmem:[%s6478_s18 + $0x370] sm:$0xff] }
  0xd5   : > { %v5053_v52 = vpop.eup %5052  ;;  %5062 = vpow2.f32 %v1451_v45  ;;  %v2411_v53 = vmul.f32 1.442695, %v2354_v46  ;;  %v3314_v54 = vmul.f32 %v3228_v47, %v6496_v24  ;;  %v357_v55 = vmul.f32 0.6931472, %v5051_v48  ;;  %v3606_v47 = vld [vmem:[%s6478_s18 + $0x378] sm:$0xff] }
  0xd6   : > { %v5055_v56 = vpop.eup %5054  ;;  %5064 = vpow2.f32 %v1931_v49  ;;  %v2891_v57 = vmul.f32 1.442695, %v2834_v50  ;;  %v3794_v58 = vmul.f32 %v3708_v51, %v6496_v24  ;;  %v838_v59 = vmul.f32 0.6931472, %v5053_v52  ;;  %v244_v50 = vld [vmem:[%s6478_s18 + $0x300] sm:$0xff] }
  0xd7   : > { %v5057_v60 = vpop.eup %5056  ;;  %5066 = vpow2.f32 %v2411_v53  ;;  %v3371_v61 = vmul.f32 1.442695, %v3314_v54  ;;  %v439_v62 = vmul.f32 %v6496_v24, %v357_v55  ;;  %v1318_v63 = vmul.f32 0.6931472, %v5055_v56 }
  0xd8   : > { %5068 = vpow2.f32 %v2891_v57  ;;  %v3851_v0 = vmul.f32 1.442695, %v3794_v58  ;;  %v919_v1 = vmul.f32 %v838_v59, %v6496_v24  ;;  %v1798_v2 = vmul.f32 0.6931472, %v5057_v60 }
  0xd9   : > { %v5059_v4 = vpop.eup %5058  ;;  %5070 = vpow2.f32 %v3371_v61  ;;  %v501_v5 = vmul.f32 1.442695, %v439_v62  ;;  %v1399_v6 = vmul.f32 %v1318_v63, %v6496_v24  ;;  %v3175_v23 = vmax.f32 %v3127_v11, 1e-06 }
  0xda   : > { %v5061_v8 = vpop.eup %5060  ;;  %5072 = vpow2.f32 %v3851_v0  ;;  %v981_v9 = vmul.f32 1.442695, %v919_v1  ;;  %v1879_v10 = vmul.f32 %v1798_v2, %v6496_v24  ;;  %v3655_v27 = vmax.f32 %v3607_v16, 1e-06 }
  0xdb   : > { %v5063_v12 = vpop.eup %5062  ;;  %v1106_v13 = vadd.f32 %v5061_v8, %v5059_v4  ;;  %5074 = vpow2.f32 %v501_v5  ;;  %v1461_v14 = vmul.f32 1.442695, %v1399_v6  ;;  %v293_v31 = vmax.f32 %v245_v20, 1e-06 }
  0xdc   : > { %v5065_v17 = vpop.eup %5064  ;;  %5076 = vpow2.f32 %v981_v9  ;;  %v1941_v18 = vmul.f32 1.442695, %v1879_v10  ;;  %v774_v34 = vmax.f32 %v726_v25, 1e-06  ;;  %v1254_v38 = vmax.f32 %v1206_v28, 1e-06 }
  0xdd   : > { %v5067_v21 = vpop.eup %5066  ;;  %v1586_v22 = vadd.f32 %v5063_v12, %v1106_v13  ;;  %5078 = vpow2.f32 %v1461_v14  ;;  %v1734_v41 = vmax.f32 %v1686_v32, 1e-06  ;;  %v2214_v46 = vmax.f32 %v2166_v35, 1e-06 }
  0xde   : > { %v5069_v26 = vpop.eup %5068  ;;  %5080 = vpow2.f32 %v1941_v18  ;;  %v2694_v49 = vmax.f32 %v2646_v39, 1e-06  ;;  %v3174_v54 = vmax.f32 %v3126_v42, 1e-06  ;;  %v3654_v57 = vmax.f32 %v3606_v47, 1e-06 }
  0xdf   : > { %v5071_v29 = vpop.eup %5070  ;;  %v2066_v30 = vadd.f32 %v5065_v17, %v1586_v22  ;;  %5082 = vlog2.f32 %v2215_v15  ;;  %v292_v61 = vmax.f32 %v244_v50, 1e-06  ;;  %v725_v42 = vld [vmem:[%s6478_s18 + $0x308] sm:$0xff]  ;;  %v1205_v47 = vld [vmem:[%s6478_s18 + $0x310] sm:$0xff] }
  0xe0   : > { %v5073_v33 = vpop.eup %5072  ;;  %5084 = vlog2.f32 %v2695_v19 }
  0xe1   : > { %v5075_v36 = vpop.eup %5074  ;;  %v2546_v37 = vadd.f32 %v5067_v21, %v2066_v30  ;;  %5086 = vlog2.f32 %v3175_v23 }
  0xe2   : > { %v5077_v40 = vpop.eup %5076  ;;  %5088 = vlog2.f32 %v3655_v27 }
  0xe3   : > { %v5079_v43 = vpop.eup %5078  ;;  %v3026_v44 = vadd.f32 %v5069_v26, %v2546_v37  ;;  %v1111_v45 = vadd.f32 %v5077_v40, %v5075_v36  ;;  %5090 = vlog2.f32 %v293_v31 }
  0xe4   : > { %v5081_v48 = vpop.eup %5080  ;;  %5092 = vlog2.f32 %v774_v34 }
  0xe5   : > { %v5083_v51 = vpop.eup %5082  ;;  %v3506_v52 = vadd.f32 %v5071_v29, %v3026_v44  ;;  %v1591_v53 = vadd.f32 %v5079_v43, %v1111_v45  ;;  %5094 = vlog2.f32 %v1254_v38 }
  0xe6   : > { %v5085_v55 = vpop.eup %5084  ;;  %v2278_v56 = vmul.f32 0.6931472, %v5083_v51  ;;  %5096 = vlog2.f32 %v1734_v41  ;;  %v1685_v51 = vld [vmem:[%s6478_s18 + $0x318] sm:$0xff] }
  0xe7   : > { %v5087_v58 = vpop.eup %5086  ;;  %v3986_v59 = vadd.f32 %v5073_v33, %v3506_v52  ;;  %v2758_v60 = vmul.f32 0.6931472, %v5085_v55  ;;  %5098 = vlog2.f32 %v2214_v46  ;;  %v2071_v2 = vadd.f32 %v5081_v48, %v1591_v53 }
  0xe8   : > { %v5089_v62 = vpop.eup %5088  ;;  %v2359_v63 = vmul.f32 %v2278_v56, %v6496_v24  ;;  %v3238_v0 = vmul.f32 0.6931472, %v5087_v58  ;;  %5100 = vlog2.f32 %v2694_v49  ;;  %v773_v55 = vmax.f32 %v725_v42, 1e-06  ;;  %v2165_v56 = vld [vmem:[%s6478_s18 + $0x320] sm:$0xff] }
  0xe9   : > { %v5091_v1 = vpop.eup %5090  ;;  %4142 = vadd.xlane.f32.xlu0 %v3986_v59  ;;  %v2839_v3 = vmul.f32 %v2758_v60, %v6496_v24  ;;  %v3718_v4 = vmul.f32 0.6931472, %v5089_v62  ;;  %5102 = vlog2.f32 %v3174_v54  ;;  %v1253_v59 = vmax.f32 %v1205_v47, 1e-06  ;;  %v2645_v60 = vld [vmem:[%s6478_s18 + $0x328] sm:$0xff] }
  0xea   : > { %v5093_v5 = vpop.eup %5092  ;;  %v2421_v6 = vmul.f32 1.442695, %v2359_v63  ;;  %v3319_v7 = vmul.f32 %v3238_v0, %v6496_v24  ;;  %v355_v8 = vmul.f32 0.6931472, %v5091_v1  ;;  %5104 = vlog2.f32 %v3654_v57  ;;  %v3125_v0 = vld [vmem:[%s6478_s18 + $0x330] sm:$0xff] }
  0xeb   : > { %v5095_v9 = vpop.eup %5094  ;;  %v2901_v10 = vmul.f32 1.442695, %v2839_v3  ;;  %v3799_v11 = vmul.f32 %v3718_v4, %v6496_v24  ;;  %v836_v12 = vmul.f32 0.6931472, %v5093_v5  ;;  %5106 = vlog2.f32 %v292_v61  ;;  %v3605_v4 = vld [vmem:[%s6478_s18 + $0x338] sm:$0xff] }
  0xec   : > { %v5097_v13 = vpop.eup %5096  ;;  %5108 = vpow2.f32 %v2421_v6  ;;  %v3381_v14 = vmul.f32 1.442695, %v3319_v7  ;;  %v438_v15 = vmul.f32 %v6496_v24, %v355_v8  ;;  %v1316_v16 = vmul.f32 0.6931472, %v5095_v9  ;;  %v249_v8 = vld [vmem:[%s6478_s18 + $0x440] sm:$0xff] }
  0xed   : > { %v5099_v17 = vpop.eup %5098  ;;  %5110 = vpow2.f32 %v2901_v10  ;;  %v3861_v18 = vmul.f32 1.442695, %v3799_v11  ;;  %v918_v19 = vmul.f32 %v836_v12, %v6496_v24  ;;  %v1796_v20 = vmul.f32 0.6931472, %v5097_v13  ;;  %v730_v12 = vld [vmem:[%s6478_s18 + $0x448] sm:$0xff] }
  0xee   : > { %v5101_v21 = vpop.eup %5100  ;;  %5112 = vpow2.f32 %v3381_v14  ;;  %v499_v22 = vmul.f32 1.442695, %v438_v15  ;;  %v1398_v23 = vmul.f32 %v1316_v16, %v6496_v24  ;;  %v2276_v25 = vmul.f32 0.6931472, %v5099_v17  ;;  %v1210_v15 = vld [vmem:[%s6478_s18 + $0x450] sm:$0xff] }
  0xef   : > { %v5103_v26 = vpop.eup %5102  ;;  %5114 = vpow2.f32 %v3861_v18  ;;  %v979_v27 = vmul.f32 1.442695, %v918_v19  ;;  %v1878_v28 = vmul.f32 %v1796_v20, %v6496_v24  ;;  %v2756_v29 = vmul.f32 0.6931472, %v5101_v21  ;;  %v1690_v19 = vld [vmem:[%s6478_s18 + $0x458] sm:$0xff] }
  0xf0   : > { %v5105_v30 = vpop.eup %5104  ;;  %5116 = vpow2.f32 %v499_v22  ;;  %v1459_v31 = vmul.f32 1.442695, %v1398_v23  ;;  %v2358_v32 = vmul.f32 %v2276_v25, %v6496_v24  ;;  %v3236_v33 = vmul.f32 0.6931472, %v5103_v26  ;;  %v2170_v26 = vld [vmem:[%s6478_s18 + $0x460] sm:$0xff] }
  0xf1   : > { %v5107_v34 = vpop.eup %5106  ;;  %5118 = vpow2.f32 %v979_v27  ;;  %v1939_v35 = vmul.f32 1.442695, %v1878_v28  ;;  %v2838_v36 = vmul.f32 %v2756_v29, %v6496_v24  ;;  %v3716_v37 = vmul.f32 0.6931472, %v5105_v30 }
  0xf2   : > { %v5109_v38 = vpop.eup %5108  ;;  %5120 = vpow2.f32 %v1459_v31  ;;  %v2419_v39 = vmul.f32 1.442695, %v2358_v32  ;;  %v3318_v40 = vmul.f32 %v3236_v33, %v6496_v24  ;;  %v353_v41 = vmul.f32 0.6931472, %v5107_v34 }
  0xf3   : > { %v5111_v43 = vpop.eup %5110  ;;  %v2551_v44 = vadd.f32 %v5109_v38, %v2071_v2  ;;  %5122 = vpow2.f32 %v1939_v35  ;;  %v2899_v45 = vmul.f32 1.442695, %v2838_v36  ;;  %v3798_v46 = vmul.f32 %v3716_v37, %v6496_v24 }
  0xf4   : > { %v5113_v48 = vpop.eup %5112  ;;  %5124 = vpow2.f32 %v2419_v39  ;;  %v3379_v49 = vmul.f32 1.442695, %v3318_v40  ;;  %v437_v50 = vmul.f32 %v6496_v24, %v353_v41  ;;  %v1733_v63 = vmax.f32 %v1685_v51, 1e-06 }
  0xf5   : > { %v5115_v52 = vpop.eup %5114  ;;  %v3031_v53 = vadd.f32 %v5111_v43, %v2551_v44  ;;  %5126 = vpow2.f32 %v2899_v45  ;;  %v3859_v54 = vmul.f32 1.442695, %v3798_v46  ;;  %v2213_v3 = vmax.f32 %v2165_v56, 1e-06 }
  0xf6   : > { %v5117_v57 = vpop.eup %5116  ;;  %5128 = vpow2.f32 %v3379_v49  ;;  %v497_v58 = vmul.f32 1.442695, %v437_v50  ;;  %v2693_v7 = vmax.f32 %v2645_v60, 1e-06  ;;  %v3173_v11 = vmax.f32 %v3125_v0, 1e-06 }
  0xf7   : > { %v5119_v61 = vpop.eup %5118  ;;  %v3511_v62 = vadd.f32 %v5113_v48, %v3031_v53  ;;  %5130 = vpow2.f32 %v3859_v54  ;;  %v3653_v14 = vmax.f32 %v3605_v4, 1e-06  ;;  %v297_v18 = vmax.f32 %v249_v8, 1e-06 }
  0xf8   : > { %v5121_v1 = vpop.eup %5120  ;;  %v1110_v2 = vadd.f32 %v5119_v61, %v5117_v57  ;;  %5132 = vpow2.f32 %v497_v58  ;;  %v778_v21 = vmax.f32 %v730_v12, 1e-06  ;;  %v1258_v25 = vmax.f32 %v1210_v15, 1e-06 }
  0xf9   : > { %v5123_v5 = vpop.eup %5122  ;;  %v3991_v6 = vadd.f32 %v5115_v52, %v3511_v62  ;;  %5134 = vlog2.f32 %v773_v55  ;;  %v1738_v28 = vmax.f32 %v1690_v19, 1e-06  ;;  %v2218_v34 = vmax.f32 %v2170_v26, 1e-06  ;;  %v3610_v19 = vld [vmem:[%s6478_s18 + $0x478] sm:$0xff] }
  0xfa   : > { %v5125_v9 = vpop.eup %5124  ;;  %v1590_v10 = vadd.f32 %v5121_v1, %v1110_v2  ;;  %5136 = vlog2.f32 %v1253_v59 }
  0xfb   : > { %v5127_v13 = vpop.eup %5126  ;;  %4152 = vadd.xlane.f32.xlu2 %v3991_v6  ;;  %5138 = vlog2.f32 %v1733_v63  ;;  %v2650_v6 = vld [vmem:[%s6478_s18 + $0x468] sm:$0xff] }
  0xfc   : > { %v5129_v16 = vpop.eup %5128  ;;  %v2070_v17 = vadd.f32 %v5123_v5, %v1590_v10  ;;  %5140 = vlog2.f32 %v2213_v3 }
  0xfd   : > { %v5131_v20 = vpop.eup %5130  ;;  %5142 = vlog2.f32 %v2693_v7 }
  0xfe   : > { %v6722_v22 = vpop.eup %5132  ;;  %v2550_v23 = vadd.f32 %v5125_v9, %v2070_v17  ;;  %5144 = vlog2.f32 %v3173_v11 }
  0xff   : > { %v5135_v27 = vpop.eup %5134  ;;  %5146 = vlog2.f32 %v3653_v14  ;;  %v3130_v14 = vld [vmem:[%s6478_s18 + $0x470] sm:$0xff] }
 0x100   : > { %v5137_v29 = vpop.eup %5136  ;;  %v3030_v30 = vadd.f32 %v5127_v13, %v2550_v23  ;;  %v834_v31 = vmul.f32 0.6931472, %v5135_v27  ;;  %5148 = vlog2.f32 %v297_v18  ;;  %v2698_v18 = vmax.f32 %v2650_v6, 1e-06 }
 0x101   : > { %v5139_v32 = vpop.eup %5138  ;;  %v1314_v33 = vmul.f32 0.6931472, %v5137_v29  ;;  %5150 = vlog2.f32 %v778_v21  ;;  %v729_v29 = vld [vmem:[%s6478_s18 + $0x408] sm:$0xff] }
 0x102   : > { %v5141_v35 = vpop.eup %5140  ;;  %v3510_v36 = vadd.f32 %v5129_v16, %v3030_v30  ;;  %v917_v37 = vmul.f32 %v834_v31, %v6496_v24  ;;  %v1794_v38 = vmul.f32 0.6931472, %v5139_v32  ;;  %5152 = vlog2.f32 %v1258_v25  ;;  %v248_v25 = vld [vmem:[%s6478_s18 + $0x400] sm:$0xff]  ;;  %v1209_v32 = vld [vmem:[%s6478_s18 + $0x410] sm:$0xff] }
 0x103   : > { %v5143_v39 = vpop.eup %5142  ;;  %v1397_v40 = vmul.f32 %v1314_v33, %v6496_v24  ;;  %v2274_v41 = vmul.f32 0.6931472, %v5141_v35  ;;  %5154 = vlog2.f32 %v1738_v28  ;;  %v3178_v28 = vmax.f32 %v3130_v14, 1e-06 }
 0x104   : > { %v5145_v42 = vpop.eup %5144  ;;  %v3990_v43 = vadd.f32 %v5131_v20, %v3510_v36  ;;  %v977_v44 = vmul.f32 1.442695, %v917_v37  ;;  %v1877_v45 = vmul.f32 %v1794_v38, %v6496_v24  ;;  %v2754_v46 = vmul.f32 0.6931472, %v5143_v39  ;;  %v1689_v36 = vld [vmem:[%s6478_s18 + $0x418] sm:$0xff]  ;;  %v2169_v39 = vld [vmem:[%s6478_s18 + $0x420] sm:$0xff] }
 0x105   : > { %v5147_v47 = vpop.eup %5146  ;;  %v1457_v48 = vmul.f32 1.442695, %v1397_v40  ;;  %v2357_v49 = vmul.f32 %v2274_v41, %v6496_v24  ;;  %v3234_v50 = vmul.f32 0.6931472, %v5145_v42  ;;  %5156 = vlog2.f32 %v2218_v34 }
 0x106   : > { %v5149_v51 = vpop.eup %5148  ;;  %4150 = vadd.xlane.f32.xlu1 %v3990_v43  ;;  %5158 = vpow2.f32 %v977_v44  ;;  %v1937_v52 = vmul.f32 1.442695, %v1877_v45  ;;  %v2837_v53 = vmul.f32 %v2754_v46, %v6496_v24  ;;  %v3714_v54 = vmul.f32 0.6931472, %v5147_v47  ;;  %v2649_v43 = vld [vmem:[%s6478_s18 + $0x428] sm:$0xff]  ;;  %v3129_v46 = vld [vmem:[%s6478_s18 + $0x430] sm:$0xff] }
 0x107   : > { %v5151_v55 = vpop.eup %5150  ;;  %5160 = vpow2.f32 %v1457_v48  ;;  %v2417_v56 = vmul.f32 1.442695, %v2357_v49  ;;  %v3317_v57 = vmul.f32 %v3234_v50, %v6496_v24  ;;  %v363_v58 = vmul.f32 0.6931472, %v5149_v51  ;;  %v3609_v51 = vld [vmem:[%s6478_s18 + $0x438] sm:$0xff] }
 0x108   : > { %v5153_v59 = vpop.eup %5152  ;;  %5162 = vpow2.f32 %v1937_v52  ;;  %v2897_v60 = vmul.f32 1.442695, %v2837_v53  ;;  %v3797_v61 = vmul.f32 %v3714_v54, %v6496_v24  ;;  %v844_v62 = vmul.f32 0.6931472, %v5151_v55  ;;  %v247_v54 = vld [vmem:[%s6478_s18 + $0x3c0] sm:$0xff] }
 0x109   : > { %v5155_v63 = vpop.eup %5154  ;;  %5164 = vpow2.f32 %v2417_v56  ;;  %v3377_v0 = vmul.f32 1.442695, %v3317_v57  ;;  %v442_v1 = vmul.f32 %v6496_v24, %v363_v58  ;;  %v1324_v2 = vmul.f32 0.6931472, %v5153_v59 }
 0x10a   : > { %5166 = vpow2.f32 %v2897_v60  ;;  %v3857_v3 = vmul.f32 1.442695, %v3797_v61  ;;  %v922_v4 = vmul.f32 %v844_v62, %v6496_v24  ;;  %v1804_v5 = vmul.f32 0.6931472, %v5155_v63  ;;  %v728_v62 = vld [vmem:[%s6478_s18 + $0x3c8] sm:$0xff] }
 0x10b   : > { %v5157_v7 = vpop.eup %5156  ;;  %5168 = vpow2.f32 %v3377_v0  ;;  %v507_v8 = vmul.f32 1.442695, %v442_v1  ;;  %v1402_v9 = vmul.f32 %v1324_v2, %v6496_v24  ;;  %v3658_v31 = vmax.f32 %v3610_v19, 1e-06 }
 0x10c   : > { %v5159_v10 = vpop.eup %5158  ;;  %5170 = vpow2.f32 %v3857_v3  ;;  %v987_v11 = vmul.f32 1.442695, %v922_v4  ;;  %v1882_v12 = vmul.f32 %v1804_v5, %v6496_v24  ;;  %v2284_v13 = vmul.f32 0.6931472, %v5157_v7 }
 0x10d   : > { %v5161_v15 = vpop.eup %5160  ;;  %v1109_v16 = vadd.f32 %v5159_v10, %v6722_v22  ;;  %5172 = vpow2.f32 %v507_v8  ;;  %v1467_v17 = vmul.f32 1.442695, %v1402_v9  ;;  %v296_v35 = vmax.f32 %v248_v25, 1e-06 }
 0x10e   : > { %v5163_v20 = vpop.eup %5162  ;;  %5174 = vpow2.f32 %v987_v11  ;;  %v1947_v21 = vmul.f32 1.442695, %v1882_v12  ;;  %v2362_v23 = vmul.f32 %v2284_v13, %v6496_v24  ;;  %v777_v38 = vmax.f32 %v729_v29, 1e-06 }
 0x10f   : > { %v5165_v26 = vpop.eup %5164  ;;  %v1589_v27 = vadd.f32 %v5161_v15, %v1109_v16  ;;  %5176 = vpow2.f32 %v1467_v17  ;;  %v1257_v42 = vmax.f32 %v1209_v32, 1e-06  ;;  %v1737_v45 = vmax.f32 %v1689_v36, 1e-06 }
 0x110   : > { %v5167_v30 = vpop.eup %5166  ;;  %5178 = vpow2.f32 %v1947_v21  ;;  %v2427_v22 = vmul.f32 1.442695, %v2362_v23  ;;  %v2217_v50 = vmax.f32 %v2169_v39, 1e-06  ;;  %v2697_v53 = vmax.f32 %v2649_v43, 1e-06 }
 0x111   : > { %v5169_v33 = vpop.eup %5168  ;;  %v2069_v34 = vadd.f32 %v5163_v20, %v1589_v27  ;;  %5180 = vlog2.f32 %v2698_v18  ;;  %v3177_v58 = vmax.f32 %v3129_v46, 1e-06  ;;  %v3657_v61 = vmax.f32 %v3609_v51, 1e-06  ;;  %v1208_v46 = vld [vmem:[%s6478_s18 + $0x3d0] sm:$0xff] }
 0x112   : > { %v5171_v37 = vpop.eup %5170  ;;  %5182 = vpow2.f32 %v2427_v22  ;;  %v295_v2 = vmax.f32 %v247_v54, 1e-06  ;;  %v776_v8 = vmax.f32 %v728_v62, 1e-06 }
 0x113   : > { %v5173_v40 = vpop.eup %5172  ;;  %v2549_v41 = vadd.f32 %v5165_v26, %v2069_v34  ;;  %5184 = vlog2.f32 %v3178_v28 }
 0x114   : > { %v5175_v44 = vpop.eup %5174  ;;  %5186 = vlog2.f32 %v3658_v31 }
 0x115   : > { %v5177_v47 = vpop.eup %5176  ;;  %v3029_v48 = vadd.f32 %v5167_v30, %v2549_v41  ;;  %v1114_v49 = vadd.f32 %v5175_v44, %v5173_v40  ;;  %5188 = vlog2.f32 %v296_v35 }
 0x116   : > { %v5179_v52 = vpop.eup %5178  ;;  %5190 = vlog2.f32 %v777_v38 }
 0x117   : > { %v5181_v55 = vpop.eup %5180  ;;  %v3509_v56 = vadd.f32 %v5169_v33, %v3029_v48  ;;  %v1594_v57 = vadd.f32 %v5177_v47, %v1114_v49  ;;  %5192 = vlog2.f32 %v1257_v42 }
 0x118   : > { %v5183_v59 = vpop.eup %5182  ;;  %v2764_v60 = vmul.f32 0.6931472, %v5181_v55  ;;  %5194 = vlog2.f32 %v1737_v45  ;;  %v1688_v55 = vld [vmem:[%s6478_s18 + $0x3d8] sm:$0xff] }
 0x119   : > { %v5185_v63 = vpop.eup %5184  ;;  %v3989_v0 = vadd.f32 %v5171_v37, %v3509_v56  ;;  %v2074_v1 = vadd.f32 %v5179_v52, %v1594_v57  ;;  %5196 = vlog2.f32 %v2217_v50 }
 0x11a   : > { %v5187_v3 = vpop.eup %5186  ;;  %v2842_v4 = vmul.f32 %v2764_v60, %v6496_v24  ;;  %v3244_v5 = vmul.f32 0.6931472, %v5185_v63  ;;  %5198 = vlog2.f32 %v2697_v53  ;;  %v2168_v60 = vld [vmem:[%s6478_s18 + $0x3e0] sm:$0xff] }
 0x11b   : > { %v5189_v6 = vpop.eup %5188  ;;  %4148 = vadd.xlane.f32.xlu0 %v3989_v0  ;;  %v3724_v7 = vmul.f32 0.6931472, %v5187_v3  ;;  %5200 = vlog2.f32 %v3177_v58  ;;  %v2554_v14 = vadd.f32 %v5183_v59, %v2074_v1  ;;  %v1256_v59 = vmax.f32 %v1208_v46, 1e-06  ;;  %v2648_v0 = vld [vmem:[%s6478_s18 + $0x3e8] sm:$0xff] }
 0x11c   : > { %v5191_v9 = vpop.eup %5190  ;;  %v2907_v10 = vmul.f32 1.442695, %v2842_v4  ;;  %v3322_v11 = vmul.f32 %v3244_v5, %v6496_v24  ;;  %v361_v12 = vmul.f32 0.6931472, %v5189_v6  ;;  %5202 = vlog2.f32 %v3657_v61  ;;  %v3128_v4 = vld [vmem:[%s6478_s18 + $0x3f0] sm:$0xff] }
 0x11d   : > { %v5193_v13 = vpop.eup %5192  ;;  %v3802_v15 = vmul.f32 %v3724_v7, %v6496_v24  ;;  %v842_v16 = vmul.f32 0.6931472, %v5191_v9  ;;  %5204 = vlog2.f32 %v295_v2  ;;  %v1736_v3 = vmax.f32 %v1688_v55, 1e-06  ;;  %v3608_v9 = vld [vmem:[%s6478_s18 + $0x3f8] sm:$0xff] }
 0x11e   : > { %v5195_v17 = vpop.eup %5194  ;;  %5206 = vpow2.f32 %v2907_v10  ;;  %v3387_v18 = vmul.f32 1.442695, %v3322_v11  ;;  %v441_v19 = vmul.f32 %v6496_v24, %v361_v12  ;;  %v1322_v20 = vmul.f32 0.6931472, %v5193_v13  ;;  %v252_v12 = vld [vmem:[%s6478_s18 + $0x500] sm:$0xff] }
 0x11f   : > { %v5197_v21 = vpop.eup %5196  ;;  %v3867_v23 = vmul.f32 1.442695, %v3802_v15  ;;  %v921_v25 = vmul.f32 %v842_v16, %v6496_v24  ;;  %v1802_v26 = vmul.f32 0.6931472, %v5195_v17  ;;  %5208 = vlog2.f32 %v776_v8  ;;  %v733_v16 = vld [vmem:[%s6478_s18 + $0x508] sm:$0xff] }
 0x120   : > { %v5199_v27 = vpop.eup %5198  ;;  %5210 = vpow2.f32 %v3387_v18  ;;  %v505_v28 = vmul.f32 1.442695, %v441_v19  ;;  %v1401_v29 = vmul.f32 %v1322_v20, %v6496_v24  ;;  %v2282_v30 = vmul.f32 0.6931472, %v5197_v21  ;;  %v1213_v19 = vld [vmem:[%s6478_s18 + $0x510] sm:$0xff] }
 0x121   : > { %v5201_v22 = vpop.eup %5200  ;;  %5212 = vpow2.f32 %v3867_v23  ;;  %v985_v31 = vmul.f32 1.442695, %v921_v25  ;;  %v1881_v32 = vmul.f32 %v1802_v26, %v6496_v24  ;;  %v2762_v33 = vmul.f32 0.6931472, %v5199_v27  ;;  %v1693_v25 = vld [vmem:[%s6478_s18 + $0x518] sm:$0xff] }
 0x122   : > { %v5203_v34 = vpop.eup %5202  ;;  %5214 = vpow2.f32 %v505_v28  ;;  %v1465_v35 = vmul.f32 1.442695, %v1401_v29  ;;  %v2361_v36 = vmul.f32 %v2282_v30, %v6496_v24  ;;  %v3242_v37 = vmul.f32 0.6931472, %v5201_v22  ;;  %v2173_v22 = vld [vmem:[%s6478_s18 + $0x520] sm:$0xff] }
 0x123   : > { %v5205_v38 = vpop.eup %5204  ;;  %5216 = vpow2.f32 %v985_v31  ;;  %v1945_v39 = vmul.f32 1.442695, %v1881_v32  ;;  %v2841_v40 = vmul.f32 %v2762_v33, %v6496_v24  ;;  %v3722_v41 = vmul.f32 0.6931472, %v5203_v34 }
 0x124   : > { %v5207_v42 = vpop.eup %5206  ;;  %5218 = vpow2.f32 %v1465_v35  ;;  %v2425_v43 = vmul.f32 1.442695, %v2361_v36  ;;  %v3321_v44 = vmul.f32 %v3242_v37, %v6496_v24  ;;  %v359_v45 = vmul.f32 0.6931472, %v5205_v38  ;;  %v2653_v36 = vld [vmem:[%s6478_s18 + $0x528] sm:$0xff] }
 0x125   : > { %v5209_v47 = vpop.eup %5208  ;;  %v3034_v48 = vadd.f32 %v5207_v42, %v2554_v14  ;;  %5220 = vpow2.f32 %v1945_v39  ;;  %v2905_v49 = vmul.f32 1.442695, %v2841_v40  ;;  %v3801_v50 = vmul.f32 %v3722_v41, %v6496_v24 }
 0x126   : > { %v5211_v51 = vpop.eup %5210  ;;  %5222 = vpow2.f32 %v2425_v43  ;;  %v3385_v52 = vmul.f32 1.442695, %v3321_v44  ;;  %v440_v53 = vmul.f32 %v6496_v24, %v359_v45  ;;  %v840_v54 = vmul.f32 0.6931472, %v5209_v47 }
 0x127   : > { %v5213_v56 = vpop.eup %5212  ;;  %v3514_v57 = vadd.f32 %v5211_v51, %v3034_v48  ;;  %5224 = vpow2.f32 %v2905_v49  ;;  %v3865_v58 = vmul.f32 1.442695, %v3801_v50  ;;  %v2216_v8 = vmax.f32 %v2168_v60, 1e-06 }
 0x128   : > { %v5215_v61 = vpop.eup %5214  ;;  %5226 = vpow2.f32 %v3385_v52  ;;  %v503_v62 = vmul.f32 1.442695, %v440_v53  ;;  %v920_v63 = vmul.f32 %v840_v54, %v6496_v24  ;;  %v2696_v11 = vmax.f32 %v2648_v0, 1e-06 }
 0x129   : > { %v5217_v1 = vpop.eup %5216  ;;  %v3994_v2 = vadd.f32 %v5213_v56, %v3514_v57  ;;  %5228 = vpow2.f32 %v3865_v58  ;;  %v3176_v15 = vmax.f32 %v3128_v4, 1e-06  ;;  %v3656_v18 = vmax.f32 %v3608_v9, 1e-06 }
 0x12a   : > { %v5219_v5 = vpop.eup %5218  ;;  %v1113_v6 = vadd.f32 %v5217_v1, %v5215_v61  ;;  %5230 = vpow2.f32 %v503_v62  ;;  %v983_v7 = vmul.f32 1.442695, %v920_v63  ;;  %v300_v23 = vmax.f32 %v252_v12, 1e-06 }
 0x12b   : > { %v5221_v10 = vpop.eup %5220  ;;  %4158 = vadd.xlane.f32.xlu2 %v3994_v2  ;;  %5232 = vlog2.f32 %v1256_v59  ;;  %v781_v27 = vmax.f32 %v733_v16, 1e-06  ;;  %v1261_v30 = vmax.f32 %v1213_v19, 1e-06  ;;  %v1741_v32 = vmax.f32 %v1693_v25, 1e-06 }
 0x12c   : > { %v5223_v13 = vpop.eup %5222  ;;  %v1593_v14 = vadd.f32 %v5219_v5, %v1113_v6  ;;  %5234 = vpow2.f32 %v983_v7  ;;  %v2221_v38 = vmax.f32 %v2173_v22, 1e-06  ;;  %v2701_v45 = vmax.f32 %v2653_v36, 1e-06  ;;  %v1212_v36 = vld [vmem:[%s6478_s18 + $0x4d0] sm:$0xff] }
 0x12d   : > { %v5225_v17 = vpop.eup %5224  ;;  %5236 = vlog2.f32 %v1736_v3 }
 0x12e   : > { %v5227_v20 = vpop.eup %5226  ;;  %v2073_v21 = vadd.f32 %v5221_v10, %v1593_v14  ;;  %5238 = vlog2.f32 %v2216_v8  ;;  %v3133_v10 = vld [vmem:[%s6478_s18 + $0x530] sm:$0xff] }
 0x12f   : > { %v5229_v26 = vpop.eup %5228  ;;  %5240 = vlog2.f32 %v2696_v11 }
 0x130   : > { %v5231_v28 = vpop.eup %5230  ;;  %v2553_v29 = vadd.f32 %v5223_v13, %v2073_v21  ;;  %5242 = vlog2.f32 %v3176_v15 }
 0x131   : > { %v5233_v31 = vpop.eup %5232  ;;  %5244 = vlog2.f32 %v3656_v18  ;;  %v3613_v18 = vld [vmem:[%s6478_s18 + $0x538] sm:$0xff] }
 0x132   : > { %v5235_v33 = vpop.eup %5234  ;;  %v3033_v34 = vadd.f32 %v5225_v17, %v2553_v29  ;;  %v1320_v35 = vmul.f32 0.6931472, %v5233_v31  ;;  %5246 = vlog2.f32 %v300_v23  ;;  %v3181_v23 = vmax.f32 %v3133_v10, 1e-06  ;;  %v251_v29 = vld [vmem:[%s6478_s18 + $0x4c0] sm:$0xff]  ;;  %v1211_v10 = vld [vmem:[%s6478_s18 + $0x490] sm:$0xff] }
 0x133   : > { %v5237_v37 = vpop.eup %5236  ;;  %5248 = vlog2.f32 %v781_v27  ;;  %v1112_v52 = vadd.f32 %v5235_v33, %v5231_v28  ;;  %v3661_v31 = vmax.f32 %v3613_v18, 1e-06 }
 0x134   : > { %v5239_v39 = vpop.eup %5238  ;;  %v3513_v40 = vadd.f32 %v5227_v20, %v3033_v34  ;;  %v1400_v41 = vmul.f32 %v1320_v35, %v6496_v24  ;;  %v1800_v42 = vmul.f32 0.6931472, %v5237_v37  ;;  %5250 = vlog2.f32 %v1261_v30 }
 0x135   : > { %v5241_v43 = vpop.eup %5240  ;;  %v2280_v44 = vmul.f32 0.6931472, %v5239_v39  ;;  %5252 = vlog2.f32 %v1741_v32  ;;  %v732_v32 = vld [vmem:[%s6478_s18 + $0x4c8] sm:$0xff]  ;;  %v299_v39 = vmax.f32 %v251_v29, 1e-06 }
 0x136   : > { %v5243_v46 = vpop.eup %5242  ;;  %v3993_v47 = vadd.f32 %v5229_v26, %v3513_v40  ;;  %v1463_v48 = vmul.f32 1.442695, %v1400_v41  ;;  %v1880_v49 = vmul.f32 %v1800_v42, %v6496_v24  ;;  %v2760_v50 = vmul.f32 0.6931472, %v5241_v43  ;;  %v1692_v40 = vld [vmem:[%s6478_s18 + $0x4d8] sm:$0xff] }
 0x137   : > { %v5245_v51 = vpop.eup %5244  ;;  %v2360_v53 = vmul.f32 %v2280_v44, %v6496_v24  ;;  %v3240_v54 = vmul.f32 0.6931472, %v5243_v46  ;;  %5254 = vlog2.f32 %v2221_v38  ;;  %v780_v43 = vmax.f32 %v732_v32, 1e-06  ;;  %v2172_v44 = vld [vmem:[%s6478_s18 + $0x4e0] sm:$0xff] }
 0x138   : > { %v5247_v55 = vpop.eup %5246  ;;  %4156 = vadd.xlane.f32.xlu1 %v3993_v47  ;;  %5256 = vpow2.f32 %v1463_v48  ;;  %v1943_v56 = vmul.f32 1.442695, %v1880_v49  ;;  %v2840_v57 = vmul.f32 %v2760_v50, %v6496_v24  ;;  %v3720_v58 = vmul.f32 0.6931472, %v5245_v51  ;;  %v2652_v48 = vld [vmem:[%s6478_s18 + $0x4e8] sm:$0xff]  ;;  %v3132_v51 = vld [vmem:[%s6478_s18 + $0x4f0] sm:$0xff] }
 0x139   : > { %v5249_v59 = vpop.eup %5248  ;;  %v2423_v60 = vmul.f32 1.442695, %v2360_v53  ;;  %v3320_v61 = vmul.f32 %v3240_v54, %v6496_v24  ;;  %v369_v62 = vmul.f32 0.6931472, %v5247_v55  ;;  %5258 = vlog2.f32 %v2701_v45 }
 0x13a   : > { %v5251_v63 = vpop.eup %5250  ;;  %5260 = vpow2.f32 %v1943_v56  ;;  %v2903_v0 = vmul.f32 1.442695, %v2840_v57  ;;  %v3800_v1 = vmul.f32 %v3720_v58, %v6496_v24  ;;  %v850_v2 = vmul.f32 0.6931472, %v5249_v59  ;;  %v3612_v56 = vld [vmem:[%s6478_s18 + $0x4f8] sm:$0xff]  ;;  %v250_v59 = vld [vmem:[%s6478_s18 + $0x480] sm:$0xff] }
 0x13b   : > { %v5253_v3 = vpop.eup %5252  ;;  %5262 = vpow2.f32 %v2423_v60  ;;  %v3383_v4 = vmul.f32 1.442695, %v3320_v61  ;;  %v445_v5 = vmul.f32 %v6496_v24, %v369_v62  ;;  %v1330_v6 = vmul.f32 0.6931472, %v5251_v63 }
 0x13c   : > { %5264 = vpow2.f32 %v2903_v0  ;;  %v3863_v7 = vmul.f32 1.442695, %v3800_v1  ;;  %v925_v8 = vmul.f32 %v850_v2, %v6496_v24  ;;  %v1810_v9 = vmul.f32 0.6931472, %v5253_v3  ;;  %v731_v3 = vld [vmem:[%s6478_s18 + $0x488] sm:$0xff] }
 0x13d   : > { %v5255_v11 = vpop.eup %5254  ;;  %5266 = vpow2.f32 %v3383_v4  ;;  %v513_v12 = vmul.f32 1.442695, %v445_v5  ;;  %v1405_v13 = vmul.f32 %v1330_v6, %v6496_v24  ;;  %v1260_v47 = vmax.f32 %v1212_v36, 1e-06 }
 0x13e   : > { %v5257_v14 = vpop.eup %5256  ;;  %5268 = vpow2.f32 %v3863_v7  ;;  %v993_v15 = vmul.f32 1.442695, %v925_v8  ;;  %v1885_v16 = vmul.f32 %v1810_v9, %v6496_v24  ;;  %v2290_v17 = vmul.f32 0.6931472, %v5255_v11 }
 0x13f   : > { %v5259_v19 = vpop.eup %5258  ;;  %v1592_v20 = vadd.f32 %v5257_v14, %v1112_v52  ;;  %5270 = vpow2.f32 %v513_v12  ;;  %v1473_v21 = vmul.f32 1.442695, %v1405_v13  ;;  %v1740_v50 = vmax.f32 %v1692_v40, 1e-06 }
 0x140   : > { %v5261_v25 = vpop.eup %5260  ;;  %5272 = vpow2.f32 %v993_v15  ;;  %v1953_v26 = vmul.f32 1.442695, %v1885_v16  ;;  %v2365_v27 = vmul.f32 %v2290_v17, %v6496_v24  ;;  %v2770_v28 = vmul.f32 0.6931472, %v5259_v19 }
 0x141   : > { %v5263_v30 = vpop.eup %5262  ;;  %v2072_v22 = vadd.f32 %v5261_v25, %v1592_v20  ;;  %5274 = vpow2.f32 %v1473_v21  ;;  %v2220_v55 = vmax.f32 %v2172_v44, 1e-06  ;;  %v2700_v58 = vmax.f32 %v2652_v48, 1e-06 }
 0x142   : > { %v5265_v33 = vpop.eup %5264  ;;  %5276 = vpow2.f32 %v1953_v26  ;;  %v2433_v34 = vmul.f32 1.442695, %v2365_v27  ;;  %v2845_v35 = vmul.f32 %v2770_v28, %v6496_v24  ;;  %v3180_v63 = vmax.f32 %v3132_v51, 1e-06 }
 0x143   : > { %v5267_v37 = vpop.eup %5266  ;;  %v2552_v38 = vadd.f32 %v5263_v30, %v2072_v22  ;;  %5278 = vlog2.f32 %v3181_v23  ;;  %v3660_v2 = vmax.f32 %v3612_v56, 1e-06  ;;  %v298_v6 = vmax.f32 %v250_v59, 1e-06  ;;  %v2171_v59 = vld [vmem:[%s6478_s18 + $0x4a0] sm:$0xff] }
 0x144   : > { %v5269_v41 = vpop.eup %5268  ;;  %5280 = vpow2.f32 %v2433_v34  ;;  %v2913_v42 = vmul.f32 1.442695, %v2845_v35  ;;  %v779_v13 = vmax.f32 %v731_v3, 1e-06  ;;  %v1259_v20 = vmax.f32 %v1211_v10, 1e-06 }
 0x145   : > { %v5271_v45 = vpop.eup %5270  ;;  %v3032_v46 = vadd.f32 %v5265_v33, %v2552_v38  ;;  %5282 = vlog2.f32 %v3661_v31 }
 0x146   : > { %v5273_v49 = vpop.eup %5272  ;;  %5284 = vpow2.f32 %v2913_v42 }
 0x147   : > { %v5275_v52 = vpop.eup %5274  ;;  %v3512_v53 = vadd.f32 %v5267_v37, %v3032_v46  ;;  %v1117_v54 = vadd.f32 %v5273_v49, %v5271_v45  ;;  %5286 = vlog2.f32 %v299_v39 }
 0x148   : > { %v5277_v57 = vpop.eup %5276  ;;  %5288 = vlog2.f32 %v780_v43 }
 0x149   : > { %v5279_v60 = vpop.eup %5278  ;;  %v3992_v61 = vadd.f32 %v5269_v41, %v3512_v53  ;;  %v1597_v62 = vadd.f32 %v5275_v52, %v1117_v54  ;;  %5290 = vlog2.f32 %v1260_v47 }
 0x14a   : > { %v5281_v0 = vpop.eup %5280  ;;  %v3250_v1 = vmul.f32 0.6931472, %v5279_v60  ;;  %5292 = vlog2.f32 %v1740_v50  ;;  %v1691_v50 = vld [vmem:[%s6478_s18 + $0x498] sm:$0xff] }
 0x14b   : > { %v5283_v4 = vpop.eup %5282  ;;  %4154 = vadd.xlane.f32.xlu0 %v3992_v61  ;;  %v2077_v5 = vadd.f32 %v5277_v57, %v1597_v62  ;;  %5294 = vlog2.f32 %v2220_v55 }
 0x14c   : > { %v5285_v7 = vpop.eup %5284  ;;  %v3325_v8 = vmul.f32 %v3250_v1, %v6496_v24  ;;  %v3730_v9 = vmul.f32 0.6931472, %v5283_v4  ;;  %5296 = vlog2.f32 %v2700_v58  ;;  %v2651_v4 = vld [vmem:[%s6478_s18 + $0x4a8] sm:$0xff] }
 0x14d   : > { %v5287_v11 = vpop.eup %5286  ;;  %v2557_v12 = vadd.f32 %v5281_v0, %v2077_v5  ;;  %5298 = vlog2.f32 %v3180_v63  ;;  %v1739_v63 = vmax.f32 %v1691_v50, 1e-06 }
 0x14e   : > { %v5289_v14 = vpop.eup %5288  ;;  %v3393_v15 = vmul.f32 1.442695, %v3325_v8  ;;  %v3805_v16 = vmul.f32 %v3730_v9, %v6496_v24  ;;  %v367_v17 = vmul.f32 0.6931472, %v5287_v11  ;;  %5300 = vlog2.f32 %v3660_v2 }
 0x14f   : > { %v5291_v18 = vpop.eup %5290  ;;  %v848_v19 = vmul.f32 0.6931472, %v5289_v14  ;;  %5302 = vlog2.f32 %v298_v6  ;;  %v3037_v28 = vadd.f32 %v5285_v7, %v2557_v12  ;;  %v2219_v6 = vmax.f32 %v2171_v59, 1e-06  ;;  %v3131_v7 = vld [vmem:[%s6478_s18 + $0x4b0] sm:$0xff]  ;;  %v3611_v12 = vld [vmem:[%s6478_s18 + $0x4b8] sm:$0xff] }
 0x150   : > { %v5293_v21 = vpop.eup %5292  ;;  %5304 = vpow2.f32 %v3393_v15  ;;  %v3873_v23 = vmul.f32 1.442695, %v3805_v16  ;;  %v444_v25 = vmul.f32 %v6496_v24, %v367_v17  ;;  %v1328_v26 = vmul.f32 0.6931472, %v5291_v18  ;;  %v255_v15 = vld [vmem:[%s6478_s18 + $0x5c0] sm:$0xff] }
 0x151   : > { %v5295_v27 = vpop.eup %5294  ;;  %v924_v29 = vmul.f32 %v848_v19, %v6496_v24  ;;  %v1808_v30 = vmul.f32 0.6931472, %v5293_v21  ;;  %5306 = vlog2.f32 %v779_v13  ;;  %v2699_v14 = vmax.f32 %v2651_v4, 1e-06 }
 0x152   : > { %v5297_v22 = vpop.eup %5296  ;;  %5308 = vpow2.f32 %v3873_v23  ;;  %v511_v31 = vmul.f32 1.442695, %v444_v25  ;;  %v1404_v32 = vmul.f32 %v1328_v26, %v6496_v24  ;;  %v2288_v33 = vmul.f32 0.6931472, %v5295_v27  ;;  %v1216_v25 = vld [vmem:[%s6478_s18 + $0x5d0] sm:$0xff] }
 0x153   : > { %v5299_v34 = vpop.eup %5298  ;;  %v991_v35 = vmul.f32 1.442695, %v924_v29  ;;  %v1884_v36 = vmul.f32 %v1808_v30, %v6496_v24  ;;  %v2768_v37 = vmul.f32 0.6931472, %v5297_v22  ;;  %5310 = vlog2.f32 %v1259_v20  ;;  %v736_v20 = vld [vmem:[%s6478_s18 + $0x5c8] sm:$0xff]  ;;  %v1696_v29 = vld [vmem:[%s6478_s18 + $0x5d8] sm:$0xff] }
 0x154   : > { %v5301_v38 = vpop.eup %5300  ;;  %5312 = vpow2.f32 %v511_v31  ;;  %v1471_v39 = vmul.f32 1.442695, %v1404_v32  ;;  %v2364_v40 = vmul.f32 %v2288_v33, %v6496_v24  ;;  %v3248_v41 = vmul.f32 0.6931472, %v5299_v34  ;;  %v2176_v34 = vld [vmem:[%s6478_s18 + $0x5e0] sm:$0xff] }
 0x155   : > { %v5303_v42 = vpop.eup %5302  ;;  %5314 = vpow2.f32 %v991_v35  ;;  %v1951_v43 = vmul.f32 1.442695, %v1884_v36  ;;  %v2844_v44 = vmul.f32 %v2768_v37, %v6496_v24  ;;  %v3728_v45 = vmul.f32 0.6931472, %v5301_v38 }
 0x156   : > { %v5305_v46 = vpop.eup %5304  ;;  %5316 = vpow2.f32 %v1471_v39  ;;  %v2431_v47 = vmul.f32 1.442695, %v2364_v40  ;;  %v3324_v48 = vmul.f32 %v3248_v41, %v6496_v24  ;;  %v365_v49 = vmul.f32 0.6931472, %v5303_v42  ;;  %v2656_v40 = vld [vmem:[%s6478_s18 + $0x5e8] sm:$0xff] }
 0x157   : > { %v5307_v51 = vpop.eup %5306  ;;  %v3517_v52 = vadd.f32 %v5305_v46, %v3037_v28  ;;  %5318 = vpow2.f32 %v1951_v43  ;;  %v2911_v53 = vmul.f32 1.442695, %v2844_v44  ;;  %v3804_v54 = vmul.f32 %v3728_v45, %v6496_v24 }
 0x158   : > { %v5309_v55 = vpop.eup %5308  ;;  %5320 = vpow2.f32 %v2431_v47  ;;  %v3391_v56 = vmul.f32 1.442695, %v3324_v48  ;;  %v443_v57 = vmul.f32 %v6496_v24, %v365_v49  ;;  %v846_v58 = vmul.f32 0.6931472, %v5307_v51  ;;  %v3136_v47 = vld [vmem:[%s6478_s18 + $0x5f0] sm:$0xff] }
 0x159   : > { %v5311_v60 = vpop.eup %5310  ;;  %v3997_v61 = vadd.f32 %v5309_v55, %v3517_v52  ;;  %5322 = vpow2.f32 %v2911_v53  ;;  %v3871_v62 = vmul.f32 1.442695, %v3804_v54  ;;  %v3179_v19 = vmax.f32 %v3131_v7, 1e-06 }
 0x15a   : > { %v5313_v0 = vpop.eup %5312  ;;  %5324 = vpow2.f32 %v3391_v56  ;;  %v509_v1 = vmul.f32 1.442695, %v443_v57  ;;  %v923_v2 = vmul.f32 %v846_v58, %v6496_v24  ;;  %v1326_v3 = vmul.f32 0.6931472, %v5311_v60 }
 0x15b   : > { %v5315_v5 = vpop.eup %5314  ;;  %4164 = vadd.xlane.f32.xlu2 %v3997_v61  ;;  %5326 = vpow2.f32 %v3871_v62  ;;  %v3659_v23 = vmax.f32 %v3611_v12, 1e-06  ;;  %v303_v28 = vmax.f32 %v255_v15, 1e-06  ;;  %v784_v22 = vmax.f32 %v736_v20, 1e-06 }
 0x15c   : > { %v5317_v8 = vpop.eup %5316  ;;  %v1116_v9 = vadd.f32 %v5315_v5, %v5313_v0  ;;  %5328 = vpow2.f32 %v509_v1  ;;  %v989_v10 = vmul.f32 1.442695, %v923_v2  ;;  %v1403_v11 = vmul.f32 %v1326_v3, %v6496_v24 }
 0x15d   : > { %v5319_v13 = vpop.eup %5318  ;;  %5330 = vlog2.f32 %v1739_v63  ;;  %v1264_v33 = vmax.f32 %v1216_v25, 1e-06  ;;  %v1744_v36 = vmax.f32 %v1696_v29, 1e-06  ;;  %v2224_v42 = vmax.f32 %v2176_v34, 1e-06 }
 0x15e   : > { %v5321_v16 = vpop.eup %5320  ;;  %v1596_v17 = vadd.f32 %v5317_v8, %v1116_v9  ;;  %5332 = vpow2.f32 %v989_v10  ;;  %v1469_v18 = vmul.f32 1.442695, %v1403_v11  ;;  %v2704_v50 = vmax.f32 %v2656_v40, 1e-06  ;;  %v1215_v40 = vld [vmem:[%s6478_s18 + $0x590] sm:$0xff] }
 0x15f   : > { %v5323_v21 = vpop.eup %5322  ;;  %5334 = vlog2.f32 %v2219_v6  ;;  %v3184_v58 = vmax.f32 %v3136_v47, 1e-06 }
 0x160   : > { %v5325_v26 = vpop.eup %5324  ;;  %v2076_v27 = vadd.f32 %v5319_v13, %v1596_v17  ;;  %5336 = vpow2.f32 %v1469_v18 }
 0x161   : > { %v5327_v30 = vpop.eup %5326  ;;  %5338 = vlog2.f32 %v2699_v14  ;;  %v3616_v14 = vld [vmem:[%s6478_s18 + $0x5f8] sm:$0xff] }
 0x162   : > { %v5329_v31 = vpop.eup %5328  ;;  %v2556_v32 = vadd.f32 %v5321_v16, %v2076_v27  ;;  %5340 = vlog2.f32 %v3179_v19 }
 0x163   : > { %v5331_v35 = vpop.eup %5330  ;;  %5342 = vlog2.f32 %v3659_v23  ;;  %v254_v23 = vld [vmem:[%s6478_s18 + $0x580] sm:$0xff] }
 0x164   : > { %v5333_v37 = vpop.eup %5332  ;;  %v3036_v38 = vadd.f32 %v5323_v21, %v2556_v32  ;;  %v1806_v39 = vmul.f32 0.6931472, %v5331_v35  ;;  %5344 = vlog2.f32 %v303_v28  ;;  %v3664_v28 = vmax.f32 %v3616_v14, 1e-06  ;;  %v735_v32 = vld [vmem:[%s6478_s18 + $0x588] sm:$0xff]  ;;  %v1214_v14 = vld [vmem:[%s6478_s18 + $0x550] sm:$0xff] }
 0x165   : > { %v5335_v41 = vpop.eup %5334  ;;  %5346 = vlog2.f32 %v784_v22  ;;  %v1115_v49 = vadd.f32 %v5333_v37, %v5329_v31  ;;  %v302_v35 = vmax.f32 %v254_v23, 1e-06  ;;  %v1694_v23 = vld [vmem:[%s6478_s18 + $0x558] sm:$0xff] }
 0x166   : > { %v5337_v43 = vpop.eup %5336  ;;  %v3516_v44 = vadd.f32 %v5325_v26, %v3036_v38  ;;  %v1883_v45 = vmul.f32 %v1806_v39, %v6496_v24  ;;  %v2286_v46 = vmul.f32 0.6931472, %v5335_v41  ;;  %5348 = vlog2.f32 %v1264_v33 }
 0x167   : > { %v5339_v48 = vpop.eup %5338  ;;  %5350 = vlog2.f32 %v1744_v36  ;;  %v1595_v0 = vadd.f32 %v5337_v43, %v1115_v49  ;;  %v783_v43 = vmax.f32 %v735_v32, 1e-06 }
 0x168   : > { %v5341_v51 = vpop.eup %5340  ;;  %v3996_v52 = vadd.f32 %v5327_v30, %v3516_v44  ;;  %v1949_v53 = vmul.f32 1.442695, %v1883_v45  ;;  %v2363_v54 = vmul.f32 %v2286_v46, %v6496_v24  ;;  %v2766_v55 = vmul.f32 0.6931472, %v5339_v48  ;;  %v1695_v44 = vld [vmem:[%s6478_s18 + $0x598] sm:$0xff]  ;;  %v2175_v48 = vld [vmem:[%s6478_s18 + $0x5a0] sm:$0xff] }
 0x169   : > { %v5343_v56 = vpop.eup %5342  ;;  %v3246_v57 = vmul.f32 0.6931472, %v5341_v51  ;;  %5352 = vlog2.f32 %v2224_v42  ;;  %v1263_v51 = vmax.f32 %v1215_v40, 1e-06 }
 0x16a   : > { %v5345_v59 = vpop.eup %5344  ;;  %4162 = vadd.xlane.f32.xlu1 %v3996_v52  ;;  %5354 = vpow2.f32 %v1949_v53  ;;  %v2429_v60 = vmul.f32 1.442695, %v2363_v54  ;;  %v2843_v61 = vmul.f32 %v2766_v55, %v6496_v24  ;;  %v3726_v62 = vmul.f32 0.6931472, %v5343_v56  ;;  %v2655_v52 = vld [vmem:[%s6478_s18 + $0x5a8] sm:$0xff]  ;;  %v3135_v56 = vld [vmem:[%s6478_s18 + $0x5b0] sm:$0xff] }
 0x16b   : > { %v5347_v63 = vpop.eup %5346  ;;  %v3323_v1 = vmul.f32 %v3246_v57, %v6496_v24  ;;  %v375_v2 = vmul.f32 0.6931472, %v5345_v59  ;;  %5356 = vlog2.f32 %v2704_v50  ;;  %v1743_v55 = vmax.f32 %v1695_v44, 1e-06 }
 0x16c   : > { %v5349_v3 = vpop.eup %5348  ;;  %5358 = vpow2.f32 %v2429_v60  ;;  %v2909_v4 = vmul.f32 1.442695, %v2843_v61  ;;  %v3803_v5 = vmul.f32 %v3726_v62, %v6496_v24  ;;  %v856_v6 = vmul.f32 0.6931472, %v5347_v63  ;;  %v3615_v61 = vld [vmem:[%s6478_s18 + $0x5b8] sm:$0xff] }
 0x16d   : > { %v5351_v7 = vpop.eup %5350  ;;  %v3389_v8 = vmul.f32 1.442695, %v3323_v1  ;;  %v448_v9 = vmul.f32 %v6496_v24, %v375_v2  ;;  %v1336_v10 = vmul.f32 0.6931472, %v5349_v3  ;;  %5360 = vlog2.f32 %v3184_v58 }
 0x16e   : > { %5362 = vpow2.f32 %v2909_v4  ;;  %v3869_v11 = vmul.f32 1.442695, %v3803_v5  ;;  %v928_v12 = vmul.f32 %v856_v6, %v6496_v24  ;;  %v1816_v13 = vmul.f32 0.6931472, %v5351_v7  ;;  %v734_v7 = vld [vmem:[%s6478_s18 + $0x548] sm:$0xff] }
 0x16f   : > { %v5353_v15 = vpop.eup %5352  ;;  %5364 = vpow2.f32 %v3389_v8  ;;  %v519_v16 = vmul.f32 1.442695, %v448_v9  ;;  %v1408_v17 = vmul.f32 %v1336_v10, %v6496_v24  ;;  %v2223_v60 = vmax.f32 %v2175_v48, 1e-06 }
 0x170   : > { %v5355_v18 = vpop.eup %5354  ;;  %5366 = vpow2.f32 %v3869_v11  ;;  %v999_v19 = vmul.f32 1.442695, %v928_v12  ;;  %v1888_v20 = vmul.f32 %v1816_v13, %v6496_v24  ;;  %v2296_v21 = vmul.f32 0.6931472, %v5353_v15 }
 0x171   : > { %v5357_v25 = vpop.eup %5356  ;;  %v2075_v26 = vadd.f32 %v5355_v18, %v1595_v0  ;;  %5368 = vpow2.f32 %v519_v16  ;;  %v1479_v27 = vmul.f32 1.442695, %v1408_v17  ;;  %v2703_v63 = vmax.f32 %v2655_v52, 1e-06  ;;  %v253_v0 = vld [vmem:[%s6478_s18 + $0x540] sm:$0xff] }
 0x172   : > { %v5359_v29 = vpop.eup %5358  ;;  %5370 = vpow2.f32 %v999_v19  ;;  %v1959_v30 = vmul.f32 1.442695, %v1888_v20  ;;  %v2368_v22 = vmul.f32 %v2296_v21, %v6496_v24  ;;  %v2776_v31 = vmul.f32 0.6931472, %v5357_v25 }
 0x173   : > { %v5361_v33 = vpop.eup %5360  ;;  %v2555_v34 = vadd.f32 %v5359_v29, %v2075_v26  ;;  %5372 = vpow2.f32 %v1479_v27  ;;  %v3183_v3 = vmax.f32 %v3135_v56, 1e-06  ;;  %v3663_v6 = vmax.f32 %v3615_v61, 1e-06 }
 0x174   : > { %v5363_v36 = vpop.eup %5362  ;;  %5374 = vpow2.f32 %v1959_v30  ;;  %v2439_v37 = vmul.f32 1.442695, %v2368_v22  ;;  %v2848_v38 = vmul.f32 %v2776_v31, %v6496_v24  ;;  %v3256_v39 = vmul.f32 0.6931472, %v5361_v33 }
 0x175   : > { %v5365_v41 = vpop.eup %5364  ;;  %v3035_v42 = vadd.f32 %v5363_v36, %v2555_v34  ;;  %5376 = vlog2.f32 %v3664_v28  ;;  %v301_v10 = vmax.f32 %v253_v0, 1e-06  ;;  %v782_v17 = vmax.f32 %v734_v7, 1e-06  ;;  %v3134_v7 = vld [vmem:[%s6478_s18 + $0x570] sm:$0xff] }
 0x176   : > { %v5367_v45 = vpop.eup %5366  ;;  %5378 = vpow2.f32 %v2439_v37  ;;  %v2919_v46 = vmul.f32 1.442695, %v2848_v38  ;;  %v3328_v47 = vmul.f32 %v3256_v39, %v6496_v24  ;;  %v1262_v27 = vmax.f32 %v1214_v14, 1e-06 }
 0x177   : > { %v5369_v49 = vpop.eup %5368  ;;  %v3515_v50 = vadd.f32 %v5365_v41, %v3035_v42  ;;  %5380 = vlog2.f32 %v302_v35  ;;  %v1742_v33 = vmax.f32 %v1694_v23, 1e-06 }
 0x178   : > { %v5371_v53 = vpop.eup %5370  ;;  %5382 = vpow2.f32 %v2919_v46  ;;  %v3399_v54 = vmul.f32 1.442695, %v3328_v47 }
 0x179   : > { %v5373_v57 = vpop.eup %5372  ;;  %v3995_v58 = vadd.f32 %v5367_v45, %v3515_v50  ;;  %v1120_v59 = vadd.f32 %v5371_v53, %v5369_v49  ;;  %5384 = vlog2.f32 %v783_v43 }
 0x17a   : > { %v5375_v62 = vpop.eup %5374  ;;  %5386 = vpow2.f32 %v3399_v54  ;;  %v2174_v54 = vld [vmem:[%s6478_s18 + $0x560] sm:$0xff] }
 0x17b   : > { %v5377_v1 = vpop.eup %5376  ;;  %4160 = vadd.xlane.f32.xlu0 %v3995_v58  ;;  %v1600_v2 = vadd.f32 %v5373_v57, %v1120_v59  ;;  %5388 = vlog2.f32 %v1263_v51 }
 0x17c   : > { %v5379_v4 = vpop.eup %5378  ;;  %v3736_v5 = vmul.f32 0.6931472, %v5377_v1  ;;  %5390 = vlog2.f32 %v1743_v55 }
 0x17d   : > { %v5381_v8 = vpop.eup %5380  ;;  %v2080_v9 = vadd.f32 %v5375_v62, %v1600_v2  ;;  %5392 = vlog2.f32 %v2223_v60  ;;  %v2222_v2 = vmax.f32 %v2174_v54, 1e-06  ;;  %v3619_v54 = vld [vmem:[%s6478_s18 + $0x6b8] sm:$0xff] }
 0x17e   : > { %v5383_v11 = vpop.eup %5382  ;;  %v3808_v12 = vmul.f32 %v3736_v5, %v6496_v24  ;;  %v373_v13 = vmul.f32 0.6931472, %v5381_v8  ;;  %5394 = vlog2.f32 %v2703_v63  ;;  %v2654_v63 = vld [vmem:[%s6478_s18 + $0x568] sm:$0xff] }
 0x17f   : > { %v5385_v15 = vpop.eup %5384  ;;  %v2560_v16 = vadd.f32 %v5379_v4, %v2080_v9  ;;  %5396 = vlog2.f32 %v3183_v3 }
 0x180   : > { %v5387_v18 = vpop.eup %5386  ;;  %v3879_v19 = vmul.f32 1.442695, %v3808_v12  ;;  %v447_v20 = vmul.f32 %v6496_v24, %v373_v13  ;;  %v854_v21 = vmul.f32 0.6931472, %v5385_v15  ;;  %5398 = vlog2.f32 %v3663_v6  ;;  %v3614_v15 = vld [vmem:[%s6478_s18 + $0x578] sm:$0xff] }
 0x181   : > { %v5389_v25 = vpop.eup %5388  ;;  %v3040_v26 = vadd.f32 %v5383_v11, %v2560_v16  ;;  %5400 = vlog2.f32 %v301_v10  ;;  %v2702_v10 = vmax.f32 %v2654_v63, 1e-06 }
 0x182   : > { %v5391_v28 = vpop.eup %5390  ;;  %5402 = vpow2.f32 %v3879_v19  ;;  %v517_v29 = vmul.f32 1.442695, %v447_v20  ;;  %v927_v30 = vmul.f32 %v854_v21, %v6496_v24  ;;  %v1334_v22 = vmul.f32 0.6931472, %v5389_v25  ;;  %v258_v19 = vld [vmem:[%s6478_s18 + $0x680] sm:$0xff]  ;;  %v739_v25 = vld [vmem:[%s6478_s18 + $0x688] sm:$0xff] }
 0x183   : > { %v5393_v31 = vpop.eup %5392  ;;  %v1814_v32 = vmul.f32 0.6931472, %v5391_v28  ;;  %5404 = vlog2.f32 %v782_v17  ;;  %v3520_v39 = vadd.f32 %v5387_v18, %v3040_v26  ;;  %v3182_v18 = vmax.f32 %v3134_v7, 1e-06 }
 0x184   : > { %v5395_v34 = vpop.eup %5394  ;;  %5406 = vpow2.f32 %v517_v29  ;;  %v997_v35 = vmul.f32 1.442695, %v927_v30  ;;  %v1407_v36 = vmul.f32 %v1334_v22, %v6496_v24  ;;  %v2294_v37 = vmul.f32 0.6931472, %v5393_v31  ;;  %v1219_v29 = vld [vmem:[%s6478_s18 + $0x690] sm:$0xff] }
 0x185   : > { %v5397_v38 = vpop.eup %5396  ;;  %v1887_v40 = vmul.f32 %v1814_v32, %v6496_v24  ;;  %v2774_v41 = vmul.f32 0.6931472, %v5395_v34  ;;  %5408 = vlog2.f32 %v1262_v27  ;;  %v3662_v28 = vmax.f32 %v3614_v15, 1e-06  ;;  %v1699_v32 = vld [vmem:[%s6478_s18 + $0x698] sm:$0xff] }
 0x186   : > { %v5399_v42 = vpop.eup %5398  ;;  %5410 = vpow2.f32 %v997_v35  ;;  %v1477_v43 = vmul.f32 1.442695, %v1407_v36  ;;  %v2367_v44 = vmul.f32 %v2294_v37, %v6496_v24  ;;  %v3254_v45 = vmul.f32 0.6931472, %v5397_v38  ;;  %v2179_v36 = vld [vmem:[%s6478_s18 + $0x6a0] sm:$0xff] }
 0x187   : > { %v5401_v46 = vpop.eup %5400  ;;  %v1957_v47 = vmul.f32 1.442695, %v1887_v40  ;;  %v2847_v48 = vmul.f32 %v2774_v41, %v6496_v24  ;;  %v3734_v49 = vmul.f32 0.6931472, %v5399_v42  ;;  %5412 = vlog2.f32 %v1742_v33 }
 0x188   : > { %v5403_v50 = vpop.eup %5402  ;;  %5414 = vpow2.f32 %v1477_v43  ;;  %v2437_v51 = vmul.f32 1.442695, %v2367_v44  ;;  %v3327_v52 = vmul.f32 %v3254_v45, %v6496_v24  ;;  %v371_v53 = vmul.f32 0.6931472, %v5401_v46  ;;  %v3139_v46 = vld [vmem:[%s6478_s18 + $0x6b0] sm:$0xff] }
 0x189   : > { %v5405_v55 = vpop.eup %5404  ;;  %v4000_v56 = vadd.f32 %v5403_v50, %v3520_v39  ;;  %5416 = vpow2.f32 %v1957_v47  ;;  %v2917_v57 = vmul.f32 1.442695, %v2847_v48  ;;  %v3807_v58 = vmul.f32 %v3734_v49, %v6496_v24  ;;  %v2659_v39 = vld [vmem:[%s6478_s18 + $0x6a8] sm:$0xff] }
 0x18a   : > { %v5407_v59 = vpop.eup %5406  ;;  %5418 = vpow2.f32 %v2437_v51  ;;  %v3397_v60 = vmul.f32 1.442695, %v3327_v52  ;;  %v446_v61 = vmul.f32 %v6496_v24, %v371_v53  ;;  %v852_v62 = vmul.f32 0.6931472, %v5405_v55 }
 0x18b   : > { %v5409_v0 = vpop.eup %5408  ;;  %4170 = vadd.xlane.f32.xlu2 %v4000_v56  ;;  %5420 = vpow2.f32 %v2917_v57  ;;  %v3877_v1 = vmul.f32 1.442695, %v3807_v58  ;;  %v306_v31 = vmax.f32 %v258_v19, 1e-06  ;;  %v787_v35 = vmax.f32 %v739_v25, 1e-06 }
 0x18c   : > { %v5411_v3 = vpop.eup %5410  ;;  %5422 = vpow2.f32 %v3397_v60  ;;  %v515_v4 = vmul.f32 1.442695, %v446_v61  ;;  %v926_v5 = vmul.f32 %v852_v62, %v6496_v24  ;;  %v1332_v6 = vmul.f32 0.6931472, %v5409_v0  ;;  %v257_v62 = vld [vmem:[%s6478_s18 + $0x640] sm:$0xff] }
 0x18d   : > { %v5413_v8 = vpop.eup %5412  ;;  %v1119_v9 = vadd.f32 %v5411_v3, %v5407_v59  ;;  %5424 = vpow2.f32 %v3877_v1  ;;  %v1267_v38 = vmax.f32 %v1219_v29, 1e-06  ;;  %v1747_v42 = vmax.f32 %v1699_v32, 1e-06 }
 0x18e   : > { %v5415_v11 = vpop.eup %5414  ;;  %5426 = vpow2.f32 %v515_v4  ;;  %v995_v12 = vmul.f32 1.442695, %v926_v5  ;;  %v1406_v13 = vmul.f32 %v1332_v6, %v6496_v24  ;;  %v1812_v14 = vmul.f32 0.6931472, %v5413_v8 }
 0x18f   : > { %v5417_v16 = vpop.eup %5416  ;;  %v1599_v17 = vadd.f32 %v5415_v11, %v1119_v9  ;;  %5428 = vlog2.f32 %v2222_v2  ;;  %v2227_v45 = vmax.f32 %v2179_v36, 1e-06  ;;  %v2707_v50 = vmax.f32 %v2659_v39, 1e-06  ;;  %v1218_v39 = vld [vmem:[%s6478_s18 + $0x650] sm:$0xff] }
 0x190   : > { %v5419_v20 = vpop.eup %5418  ;;  %5430 = vpow2.f32 %v995_v12  ;;  %v1475_v21 = vmul.f32 1.442695, %v1406_v13  ;;  %v1886_v23 = vmul.f32 %v1812_v14, %v6496_v24  ;;  %v3187_v57 = vmax.f32 %v3139_v46, 1e-06 }
 0x191   : > { %v5421_v26 = vpop.eup %5420  ;;  %v2079_v27 = vadd.f32 %v5417_v16, %v1599_v17  ;;  %5432 = vlog2.f32 %v2702_v10  ;;  %v3667_v1 = vmax.f32 %v3619_v54, 1e-06  ;;  %v305_v8 = vmax.f32 %v257_v62, 1e-06 }
 0x192   : > { %v5423_v30 = vpop.eup %5422  ;;  %5434 = vpow2.f32 %v1475_v21  ;;  %v1955_v22 = vmul.f32 1.442695, %v1886_v23 }
 0x193   : > { %v5425_v33 = vpop.eup %5424  ;;  %v2559_v34 = vadd.f32 %v5419_v20, %v2079_v27  ;;  %5436 = vlog2.f32 %v3182_v18 }
 0x194   : > { %v5427_v37 = vpop.eup %5426  ;;  %5438 = vpow2.f32 %v1955_v22  ;;  %v738_v22 = vld [vmem:[%s6478_s18 + $0x648] sm:$0xff] }
 0x195   : > { %v5429_v40 = vpop.eup %5428  ;;  %v3039_v41 = vadd.f32 %v5421_v26, %v2559_v34  ;;  %5440 = vlog2.f32 %v3662_v28 }
 0x196   : > { %v5431_v43 = vpop.eup %5430  ;;  %v2292_v44 = vmul.f32 0.6931472, %v5429_v40  ;;  %5442 = vlog2.f32 %v306_v31 }
 0x197   : > { %v5433_v47 = vpop.eup %5432  ;;  %v3519_v48 = vadd.f32 %v5423_v30, %v3039_v41  ;;  %v1118_v49 = vadd.f32 %v5431_v43, %v5427_v37  ;;  %5444 = vlog2.f32 %v787_v35  ;;  %v786_v43 = vmax.f32 %v738_v22, 1e-06  ;;  %v2177_v22 = vld [vmem:[%s6478_s18 + $0x620] sm:$0xff] }
 0x198   : > { %v5435_v51 = vpop.eup %5434  ;;  %v2366_v52 = vmul.f32 %v2292_v44, %v6496_v24  ;;  %v2772_v53 = vmul.f32 0.6931472, %v5433_v47  ;;  %5446 = vlog2.f32 %v1267_v38 }
 0x199   : > { %v5437_v55 = vpop.eup %5436  ;;  %v3999_v56 = vadd.f32 %v5425_v33, %v3519_v48  ;;  %5448 = vlog2.f32 %v1747_v42  ;;  %v1598_v0 = vadd.f32 %v5435_v51, %v1118_v49  ;;  %v1698_v48 = vld [vmem:[%s6478_s18 + $0x658] sm:$0xff]  ;;  %v1266_v51 = vmax.f32 %v1218_v39, 1e-06 }
 0x19a   : > { %v5439_v58 = vpop.eup %5438  ;;  %v2435_v59 = vmul.f32 1.442695, %v2366_v52  ;;  %v2846_v60 = vmul.f32 %v2772_v53, %v6496_v24  ;;  %v3252_v61 = vmul.f32 0.6931472, %v5437_v55  ;;  %5450 = vlog2.f32 %v2227_v45 }
 0x19b   : > { %v5441_v63 = vpop.eup %5440  ;;  %4168 = vadd.xlane.f32.xlu1 %v3999_v56  ;;  %5452 = vlog2.f32 %v2707_v50  ;;  %v2078_v14 = vadd.f32 %v5439_v58, %v1598_v0  ;;  %v2178_v56 = vld [vmem:[%s6478_s18 + $0x660] sm:$0xff]  ;;  %v3138_v0 = vld [vmem:[%s6478_s18 + $0x670] sm:$0xff] }
 0x19c   : > { %v5443_v2 = vpop.eup %5442  ;;  %5454 = vpow2.f32 %v2435_v59  ;;  %v2915_v3 = vmul.f32 1.442695, %v2846_v60  ;;  %v3326_v4 = vmul.f32 %v3252_v61, %v6496_v24  ;;  %v3732_v5 = vmul.f32 0.6931472, %v5441_v63  ;;  %v2658_v60 = vld [vmem:[%s6478_s18 + $0x668] sm:$0xff] }
 0x19d   : > { %v5445_v6 = vpop.eup %5444  ;;  %v381_v7 = vmul.f32 0.6931472, %v5443_v2  ;;  %5456 = vlog2.f32 %v3187_v57  ;;  %v1746_v59 = vmax.f32 %v1698_v48, 1e-06 }
 0x19e   : > { %v5447_v9 = vpop.eup %5446  ;;  %5458 = vpow2.f32 %v2915_v3  ;;  %v3395_v10 = vmul.f32 1.442695, %v3326_v4  ;;  %v3806_v11 = vmul.f32 %v3732_v5, %v6496_v24  ;;  %v862_v12 = vmul.f32 0.6931472, %v5445_v6  ;;  %v3618_v4 = vld [vmem:[%s6478_s18 + $0x678] sm:$0xff] }
 0x19f   : > { %v5449_v13 = vpop.eup %5448  ;;  %v451_v15 = vmul.f32 %v6496_v24, %v381_v7  ;;  %v1342_v16 = vmul.f32 0.6931472, %v5447_v9  ;;  %5460 = vlog2.f32 %v3667_v1  ;;  %v2226_v3 = vmax.f32 %v2178_v56, 1e-06 }
 0x1a0   : > { %v5451_v17 = vpop.eup %5450  ;;  %5462 = vpow2.f32 %v3395_v10  ;;  %v3875_v18 = vmul.f32 1.442695, %v3806_v11  ;;  %v931_v19 = vmul.f32 %v862_v12, %v6496_v24  ;;  %v1822_v20 = vmul.f32 0.6931472, %v5449_v13  ;;  %v737_v12 = vld [vmem:[%s6478_s18 + $0x608] sm:$0xff] }
 0x1a1   : > { %v5453_v21 = vpop.eup %5452  ;;  %v525_v23 = vmul.f32 1.442695, %v451_v15  ;;  %v1411_v25 = vmul.f32 %v1342_v16, %v6496_v24  ;;  %v2302_v26 = vmul.f32 0.6931472, %v5451_v17  ;;  %5464 = vlog2.f32 %v305_v8  ;;  %v256_v8 = vld [vmem:[%s6478_s18 + $0x600] sm:$0xff]  ;;  %v1217_v15 = vld [vmem:[%s6478_s18 + $0x610] sm:$0xff] }
 0x1a2   : > { %v5455_v27 = vpop.eup %5454  ;;  %5466 = vpow2.f32 %v3875_v18  ;;  %v1005_v28 = vmul.f32 1.442695, %v931_v19  ;;  %v1891_v29 = vmul.f32 %v1822_v20, %v6496_v24  ;;  %v2782_v30 = vmul.f32 0.6931472, %v5453_v21 }
 0x1a3   : > { %v5457_v31 = vpop.eup %5456  ;;  %v2558_v32 = vadd.f32 %v5455_v27, %v2078_v14  ;;  %5468 = vpow2.f32 %v525_v23  ;;  %v1485_v33 = vmul.f32 1.442695, %v1411_v25  ;;  %v2371_v34 = vmul.f32 %v2302_v26, %v6496_v24  ;;  %v1697_v23 = vld [vmem:[%s6478_s18 + $0x618] sm:$0xff] }
 0x1a4   : > { %v5459_v35 = vpop.eup %5458  ;;  %5470 = vpow2.f32 %v1005_v28  ;;  %v1965_v36 = vmul.f32 1.442695, %v1891_v29  ;;  %v2851_v37 = vmul.f32 %v2782_v30, %v6496_v24  ;;  %v3262_v38 = vmul.f32 0.6931472, %v5457_v31 }
 0x1a5   : > { %v5461_v40 = vpop.eup %5460  ;;  %v3038_v41 = vadd.f32 %v5459_v35, %v2558_v32  ;;  %5472 = vpow2.f32 %v1485_v33  ;;  %v2445_v42 = vmul.f32 1.442695, %v2371_v34  ;;  %v2706_v7 = vmax.f32 %v2658_v60, 1e-06 }
 0x1a6   : > { %v5463_v44 = vpop.eup %5462  ;;  %5474 = vpow2.f32 %v1965_v36  ;;  %v2925_v45 = vmul.f32 1.442695, %v2851_v37  ;;  %v3331_v46 = vmul.f32 %v3262_v38, %v6496_v24  ;;  %v3742_v47 = vmul.f32 0.6931472, %v5461_v40  ;;  %v2657_v38 = vld [vmem:[%s6478_s18 + $0x628] sm:$0xff] }
 0x1a7   : > { %v5465_v49 = vpop.eup %5464  ;;  %v3518_v50 = vadd.f32 %v5463_v44, %v3038_v41  ;;  %5476 = vpow2.f32 %v2445_v42  ;;  %v3186_v11 = vmax.f32 %v3138_v0, 1e-06  ;;  %v3666_v14 = vmax.f32 %v3618_v4, 1e-06 }
 0x1a8   : > { %v5467_v52 = vpop.eup %5466  ;;  %5478 = vpow2.f32 %v2925_v45  ;;  %v3405_v53 = vmul.f32 1.442695, %v3331_v46  ;;  %v3811_v54 = vmul.f32 %v3742_v47, %v6496_v24  ;;  %v379_v55 = vmul.f32 0.6931472, %v5465_v49 }
 0x1a9   : > { %v5469_v57 = vpop.eup %5468  ;;  %v3998_v58 = vadd.f32 %v5467_v52, %v3518_v50  ;;  %5480 = vlog2.f32 %v786_v43  ;;  %v304_v18 = vmax.f32 %v256_v8, 1e-06  ;;  %v785_v21 = vmax.f32 %v737_v12, 1e-06 }
 0x1aa   : > { %v5471_v61 = vpop.eup %5470  ;;  %5482 = vpow2.f32 %v3405_v53  ;;  %v3885_v62 = vmul.f32 1.442695, %v3811_v54  ;;  %v450_v63 = vmul.f32 %v6496_v24, %v379_v55  ;;  %v1265_v27 = vmax.f32 %v1217_v15, 1e-06 }
 0x1ab   : > { %v5473_v1 = vpop.eup %5472  ;;  %4166 = vadd.xlane.f32.xlu0 %v3998_v58  ;;  %v1123_v2 = vadd.f32 %v5471_v61, %v5469_v57  ;;  %5484 = vlog2.f32 %v1266_v51  ;;  %v1745_v33 = vmax.f32 %v1697_v23, 1e-06  ;;  %v2225_v41 = vmax.f32 %v2177_v22, 1e-06 }
 0x1ac   : > { %v5475_v5 = vpop.eup %5474  ;;  %5486 = vpow2.f32 %v3885_v62  ;;  %v523_v6 = vmul.f32 1.442695, %v450_v63  ;;  %v2705_v49 = vmax.f32 %v2657_v38, 1e-06 }
 0x1ad   : > { %v5477_v9 = vpop.eup %5476  ;;  %v1603_v10 = vadd.f32 %v5473_v1, %v1123_v2  ;;  %5488 = vlog2.f32 %v1746_v59 }
 0x1ae   : > { %v5479_v13 = vpop.eup %5478  ;;  %5490 = vpow2.f32 %v523_v6 }
 0x1af   : > { %v5481_v16 = vpop.eup %5480  ;;  %v2083_v17 = vadd.f32 %v5475_v5, %v1603_v10  ;;  %5492 = vlog2.f32 %v2226_v3  ;;  %v3137_v5 = vld [vmem:[%s6478_s18 + $0x630] sm:$0xff] }
 0x1b0   : > { %v5483_v19 = vpop.eup %5482  ;;  %v860_v20 = vmul.f32 0.6931472, %v5481_v16  ;;  %5494 = vlog2.f32 %v2706_v7 }
 0x1b1   : > { %v5485_v25 = vpop.eup %5484  ;;  %v2563_v26 = vadd.f32 %v5477_v9, %v2083_v17  ;;  %5496 = vlog2.f32 %v3186_v11 }
 0x1b2   : > { %v5487_v28 = vpop.eup %5486  ;;  %v930_v29 = vmul.f32 %v860_v20, %v6496_v24  ;;  %v1340_v30 = vmul.f32 0.6931472, %v5485_v25  ;;  %5498 = vlog2.f32 %v3666_v14  ;;  %v3617_v14 = vld [vmem:[%s6478_s18 + $0x638] sm:$0xff]  ;;  %v261_v25 = vld [vmem:[%s6478_s18 + $0x740] sm:$0xff] }
 0x1b3   : > { %v5489_v31 = vpop.eup %5488  ;;  %v3043_v32 = vadd.f32 %v5479_v13, %v2563_v26  ;;  %5500 = vlog2.f32 %v304_v18  ;;  %v3185_v18 = vmax.f32 %v3137_v5, 1e-06  ;;  %v260_v5 = vld [vmem:[%s6478_s18 + $0x700] sm:$0xff] }
 0x1b4   : > { %v5491_v34 = vpop.eup %5490  ;;  %v1003_v35 = vmul.f32 1.442695, %v930_v29  ;;  %v1410_v36 = vmul.f32 %v1340_v30, %v6496_v24  ;;  %v1820_v37 = vmul.f32 0.6931472, %v5489_v31  ;;  %5502 = vlog2.f32 %v785_v21 }
 0x1b5   : > { %v5493_v39 = vpop.eup %5492  ;;  %v3523_v40 = vadd.f32 %v5483_v19, %v3043_v32  ;;  %5504 = vlog2.f32 %v1265_v27  ;;  %v742_v32 = vld [vmem:[%s6478_s18 + $0x748] sm:$0xff] }
 0x1b6   : > { %v5495_v42 = vpop.eup %5494  ;;  %5506 = vpow2.f32 %v1003_v35  ;;  %v1483_v43 = vmul.f32 1.442695, %v1410_v36  ;;  %v1890_v44 = vmul.f32 %v1820_v37, %v6496_v24  ;;  %v2300_v45 = vmul.f32 0.6931472, %v5493_v39  ;;  %v1222_v36 = vld [vmem:[%s6478_s18 + $0x750] sm:$0xff] }
 0x1b7   : > { %v5497_v46 = vpop.eup %5496  ;;  %v4003_v47 = vadd.f32 %v5487_v28, %v3523_v40  ;;  %v2780_v48 = vmul.f32 0.6931472, %v5495_v42  ;;  %5508 = vlog2.f32 %v1745_v33  ;;  %v3665_v28 = vmax.f32 %v3617_v14, 1e-06  ;;  %v1702_v40 = vld [vmem:[%s6478_s18 + $0x758] sm:$0xff]  ;;  %v1221_v14 = vld [vmem:[%s6478_s18 + $0x710] sm:$0xff] }
 0x1b8   : > { %v5499_v50 = vpop.eup %5498  ;;  %5510 = vpow2.f32 %v1483_v43  ;;  %v1963_v51 = vmul.f32 1.442695, %v1890_v44  ;;  %v2370_v52 = vmul.f32 %v2300_v45, %v6496_v24  ;;  %v3260_v53 = vmul.f32 0.6931472, %v5497_v46  ;;  %v2182_v44 = vld [vmem:[%s6478_s18 + $0x760] sm:$0xff] }
 0x1b9   : > { %v5501_v54 = vpop.eup %5500  ;;  %4176 = vadd.xlane.f32.xlu2 %v4003_v47  ;;  %v2850_v55 = vmul.f32 %v2780_v48, %v6496_v24  ;;  %v3740_v56 = vmul.f32 0.6931472, %v5499_v50  ;;  %5512 = vlog2.f32 %v2225_v41  ;;  %v309_v35 = vmax.f32 %v261_v25, 1e-06  ;;  %v2662_v48 = vld [vmem:[%s6478_s18 + $0x768] sm:$0xff] }
 0x1ba   : > { %v5503_v57 = vpop.eup %5502  ;;  %5514 = vpow2.f32 %v1963_v51  ;;  %v2443_v58 = vmul.f32 1.442695, %v2370_v52  ;;  %v3330_v59 = vmul.f32 %v3260_v53, %v6496_v24  ;;  %v377_v60 = vmul.f32 0.6931472, %v5501_v54 }
 0x1bb   : > { %v5505_v61 = vpop.eup %5504  ;;  %v2923_v62 = vmul.f32 1.442695, %v2850_v55  ;;  %v3810_v63 = vmul.f32 %v3740_v56, %v6496_v24  ;;  %v858_v0 = vmul.f32 0.6931472, %v5503_v57  ;;  %5516 = vlog2.f32 %v2705_v49  ;;  %v3142_v55 = vld [vmem:[%s6478_s18 + $0x770] sm:$0xff] }
 0x1bc   : > { %v5507_v1 = vpop.eup %5506  ;;  %5518 = vpow2.f32 %v2443_v58  ;;  %v3403_v2 = vmul.f32 1.442695, %v3330_v59  ;;  %v449_v3 = vmul.f32 %v6496_v24, %v377_v60  ;;  %v1338_v4 = vmul.f32 0.6931472, %v5505_v61 }
 0x1bd   : > { %v5509_v6 = vpop.eup %5508  ;;  %v1122_v7 = vadd.f32 %v5507_v1, %v5491_v34  ;;  %5520 = vpow2.f32 %v2923_v62  ;;  %v3883_v8 = vmul.f32 1.442695, %v3810_v63  ;;  %v929_v9 = vmul.f32 %v858_v0, %v6496_v24  ;;  %v3622_v62 = vld [vmem:[%s6478_s18 + $0x778] sm:$0xff] }
 0x1be   : > { %v5511_v10 = vpop.eup %5510  ;;  %5522 = vpow2.f32 %v3403_v2  ;;  %v521_v11 = vmul.f32 1.442695, %v449_v3  ;;  %v1409_v12 = vmul.f32 %v1338_v4, %v6496_v24  ;;  %v1818_v13 = vmul.f32 0.6931472, %v5509_v6 }
 0x1bf   : > { %v5513_v15 = vpop.eup %5512  ;;  %v1602_v16 = vadd.f32 %v5511_v10, %v1122_v7  ;;  %5524 = vpow2.f32 %v3883_v8  ;;  %v1001_v17 = vmul.f32 1.442695, %v929_v9  ;;  %v790_v43 = vmax.f32 %v742_v32, 1e-06  ;;  %v741_v8 = vld [vmem:[%s6478_s18 + $0x708] sm:$0xff] }
 0x1c0   : > { %v5515_v19 = vpop.eup %5514  ;;  %5526 = vpow2.f32 %v521_v11  ;;  %v1481_v20 = vmul.f32 1.442695, %v1409_v12  ;;  %v1889_v21 = vmul.f32 %v1818_v13, %v6496_v24  ;;  %v2298_v23 = vmul.f32 0.6931472, %v5513_v15 }
 0x1c1   : > { %v5517_v26 = vpop.eup %5516  ;;  %v2082_v27 = vadd.f32 %v5515_v19, %v1602_v16  ;;  %5528 = vpow2.f32 %v1001_v17  ;;  %v1270_v47 = vmax.f32 %v1222_v36, 1e-06  ;;  %v1750_v51 = vmax.f32 %v1702_v40, 1e-06 }
 0x1c2   : > { %v5519_v29 = vpop.eup %5518  ;;  %5530 = vpow2.f32 %v1481_v20  ;;  %v1961_v30 = vmul.f32 1.442695, %v1889_v21  ;;  %v2369_v22 = vmul.f32 %v2298_v23, %v6496_v24  ;;  %v2778_v31 = vmul.f32 0.6931472, %v5517_v26 }
 0x1c3   : > { %v5521_v33 = vpop.eup %5520  ;;  %v2562_v34 = vadd.f32 %v5519_v29, %v2082_v27  ;;  %5532 = vlog2.f32 %v3185_v18  ;;  %v2230_v54 = vmax.f32 %v2182_v44, 1e-06  ;;  %v2710_v58 = vmax.f32 %v2662_v48, 1e-06  ;;  %v1701_v44 = vld [vmem:[%s6478_s18 + $0x718] sm:$0xff] }
 0x1c4   : > { %v5523_v37 = vpop.eup %5522  ;;  %5534 = vpow2.f32 %v1961_v30  ;;  %v2441_v38 = vmul.f32 1.442695, %v2369_v22  ;;  %v2849_v39 = vmul.f32 %v2778_v31, %v6496_v24  ;;  %v3190_v0 = vmax.f32 %v3142_v55, 1e-06 }
 0x1c5   : > { %v5525_v41 = vpop.eup %5524  ;;  %v3042_v42 = vadd.f32 %v5521_v33, %v2562_v34  ;;  %5536 = vlog2.f32 %v3665_v28  ;;  %v3670_v7 = vmax.f32 %v3622_v62, 1e-06  ;;  %v308_v16 = vmax.f32 %v260_v5, 1e-06 }
 0x1c6   : > { %v5527_v45 = vpop.eup %5526  ;;  %5538 = vpow2.f32 %v2441_v38  ;;  %v2921_v46 = vmul.f32 1.442695, %v2849_v39  ;;  %v789_v20 = vmax.f32 %v741_v8, 1e-06  ;;  %v1269_v26 = vmax.f32 %v1221_v14, 1e-06 }
 0x1c7   : > { %v5529_v49 = vpop.eup %5528  ;;  %v3522_v50 = vadd.f32 %v5523_v37, %v3042_v42  ;;  %5540 = vlog2.f32 %v309_v35  ;;  %v1749_v55 = vmax.f32 %v1701_v44, 1e-06  ;;  %v259_v14 = vld [vmem:[%s6478_s18 + $0x6c0] sm:$0xff] }
 0x1c8   : > { %v5531_v52 = vpop.eup %5530  ;;  %v1121_v53 = vadd.f32 %v5529_v49, %v5527_v45  ;;  %5542 = vpow2.f32 %v2921_v46 }
 0x1c9   : > { %v5533_v56 = vpop.eup %5532  ;;  %v4002_v57 = vadd.f32 %v5525_v41, %v3522_v50  ;;  %5544 = vlog2.f32 %v790_v43 }
 0x1ca   : > { %v5535_v59 = vpop.eup %5534  ;;  %v1601_v60 = vadd.f32 %v5531_v52, %v1121_v53  ;;  %v3258_v61 = vmul.f32 0.6931472, %v5533_v56  ;;  %5546 = vlog2.f32 %v1270_v47  ;;  %v2181_v52 = vld [vmem:[%s6478_s18 + $0x720] sm:$0xff] }
 0x1cb   : > { %v5537_v63 = vpop.eup %5536  ;;  %4174 = vadd.xlane.f32.xlu1 %v4002_v57  ;;  %5548 = vlog2.f32 %v1750_v51  ;;  %v2229_v62 = vmax.f32 %v2181_v52, 1e-06  ;;  %v3140_v52 = vld [vmem:[%s6478_s18 + $0x6f0] sm:$0xff] }
 0x1cc   : > { %v5539_v1 = vpop.eup %5538  ;;  %v2081_v2 = vadd.f32 %v5535_v59, %v1601_v60  ;;  %v3329_v3 = vmul.f32 %v3258_v61, %v6496_v24  ;;  %v3738_v4 = vmul.f32 0.6931472, %v5537_v63  ;;  %5550 = vlog2.f32 %v2230_v54  ;;  %v2661_v60 = vld [vmem:[%s6478_s18 + $0x728] sm:$0xff] }
 0x1cd   : > { %v5541_v6 = vpop.eup %5540  ;;  %5552 = vlog2.f32 %v2710_v58  ;;  %v2709_v5 = vmax.f32 %v2661_v60, 1e-06 }
 0x1ce   : > { %v5543_v9 = vpop.eup %5542  ;;  %v2561_v10 = vadd.f32 %v5539_v1, %v2081_v2  ;;  %v3401_v11 = vmul.f32 1.442695, %v3329_v3  ;;  %v3809_v12 = vmul.f32 %v3738_v4, %v6496_v24  ;;  %v387_v13 = vmul.f32 0.6931472, %v5541_v6  ;;  %v3141_v6 = vld [vmem:[%s6478_s18 + $0x730] sm:$0xff] }
 0x1cf   : > { %v5545_v15 = vpop.eup %5544  ;;  %5554 = vlog2.f32 %v3190_v0 }
 0x1d0   : > { %v5547_v17 = vpop.eup %5546  ;;  %5556 = vpow2.f32 %v3401_v11  ;;  %v3881_v18 = vmul.f32 1.442695, %v3809_v12  ;;  %v454_v19 = vmul.f32 %v6496_v24, %v387_v13  ;;  %v868_v23 = vmul.f32 0.6931472, %v5545_v15  ;;  %v3621_v11 = vld [vmem:[%s6478_s18 + $0x738] sm:$0xff] }
 0x1d1   : > { %v5549_v21 = vpop.eup %5548  ;;  %v1348_v25 = vmul.f32 0.6931472, %v5547_v17  ;;  %5558 = vlog2.f32 %v3670_v7  ;;  %v3041_v28 = vadd.f32 %v5543_v9, %v2561_v10 }
 0x1d2   : > { %v5551_v27 = vpop.eup %5550  ;;  %5560 = vpow2.f32 %v3881_v18  ;;  %v531_v29 = vmul.f32 1.442695, %v454_v19  ;;  %v1828_v30 = vmul.f32 0.6931472, %v5549_v21  ;;  %v934_v31 = vmul.f32 %v868_v23, %v6496_v24  ;;  %v740_v19 = vld [vmem:[%s6478_s18 + $0x6c8] sm:$0xff] }
 0x1d3   : > { %v5553_v22 = vpop.eup %5552  ;;  %v1414_v32 = vmul.f32 %v1348_v25, %v6496_v24  ;;  %v2308_v33 = vmul.f32 0.6931472, %v5551_v27  ;;  %5562 = vlog2.f32 %v308_v16  ;;  %v3189_v18 = vmax.f32 %v3141_v6, 1e-06  ;;  %v3620_v6 = vld [vmem:[%s6478_s18 + $0x6f8] sm:$0xff] }
 0x1d4   : > { %5564 = vpow2.f32 %v531_v29  ;;  %v1894_v34 = vmul.f32 %v1828_v30, %v6496_v24  ;;  %v2788_v35 = vmul.f32 0.6931472, %v5553_v22  ;;  %v1011_v37 = vmul.f32 1.442695, %v934_v31 }
 0x1d5   : > { %v5555_v36 = vpop.eup %5554  ;;  %v1491_v38 = vmul.f32 1.442695, %v1414_v32  ;;  %v2374_v39 = vmul.f32 %v2308_v33, %v6496_v24  ;;  %5566 = vlog2.f32 %v789_v20  ;;  %v3669_v23 = vmax.f32 %v3621_v11, 1e-06  ;;  %v1700_v33 = vld [vmem:[%s6478_s18 + $0x6d8] sm:$0xff] }
 0x1d6   : > { %v5557_v40 = vpop.eup %5556  ;;  %v1971_v41 = vmul.f32 1.442695, %v1894_v34  ;;  %v2854_v42 = vmul.f32 %v2788_v35, %v6496_v24  ;;  %v3268_v43 = vmul.f32 0.6931472, %v5555_v36  ;;  %5568 = vlog2.f32 %v1269_v26 }
 0x1d7   : > { %v5559_v45 = vpop.eup %5558  ;;  %v3521_v46 = vadd.f32 %v5557_v40, %v3041_v28  ;;  %5570 = vpow2.f32 %v1011_v37  ;;  %v2451_v47 = vmul.f32 1.442695, %v2374_v39  ;;  %v307_v27 = vmax.f32 %v259_v14, 1e-06  ;;  %v1220_v28 = vld [vmem:[%s6478_s18 + $0x6d0] sm:$0xff]  ;;  %v2180_v40 = vld [vmem:[%s6478_s18 + $0x6e0] sm:$0xff] }
 0x1d8   : > { %v5561_v48 = vpop.eup %5560  ;;  %5572 = vpow2.f32 %v1491_v38  ;;  %v2931_v49 = vmul.f32 1.442695, %v2854_v42  ;;  %v3334_v50 = vmul.f32 %v3268_v43, %v6496_v24  ;;  %v3748_v51 = vmul.f32 0.6931472, %v5559_v45 }
 0x1d9   : > { %v5563_v53 = vpop.eup %5562  ;;  %v4001_v54 = vadd.f32 %v5561_v48, %v3521_v46  ;;  %5574 = vpow2.f32 %v1971_v41  ;;  %v788_v30 = vmax.f32 %v740_v19, 1e-06  ;;  %v1268_v35 = vmax.f32 %v1220_v28, 1e-06  ;;  %v2660_v48 = vld [vmem:[%s6478_s18 + $0x6e8] sm:$0xff] }
 0x1da   : > { %v5565_v56 = vpop.eup %5564  ;;  %5576 = vpow2.f32 %v2451_v47  ;;  %v3411_v57 = vmul.f32 1.442695, %v3334_v50  ;;  %v3814_v58 = vmul.f32 %v3748_v51, %v6496_v24  ;;  %v385_v59 = vmul.f32 0.6931472, %v5563_v53 }
 0x1db   : > { %v5567_v61 = vpop.eup %5566  ;;  %4172 = vadd.xlane.f32.xlu0 %v4001_v54  ;;  %5578 = vpow2.f32 %v2931_v49  ;;  %v1748_v42 = vmax.f32 %v1700_v33, 1e-06  ;;  %v2228_v51 = vmax.f32 %v2180_v40, 1e-06 }
 0x1dc   : > { %v5569_v63 = vpop.eup %5568  ;;  %5580 = vpow2.f32 %v3411_v57  ;;  %v3891_v0 = vmul.f32 1.442695, %v3814_v58  ;;  %v453_v1 = vmul.f32 %v6496_v24, %v385_v59  ;;  %v866_v2 = vmul.f32 0.6931472, %v5567_v61 }
 0x1dd   : > { %v5571_v3 = vpop.eup %5570  ;;  %v1346_v4 = vmul.f32 0.6931472, %v5569_v63  ;;  %5582 = vlog2.f32 %v1749_v55  ;;  %v2708_v59 = vmax.f32 %v2660_v48, 1e-06  ;;  %v3188_v63 = vmax.f32 %v3140_v52, 1e-06 }
 0x1de   : > { %v5573_v7 = vpop.eup %5572  ;;  %v1126_v8 = vadd.f32 %v5571_v3, %v5565_v56  ;;  %5584 = vpow2.f32 %v3891_v0  ;;  %v529_v9 = vmul.f32 1.442695, %v453_v1  ;;  %v933_v10 = vmul.f32 %v866_v2, %v6496_v24  ;;  %v2185_v48 = vld [vmem:[%s6478_s18 + $0x820] sm:$0xff]  ;;  %v2665_v52 = vld [vmem:[%s6478_s18 + $0x828] sm:$0xff] }
 0x1df   : > { %v5575_v12 = vpop.eup %5574  ;;  %v1413_v13 = vmul.f32 %v1346_v4, %v6496_v24  ;;  %5586 = vlog2.f32 %v2229_v62 }
 0x1e0   : > { %v5577_v15 = vpop.eup %5576  ;;  %v1606_v16 = vadd.f32 %v5573_v7, %v1126_v8  ;;  %5588 = vpow2.f32 %v529_v9  ;;  %v1009_v17 = vmul.f32 1.442695, %v933_v10 }
 0x1e1   : > { %v5579_v20 = vpop.eup %5578  ;;  %v1489_v21 = vmul.f32 1.442695, %v1413_v13  ;;  %5590 = vlog2.f32 %v2709_v5 }
 0x1e2   : > { %v5581_v25 = vpop.eup %5580  ;;  %v2086_v26 = vadd.f32 %v5575_v12, %v1606_v16  ;;  %5592 = vpow2.f32 %v1009_v17  ;;  %v3668_v17 = vmax.f32 %v3620_v6, 1e-06 }
 0x1e3   : > { %v5583_v29 = vpop.eup %5582  ;;  %5594 = vpow2.f32 %v1489_v21 }
 0x1e4   : > { %v5585_v22 = vpop.eup %5584  ;;  %v2566_v31 = vadd.f32 %v5577_v15, %v2086_v26  ;;  %v1826_v32 = vmul.f32 0.6931472, %v5583_v29  ;;  %5596 = vlog2.f32 %v3189_v18 }
 0x1e5   : > { %v5587_v34 = vpop.eup %5586  ;;  %5598 = vlog2.f32 %v3669_v23  ;;  %v264_v23 = vld [vmem:[%s6478_s18 + $0x800] sm:$0xff] }
 0x1e6   : > { %v5589_v36 = vpop.eup %5588  ;;  %v3046_v37 = vadd.f32 %v5579_v20, %v2566_v31  ;;  %v1893_v38 = vmul.f32 %v1826_v32, %v6496_v24  ;;  %v2306_v39 = vmul.f32 0.6931472, %v5587_v34  ;;  %5600 = vlog2.f32 %v307_v27 }
 0x1e7   : > { %v5591_v41 = vpop.eup %5590  ;;  %5602 = vlog2.f32 %v788_v30  ;;  %v312_v33 = vmax.f32 %v264_v23, 1e-06 }
 0x1e8   : > { %v5593_v43 = vpop.eup %5592  ;;  %v3526_v44 = vadd.f32 %v5581_v25, %v3046_v37  ;;  %v1969_v45 = vmul.f32 1.442695, %v1893_v38  ;;  %v2373_v46 = vmul.f32 %v2306_v39, %v6496_v24  ;;  %v2786_v47 = vmul.f32 0.6931472, %v5591_v41  ;;  %v1225_v38 = vld [vmem:[%s6478_s18 + $0x810] sm:$0xff]  ;;  %v6969_v39 = vld [vmem:[%s6478_s18 + $0x7c0] sm:$0xff] }
 0x1e9   : > { %v5595_v49 = vpop.eup %5594  ;;  %v1125_v50 = vadd.f32 %v5593_v43, %v5589_v36  ;;  %5604 = vlog2.f32 %v1268_v35  ;;  %v1705_v43 = vld [vmem:[%s6478_s18 + $0x818] sm:$0xff] }
 0x1ea   : > { %v5597_v53 = vpop.eup %5596  ;;  %v4006_v54 = vadd.f32 %v5585_v22, %v3526_v44  ;;  %5606 = vpow2.f32 %v1969_v45  ;;  %v2449_v55 = vmul.f32 1.442695, %v2373_v46  ;;  %v2853_v56 = vmul.f32 %v2786_v47, %v6496_v24  ;;  %v745_v22 = vld [vmem:[%s6478_s18 + $0x808] sm:$0xff] }
 0x1eb   : > { %v5599_v57 = vpop.eup %5598  ;;  %v3266_v58 = vmul.f32 0.6931472, %v5597_v53  ;;  %5608 = vlog2.f32 %v1748_v42  ;;  %v1605_v1 = vadd.f32 %v5595_v49, %v1125_v50  ;;  %v793_v42 = vmax.f32 %v745_v22, 1e-06  ;;  %v3145_v53 = vld [vmem:[%s6478_s18 + $0x830] sm:$0xff] }
 0x1ec   : > { %v5601_v60 = vpop.eup %5600  ;;  %4182 = vadd.xlane.f32.xlu2 %v4006_v54  ;;  %5610 = vpow2.f32 %v2449_v55  ;;  %v2929_v61 = vmul.f32 1.442695, %v2853_v56  ;;  %v3746_v62 = vmul.f32 0.6931472, %v5599_v57  ;;  %v311_v54 = vmax.f32 %v6969_v39, 1e-06 }
 0x1ed   : > { %v5603_v0 = vpop.eup %5602  ;;  %v3333_v2 = vmul.f32 %v3266_v58, %v6496_v24  ;;  %v383_v3 = vmul.f32 0.6931472, %v5601_v60  ;;  %5612 = vlog2.f32 %v2228_v51  ;;  %v1273_v51 = vmax.f32 %v1225_v38, 1e-06 }
 0x1ee   : > { %5614 = vpow2.f32 %v2929_v61  ;;  %v3813_v4 = vmul.f32 %v3746_v62, %v6496_v24  ;;  %v864_v5 = vmul.f32 0.6931472, %v5603_v0  ;;  %v1753_v58 = vmax.f32 %v1705_v43, 1e-06 }
 0x1ef   : > { %v5605_v7 = vpop.eup %5604  ;;  %v3409_v8 = vmul.f32 1.442695, %v3333_v2  ;;  %v452_v9 = vmul.f32 %v6496_v24, %v383_v3  ;;  %5616 = vlog2.f32 %v2708_v59  ;;  %v3625_v59 = vld [vmem:[%s6478_s18 + $0x838] sm:$0xff]  ;;  %v2713_v2 = vmax.f32 %v2665_v52, 1e-06 }
 0x1f0   : > { %v5607_v10 = vpop.eup %5606  ;;  %v3889_v11 = vmul.f32 1.442695, %v3813_v4  ;;  %v932_v12 = vmul.f32 %v864_v5, %v6496_v24  ;;  %v1344_v13 = vmul.f32 0.6931472, %v5605_v7  ;;  %5618 = vlog2.f32 %v3188_v63 }
 0x1f1   : > { %v5609_v14 = vpop.eup %5608  ;;  %v2085_v15 = vadd.f32 %v5607_v10, %v1605_v1  ;;  %5620 = vpow2.f32 %v3409_v8  ;;  %v527_v16 = vmul.f32 1.442695, %v452_v9  ;;  %v2233_v63 = vmax.f32 %v2185_v48, 1e-06 }
 0x1f2   : > { %v5611_v18 = vpop.eup %5610  ;;  %5622 = vpow2.f32 %v3889_v11  ;;  %v1007_v19 = vmul.f32 1.442695, %v932_v12  ;;  %v1412_v20 = vmul.f32 %v1344_v13, %v6496_v24  ;;  %v1824_v21 = vmul.f32 0.6931472, %v5609_v14  ;;  %v744_v11 = vld [vmem:[%s6478_s18 + $0x7c8] sm:$0xff]  ;;  %v1224_v12 = vld [vmem:[%s6478_s18 + $0x7d0] sm:$0xff] }
 0x1f3   : > { %v5613_v25 = vpop.eup %5612  ;;  %v2565_v26 = vadd.f32 %v5611_v18, %v2085_v15  ;;  %5624 = vpow2.f32 %v527_v16  ;;  %v3193_v3 = vmax.f32 %v3145_v53, 1e-06  ;;  %v3673_v6 = vmax.f32 %v3625_v59, 1e-06 }
 0x1f4   : > { %v5615_v27 = vpop.eup %5614  ;;  %5626 = vpow2.f32 %v1007_v19  ;;  %v1487_v28 = vmul.f32 1.442695, %v1412_v20  ;;  %v1892_v29 = vmul.f32 %v1824_v21, %v6496_v24  ;;  %v2304_v30 = vmul.f32 0.6931472, %v5613_v25 }
 0x1f5   : > { %v5617_v31 = vpop.eup %5616  ;;  %v3045_v32 = vadd.f32 %v5615_v27, %v2565_v26  ;;  %5628 = vlog2.f32 %v3668_v17  ;;  %v4374_v10 = vand.u32 2147483647, %v6496_v24  ;;  %v4376_v15 = vand.u32 2147483648, %v6496_v24 }
 0x1f6   : > { %v5619_v34 = vpop.eup %5618  ;;  %5630 = vpow2.f32 %v1487_v28  ;;  %v1967_v35 = vmul.f32 1.442695, %v1892_v29  ;;  %v2372_v36 = vmul.f32 %v2304_v30, %v6496_v24  ;;  %v2784_v37 = vmul.f32 0.6931472, %v5617_v31  ;;  %v1704_v30 = vld [vmem:[%s6478_s18 + $0x7d8] sm:$0xff] }
 0x1f7   : > { %v5621_v40 = vpop.eup %5620  ;;  %v3264_v41 = vmul.f32 0.6931472, %v5619_v34  ;;  %5632 = vrcp.f32 %v6496_v24  ;;  %v792_v23 = vmax.f32 %v744_v11, 1e-06  ;;  %v1272_v25 = vmax.f32 %v1224_v12, 1e-06 }
 0x1f8   : > { %v5623_v44 = vpop.eup %5622  ;;  %v3525_v45 = vadd.f32 %v5621_v40, %v3045_v32  ;;  %5634 = vpow2.f32 %v1967_v35  ;;  %v2447_v46 = vmul.f32 1.442695, %v2372_v36  ;;  %v2852_v47 = vmul.f32 %v2784_v37, %v6496_v24  ;;  %v262_v32 = vld [vmem:[%s6478_s18 + $0x780] sm:$0xff] }
 0x1f9   : > { %v5625_v49 = vpop.eup %5624  ;;  %v3332_v50 = vmul.f32 %v3264_v41, %v6496_v24  ;;  %5636 = vlog2.f32 %v312_v33  ;;  %vm6996_vm3 = vcmp.eq.f32.partialorder %v4374_v10, 8.507059e+37  ;;  %v4377_v34 = vor.u32 1.1754944e-38, %v4376_v15 }
 0x1fa   : > { %v5627_v55 = vpop.eup %5626  ;;  %v4005_v56 = vadd.f32 %v5623_v44, %v3525_v45  ;;  %5638 = vpow2.f32 %v2447_v46  ;;  %v2927_v57 = vmul.f32 1.442695, %v2852_v47  ;;  %v1752_v43 = vmax.f32 %v1704_v30, 1e-06 }
 0x1fb   : > { %v5629_v60 = vpop.eup %5628  ;;  %v1124_v61 = vadd.f32 %v5627_v55, %v5625_v49  ;;  %v3407_v62 = vmul.f32 1.442695, %v3332_v50  ;;  %5640 = vlog2.f32 %v793_v42 }
 0x1fc   : > { %v5631_v0 = vpop.eup %5630  ;;  %4180 = vadd.xlane.f32.xlu1 %v4005_v56  ;;  %5642 = vpow2.f32 %v2927_v57  ;;  %v3744_v1 = vmul.f32 0.6931472, %v5629_v60 }
 0x1fd   : > { %v5633_v4 = vpop.eup %5632  ;;  %v1604_v5 = vadd.f32 %v5631_v0, %v1124_v61  ;;  %5644 = vpow2.f32 %v3407_v62 }
 0x1fe   : > { %v5635_v7 = vpop.eup %5634  ;;  %v3812_v8 = vmul.f32 %v3744_v1, %v6496_v24  ;;  %v4366_v9 = vmul.f32 %v5633_v4, %v6496_v24  ;;  %5646 = vlog2.f32 %v1273_v51  ;;  %vm4371_vm1 = vweird.f32 %v5633_v4 }
 0x1ff   : > { %v5637_v13 = vpop.eup %5636  ;;  %v2084_v14 = vadd.f32 %v5635_v7, %v1604_v5  ;;  %5648 = vlog2.f32 %v1753_v58  ;;  %vm6992_vm2 = vmor %vm4370_vm0, %vm4371_vm1  ;;  %v2664_v7 = vld [vmem:[%s6478_s18 + $0x7e8] sm:$0xff] }
 0x200   : > { %v5639_v16 = vpop.eup %5638  ;;  %v3887_v17 = vmul.f32 1.442695, %v3812_v8  ;;  %v4367_v18 = vsub.f32 1.0, %v4366_v9  ;;  %v393_v19 = vmul.f32 0.6931472, %v5637_v13  ;;  %5650 = vlog2.f32 %v2233_v63 }
 0x201   : > { %v5641_v20 = vpop.eup %5640  ;;  %v2564_v21 = vadd.f32 %v5639_v16, %v2084_v14  ;;  %5652 = vlog2.f32 %v2713_v2  ;;  %v3144_v14 = vld [vmem:[%s6478_s18 + $0x7f0] sm:$0xff] }
 0x202   : > { %v5643_v26 = vpop.eup %5642  ;;  %5654 = vpow2.f32 %v3887_v17  ;;  %v4368_v27 = vmul.f32 %v5633_v4, %v4367_v18  ;;  %v457_v28 = vmul.f32 %v6496_v24, %v393_v19  ;;  %v874_v29 = vmul.f32 0.6931472, %v5641_v20 }
 0x203   : > { %v5645_v22 = vpop.eup %5644  ;;  %v3044_v31 = vadd.f32 %v5643_v26, %v2564_v21  ;;  %5656 = vlog2.f32 %v3193_v3  ;;  %v2712_v18 = vmax.f32 %v2664_v7, 1e-06  ;;  %v3623_v7 = vld [vmem:[%s6478_s18 + $0x7b8] sm:$0xff] }
 0x204   : > { %v5647_v35 = vpop.eup %5646  ;;  %v4369_v36 = vadd.f32 %v5633_v4, %v4368_v27  ;;  %v537_v37 = vmul.f32 1.442695, %v457_v28  ;;  %v937_v38 = vmul.f32 %v874_v29, %v6496_v24  ;;  %5658 = vlog2.f32 %v3673_v6  ;;  %v3624_v28 = vld [vmem:[%s6478_s18 + $0x7f8] sm:$0xff] }
 0x205   : > { %v5649_v40 = vpop.eup %5648  ;;  %v3524_v41 = vadd.f32 %v5645_v22, %v3044_v31  ;;  %v1354_v42 = vmul.f32 0.6931472, %v5647_v35  ;;  %5660 = vlog2.f32 %v311_v54  ;;  %v2184_v54 = vld [vmem:[%s6478_s18 + $0x7e0] sm:$0xff]  ;;  %v3192_v27 = vmax.f32 %v3144_v14, 1e-06  ;;  %v743_v35 = vld [vmem:[%s6478_s18 + $0x788] sm:$0xff] }
 0x206   : > { %v5651_v44 = vpop.eup %5650  ;;  %v4373_v45 = vsel %vm6992_vm2, %v5633_v4, %v4369_v36  ;;  %5662 = vpow2.f32 %v537_v37  ;;  %v1017_v46 = vmul.f32 1.442695, %v937_v38  ;;  %v1834_v47 = vmul.f32 0.6931472, %v5649_v40 }
 0x207   : > { %v5653_v48 = vpop.eup %5652  ;;  %v4378_v49 = vsel %vm6996_vm3, %v4377_v34, %v4373_v45  ;;  %v1417_v50 = vmul.f32 %v1354_v42, %v6496_v24  ;;  %v2314_v51 = vmul.f32 0.6931472, %v5651_v44  ;;  %5664 = vlog2.f32 %v792_v23 }
 0x208   : > { %v5655_v52 = vpop.eup %5654  ;;  %4656 = vpush %v4378_v49  ;;  %5666 = vpow2.f32 %v1017_v46  ;;  %v1897_v39 = vmul.f32 %v1834_v47, %v6496_v24  ;;  %v2794_v53 = vmul.f32 0.6931472, %v5653_v48  ;;  %v2232_v2 = vmax.f32 %v2184_v54, 1e-06  ;;  %v1703_v49 = vld [vmem:[%s6478_s18 + $0x798] sm:$0xff] }
 0x209   : > { %v5657_v55 = vpop.eup %5656  ;;  %v4004_v56 = vadd.f32 %v5655_v52, %v3524_v41  ;;  %v1497_v57 = vmul.f32 1.442695, %v1417_v50  ;;  %v2377_v58 = vmul.f32 %v2314_v51, %v6496_v24  ;;  %5668 = vlog2.f32 %v1272_v25  ;;  %v1223_v41 = vld [vmem:[%s6478_s18 + $0x790] sm:$0xff]  ;;  %v2183_v50 = vld [vmem:[%s6478_s18 + $0x7a0] sm:$0xff] }
 0x20a   : > { %v5659_v59 = vpop.eup %5658  ;;  %v1977_v60 = vmul.f32 1.442695, %v1897_v39  ;;  %v2857_v61 = vmul.f32 %v2794_v53, %v6496_v24  ;;  %v3274_v62 = vmul.f32 0.6931472, %v5657_v55  ;;  %5670 = vlog2.f32 %v1752_v43  ;;  %v2663_v55 = vld [vmem:[%s6478_s18 + $0x7a8] sm:$0xff] }
 0x20b   : > { %v5661_v63 = vpop.eup %5660  ;;  %4178 = vadd.xlane.f32.xlu0 %v4004_v56  ;;  %5672 = vpow2.f32 %v1497_v57  ;;  %v2457_v0 = vmul.f32 1.442695, %v2377_v58  ;;  %v3754_v1 = vmul.f32 0.6931472, %v5659_v59  ;;  %v3672_v40 = vmax.f32 %v3624_v28, 1e-06 }
 0x20c   : > { %v5663_v3 = vpop.eup %5662  ;;  %5674 = vpow2.f32 %v1977_v60  ;;  %v2937_v4 = vmul.f32 1.442695, %v2857_v61  ;;  %v3337_v5 = vmul.f32 %v3274_v62, %v6496_v24  ;;  %v391_v6 = vmul.f32 0.6931472, %v5661_v63  ;;  %v3143_v63 = vld [vmem:[%s6478_s18 + $0x7b0] sm:$0xff] }
 0x20d   : > { %v5665_v8 = vpop.eup %5664  ;;  %5676 = vpow2.f32 %v2457_v0  ;;  %v3817_v9 = vmul.f32 %v3754_v1, %v6496_v24  ;;  %v310_v44 = vmax.f32 %v262_v32, 1e-06  ;;  %v791_v48 = vmax.f32 %v743_v35, 1e-06 }
 0x20e   : > { %v5667_v10 = vpop.eup %5666  ;;  %5678 = vpow2.f32 %v2937_v4  ;;  %v3417_v11 = vmul.f32 1.442695, %v3337_v5  ;;  %v456_v12 = vmul.f32 %v6496_v24, %v391_v6  ;;  %v872_v13 = vmul.f32 0.6931472, %v5665_v8 }
 0x20f   : > { %v5669_v15 = vpop.eup %5668  ;;  %v1129_v16 = vadd.f32 %v5667_v10, %v5663_v3  ;;  %v3897_v17 = vmul.f32 1.442695, %v3817_v9  ;;  %5680 = vlog2.f32 %v2232_v2  ;;  %v1271_v52 = vmax.f32 %v1223_v41, 1e-06 }
 0x210   : > { %v5671_v19 = vpop.eup %5670  ;;  %5682 = vpow2.f32 %v3417_v11  ;;  %v535_v20 = vmul.f32 1.442695, %v456_v12  ;;  %v936_v21 = vmul.f32 %v872_v13, %v6496_v24  ;;  %v1352_v23 = vmul.f32 0.6931472, %v5669_v15  ;;  %v267_v11 = vld [vmem:[%s6478_s18 + $0x8c0] sm:$0xff] }
 0x211   : > { %v5673_v25 = vpop.eup %5672  ;;  %5684 = vpow2.f32 %v3897_v17  ;;  %v1832_v26 = vmul.f32 0.6931472, %v5671_v19  ;;  %v1751_v57 = vmax.f32 %v1703_v49, 1e-06  ;;  %v2231_v58 = vmax.f32 %v2183_v50, 1e-06 }
 0x212   : > { %v5675_v29 = vpop.eup %5674  ;;  %v1609_v30 = vadd.f32 %v5673_v25, %v1129_v16  ;;  %5686 = vpow2.f32 %v535_v20  ;;  %v1015_v22 = vmul.f32 1.442695, %v936_v21  ;;  %v1416_v31 = vmul.f32 %v1352_v23, %v6496_v24 }
 0x213   : > { %v5677_v33 = vpop.eup %5676  ;;  %v1896_v34 = vmul.f32 %v1832_v26, %v6496_v24  ;;  %5688 = vlog2.f32 %v2712_v18  ;;  %v2711_v2 = vmax.f32 %v2663_v55, 1e-06  ;;  %v3191_v10 = vmax.f32 %v3143_v63, 1e-06  ;;  %v1708_v55 = vld [vmem:[%s6478_s18 + $0x8d8] sm:$0xff] }
 0x214   : > { %v5679_v36 = vpop.eup %5678  ;;  %v2089_v37 = vadd.f32 %v5675_v29, %v1609_v30  ;;  %5690 = vpow2.f32 %v1015_v22  ;;  %v1495_v38 = vmul.f32 1.442695, %v1416_v31  ;;  %v3671_v18 = vmax.f32 %v3623_v7, 1e-06  ;;  %v748_v22 = vld [vmem:[%s6478_s18 + $0x8c8] sm:$0xff] }
 0x215   : > { %v5681_v42 = vpop.eup %5680  ;;  %v1975_v43 = vmul.f32 1.442695, %v1896_v34  ;;  %5692 = vlog2.f32 %v3192_v27  ;;  %v315_v23 = vmax.f32 %v267_v11, 1e-06  ;;  %v3148_v11 = vld [vmem:[%s6478_s18 + $0x8f0] sm:$0xff] }
 0x216   : > { %v5683_v45 = vpop.eup %5682  ;;  %v2569_v46 = vadd.f32 %v5677_v33, %v2089_v37  ;;  %5694 = vpow2.f32 %v1495_v38  ;;  %v2312_v47 = vmul.f32 0.6931472, %v5681_v42 }
 0x217   : > { %v5685_v51 = vpop.eup %5684  ;;  %5696 = vpow2.f32 %v1975_v43  ;;  %v796_v43 = vmax.f32 %v748_v22, 1e-06 }
 0x218   : > { %v5687_v39 = vpop.eup %5686  ;;  %v3049_v53 = vadd.f32 %v5679_v36, %v2569_v46  ;;  %v2376_v54 = vmul.f32 %v2312_v47, %v6496_v24  ;;  %5698 = vlog2.f32 %v3672_v40 }
 0x219   : > { %v5689_v56 = vpop.eup %5688  ;;  %5700 = vlog2.f32 %v310_v44 }
 0x21a   : > { %v5691_v59 = vpop.eup %5690  ;;  %v3529_v60 = vadd.f32 %v5683_v45, %v3049_v53  ;;  %v2455_v61 = vmul.f32 1.442695, %v2376_v54  ;;  %v2792_v62 = vmul.f32 0.6931472, %v5689_v56  ;;  %5702 = vlog2.f32 %v791_v48  ;;  %v1228_v48 = vld [vmem:[%s6478_s18 + $0x8d0] sm:$0xff] }
 0x21b   : > { %v5693_v0 = vpop.eup %5692  ;;  %v1128_v1 = vadd.f32 %v5691_v59, %v5687_v39  ;;  %5704 = vlog2.f32 %v1271_v52  ;;  %v1276_v59 = vmax.f32 %v1228_v48, 1e-06  ;;  %v2187_v48 = vld [vmem:[%s6478_s18 + $0x8a0] sm:$0xff] }
 0x21c   : > { %v5695_v3 = vpop.eup %5694  ;;  %v4009_v4 = vadd.f32 %v5685_v51, %v3529_v60  ;;  %5706 = vpow2.f32 %v2455_v61  ;;  %v2856_v5 = vmul.f32 %v2792_v62, %v6496_v24  ;;  %v3272_v6 = vmul.f32 0.6931472, %v5693_v0 }
 0x21d   : > { %v5697_v8 = vpop.eup %5696  ;;  %v1608_v9 = vadd.f32 %v5695_v3, %v1128_v1  ;;  %5708 = vlog2.f32 %v1751_v57  ;;  %v2188_v3 = vld [vmem:[%s6478_s18 + $0x8e0] sm:$0xff] }
 0x21e   : > { %v5699_v12 = vpop.eup %5698  ;;  %4188 = vadd.xlane.f32.xlu2 %v4009_v4  ;;  %v2935_v13 = vmul.f32 1.442695, %v2856_v5  ;;  %v3336_v14 = vmul.f32 %v3272_v6, %v6496_v24  ;;  %5710 = vlog2.f32 %v2231_v58 }
 0x21f   : > { %v5701_v15 = vpop.eup %5700  ;;  %v2088_v16 = vadd.f32 %v5697_v8, %v1608_v9  ;;  %v3752_v17 = vmul.f32 0.6931472, %v5699_v12  ;;  %5712 = vlog2.f32 %v2711_v2  ;;  %v1756_v2 = vmax.f32 %v1708_v55, 1e-06  ;;  %v2668_v8 = vld [vmem:[%s6478_s18 + $0x8e8] sm:$0xff] }
 0x220   : > { %v5703_v19 = vpop.eup %5702  ;;  %5714 = vpow2.f32 %v2935_v13  ;;  %v3415_v20 = vmul.f32 1.442695, %v3336_v14  ;;  %v389_v21 = vmul.f32 0.6931472, %v5701_v15  ;;  %v2236_v15 = vmax.f32 %v2188_v3, 1e-06 }
 0x221   : > { %v5705_v25 = vpop.eup %5704  ;;  %v3816_v26 = vmul.f32 %v3752_v17, %v6496_v24  ;;  %v870_v27 = vmul.f32 0.6931472, %v5703_v19  ;;  %5716 = vlog2.f32 %v3191_v10  ;;  %v2716_v19 = vmax.f32 %v2668_v8, 1e-06 }
 0x222   : > { %v5707_v28 = vpop.eup %5706  ;;  %5718 = vpow2.f32 %v3415_v20  ;;  %v455_v29 = vmul.f32 %v6496_v24, %v389_v21  ;;  %v1350_v30 = vmul.f32 0.6931472, %v5705_v25  ;;  %v3196_v25 = vmax.f32 %v3148_v11, 1e-06 }
 0x223   : > { %v5709_v31 = vpop.eup %5708  ;;  %v2568_v32 = vadd.f32 %v5707_v28, %v2088_v16  ;;  %v3895_v33 = vmul.f32 1.442695, %v3816_v26  ;;  %v935_v34 = vmul.f32 %v870_v27, %v6496_v24  ;;  %5720 = vlog2.f32 %v3671_v18  ;;  %v3628_v16 = vld [vmem:[%s6478_s18 + $0x8f8] sm:$0xff]  ;;  %v266_v26 = vld [vmem:[%s6478_s18 + $0x880] sm:$0xff]  ;;  %v747_v27 = vld [vmem:[%s6478_s18 + $0x888] sm:$0xff] }
 0x224   : > { %v5711_v35 = vpop.eup %5710  ;;  %v533_v36 = vmul.f32 1.442695, %v455_v29  ;;  %v1415_v37 = vmul.f32 %v1350_v30, %v6496_v24  ;;  %v1830_v38 = vmul.f32 0.6931472, %v5709_v31  ;;  %5722 = vlog2.f32 %v315_v23 }
 0x225   : > { %v5713_v40 = vpop.eup %5712  ;;  %5724 = vpow2.f32 %v3895_v33  ;;  %v1013_v41 = vmul.f32 1.442695, %v935_v34  ;;  %v2310_v42 = vmul.f32 0.6931472, %v5711_v35  ;;  %v3676_v29 = vmax.f32 %v3628_v16, 1e-06 }
 0x226   : > { %v5715_v44 = vpop.eup %5714  ;;  %5726 = vpow2.f32 %v533_v36  ;;  %v1493_v45 = vmul.f32 1.442695, %v1415_v37  ;;  %v1895_v46 = vmul.f32 %v1830_v38, %v6496_v24  ;;  %v2790_v47 = vmul.f32 0.6931472, %v5713_v40 }
 0x227   : > { %v5717_v49 = vpop.eup %5716  ;;  %v3048_v50 = vadd.f32 %v5715_v44, %v2568_v32  ;;  %5728 = vpow2.f32 %v1013_v41  ;;  %v2375_v51 = vmul.f32 %v2310_v42, %v6496_v24  ;;  %v1227_v32 = vld [vmem:[%s6478_s18 + $0x890] sm:$0xff]  ;;  %v314_v34 = vmax.f32 %v266_v26, 1e-06  ;;  %v1707_v41 = vld [vmem:[%s6478_s18 + $0x898] sm:$0xff] }
 0x228   : > { %v5719_v52 = vpop.eup %5718  ;;  %5730 = vpow2.f32 %v1493_v45  ;;  %v1973_v39 = vmul.f32 1.442695, %v1895_v46  ;;  %v2855_v53 = vmul.f32 %v2790_v47, %v6496_v24  ;;  %v3270_v54 = vmul.f32 0.6931472, %v5717_v49  ;;  %v2667_v49 = vld [vmem:[%s6478_s18 + $0x8a8] sm:$0xff] }
 0x229   : > { %v5721_v56 = vpop.eup %5720  ;;  %v3528_v57 = vadd.f32 %v5719_v52, %v3048_v50  ;;  %v2453_v58 = vmul.f32 1.442695, %v2375_v51  ;;  %5732 = vlog2.f32 %v796_v43  ;;  %v795_v35 = vmax.f32 %v747_v27, 1e-06 }
 0x22a   : > { %v5723_v60 = vpop.eup %5722  ;;  %5734 = vpow2.f32 %v1973_v39  ;;  %v2933_v61 = vmul.f32 1.442695, %v2855_v53  ;;  %v3335_v62 = vmul.f32 %v3270_v54, %v6496_v24  ;;  %v3750_v63 = vmul.f32 0.6931472, %v5721_v56 }
 0x22b   : > { %v5725_v0 = vpop.eup %5724  ;;  %5736 = vpow2.f32 %v2453_v58  ;;  %v399_v1 = vmul.f32 0.6931472, %v5723_v60  ;;  %v1275_v43 = vmax.f32 %v1227_v32, 1e-06  ;;  %v1755_v51 = vmax.f32 %v1707_v41, 1e-06 }
 0x22c   : > { %v5727_v4 = vpop.eup %5726  ;;  %v4008_v5 = vadd.f32 %v5725_v0, %v3528_v57  ;;  %5738 = vpow2.f32 %v2933_v61  ;;  %v3413_v6 = vmul.f32 1.442695, %v3335_v62  ;;  %v3815_v7 = vmul.f32 %v3750_v63, %v6496_v24 }
 0x22d   : > { %v5729_v9 = vpop.eup %5728  ;;  %v460_v10 = vmul.f32 %v6496_v24, %v399_v1  ;;  %5740 = vlog2.f32 %v1276_v59  ;;  %v2235_v57 = vmax.f32 %v2187_v48, 1e-06  ;;  %v2715_v58 = vmax.f32 %v2667_v49, 1e-06  ;;  %v1226_v49 = vld [vmem:[%s6478_s18 + $0x850] sm:$0xff] }
 0x22e   : > { %v5731_v12 = vpop.eup %5730  ;;  %4186 = vadd.xlane.f32.xlu1 %v4008_v5  ;;  %v1127_v13 = vadd.f32 %v5729_v9, %v5727_v4  ;;  %5742 = vpow2.f32 %v3413_v6  ;;  %v3893_v14 = vmul.f32 1.442695, %v3815_v7  ;;  %v3147_v5 = vld [vmem:[%s6478_s18 + $0x8b0] sm:$0xff] }
 0x22f   : > { %v5733_v17 = vpop.eup %5732  ;;  %v543_v18 = vmul.f32 1.442695, %v460_v10  ;;  %5744 = vlog2.f32 %v1756_v2 }
 0x230   : > { %v5735_v20 = vpop.eup %5734  ;;  %v1607_v21 = vadd.f32 %v5731_v12, %v1127_v13  ;;  %5746 = vpow2.f32 %v3893_v14  ;;  %v880_v23 = vmul.f32 0.6931472, %v5733_v17  ;;  %v3195_v17 = vmax.f32 %v3147_v5, 1e-06 }
 0x231   : > { %v5737_v28 = vpop.eup %5736  ;;  %5748 = vpow2.f32 %v543_v18 }
 0x232   : > { %v5739_v30 = vpop.eup %5738  ;;  %v2087_v22 = vadd.f32 %v5735_v20, %v1607_v21  ;;  %v940_v31 = vmul.f32 %v880_v23, %v6496_v24  ;;  %5750 = vlog2.f32 %v2236_v15  ;;  %v3627_v23 = vld [vmem:[%s6478_s18 + $0x8b8] sm:$0xff] }
 0x233   : > { %v5741_v33 = vpop.eup %5740  ;;  %5752 = vlog2.f32 %v2716_v19 }
 0x234   : > { %v5743_v36 = vpop.eup %5742  ;;  %v2567_v37 = vadd.f32 %v5737_v28, %v2087_v22  ;;  %v1023_v38 = vmul.f32 1.442695, %v940_v31  ;;  %v1360_v40 = vmul.f32 0.6931472, %v5741_v33  ;;  %5754 = vlog2.f32 %v3196_v25  ;;  %v265_v31 = vld [vmem:[%s6478_s18 + $0x840] sm:$0xff] }
 0x235   : > { %v5745_v42 = vpop.eup %5744  ;;  %5756 = vlog2.f32 %v3676_v29 }
 0x236   : > { %v5747_v44 = vpop.eup %5746  ;;  %v3047_v45 = vadd.f32 %v5739_v30, %v2567_v37  ;;  %5758 = vpow2.f32 %v1023_v38  ;;  %v1420_v46 = vmul.f32 %v1360_v40, %v6496_v24  ;;  %v1840_v47 = vmul.f32 0.6931472, %v5745_v42 }
 0x237   : > { %v5749_v50 = vpop.eup %5748  ;;  %5760 = vlog2.f32 %v314_v34 }
 0x238   : > { %v5751_v52 = vpop.eup %5750  ;;  %v3527_v39 = vadd.f32 %v5743_v36, %v3047_v45  ;;  %v1503_v53 = vmul.f32 1.442695, %v1420_v46  ;;  %v1900_v54 = vmul.f32 %v1840_v47, %v6496_v24  ;;  %5762 = vlog2.f32 %v795_v35 }
 0x239   : > { %v5753_v55 = vpop.eup %5752  ;;  %v2320_v56 = vmul.f32 0.6931472, %v5751_v52  ;;  %5764 = vlog2.f32 %v1275_v43  ;;  %v3675_v35 = vmax.f32 %v3627_v23, 1e-06  ;;  %v313_v43 = vmax.f32 %v265_v31, 1e-06  ;;  %s4657_s20 = spop %4656 }
 0x23a   : > { %v5755_v59 = vpop.eup %5754  ;;  %v4007_v60 = vadd.f32 %v5747_v44, %v3527_v39  ;;  %5766 = vpow2.f32 %v1503_v53  ;;  %v1983_v61 = vmul.f32 1.442695, %v1900_v54  ;;  %v2800_v62 = vmul.f32 0.6931472, %v5753_v55  ;;  %v746_v44 = vld [vmem:[%s6478_s18 + $0x848] sm:$0xff]  ;;  %v1706_v52 = vld [vmem:[%s6478_s18 + $0x858] sm:$0xff] }
 0x23b   : > { %v5757_v63 = vpop.eup %5756  ;;  %v2380_v0 = vmul.f32 %v2320_v56, %v6496_v24  ;;  %v3280_v1 = vmul.f32 0.6931472, %v5755_v59  ;;  %5768 = vlog2.f32 %v1755_v51  ;;  %v794_v55 = vmax.f32 %v746_v44, 1e-06  ;;  %v2186_v56 = vld [vmem:[%s6478_s18 + $0x860] sm:$0xff] }
 0x23c   : > { %v5759_v2 = vpop.eup %5758  ;;  %4184 = vadd.xlane.f32.xlu0 %v4007_v60  ;;  %5770 = vpow2.f32 %v1983_v61  ;;  %v2860_v3 = vmul.f32 %v2800_v62, %v6496_v24  ;;  %v3760_v4 = vmul.f32 0.6931472, %v5757_v63  ;;  %v1274_v59 = vmax.f32 %v1226_v49, 1e-06 }
 0x23d   : > { %v5761_v6 = vpop.eup %5760  ;;  %v1132_v7 = vadd.f32 %v5759_v2, %v5749_v50  ;;  %v2463_v8 = vmul.f32 1.442695, %v2380_v0  ;;  %v3340_v9 = vmul.f32 %v3280_v1, %v6496_v24  ;;  %5772 = vlog2.f32 %v2235_v57  ;;  %v2666_v0 = vld [vmem:[%s6478_s18 + $0x868] sm:$0xff]  ;;  %v3146_v1 = vld [vmem:[%s6478_s18 + $0x870] sm:$0xff] }
 0x23e   : > { %v5763_v10 = vpop.eup %5762  ;;  %v2943_v11 = vmul.f32 1.442695, %v2860_v3  ;;  %v3820_v12 = vmul.f32 %v3760_v4, %v6496_v24  ;;  %v397_v13 = vmul.f32 0.6931472, %v5761_v6  ;;  %5774 = vlog2.f32 %v2715_v58 }
 0x23f   : > { %v5765_v14 = vpop.eup %5764  ;;  %5776 = vpow2.f32 %v2463_v8  ;;  %v3423_v15 = vmul.f32 1.442695, %v3340_v9  ;;  %v878_v16 = vmul.f32 0.6931472, %v5763_v10  ;;  %v1754_v63 = vmax.f32 %v1706_v52, 1e-06 }
 0x240   : > { %v5767_v18 = vpop.eup %5766  ;;  %5778 = vpow2.f32 %v2943_v11  ;;  %v3903_v19 = vmul.f32 1.442695, %v3820_v12  ;;  %v459_v20 = vmul.f32 %v6496_v24, %v397_v13  ;;  %v1358_v21 = vmul.f32 0.6931472, %v5765_v14  ;;  %v3626_v8 = vld [vmem:[%s6478_s18 + $0x878] sm:$0xff] }
 0x241   : > { %v5769_v25 = vpop.eup %5768  ;;  %v1612_v26 = vadd.f32 %v5767_v18, %v1132_v7  ;;  %5780 = vpow2.f32 %v3423_v15  ;;  %v939_v27 = vmul.f32 %v878_v16, %v6496_v24  ;;  %v2234_v3 = vmax.f32 %v2186_v56, 1e-06  ;;  %v270_v16 = vld [vmem:[%s6478_s18 + $0x980] sm:$0xff] }
 0x242   : > { %v5771_v28 = vpop.eup %5770  ;;  %5782 = vpow2.f32 %v3903_v19  ;;  %v541_v29 = vmul.f32 1.442695, %v459_v20  ;;  %v1419_v30 = vmul.f32 %v1358_v21, %v6496_v24  ;;  %v1838_v22 = vmul.f32 0.6931472, %v5769_v25  ;;  %v751_v25 = vld [vmem:[%s6478_s18 + $0x988] sm:$0xff] }
 0x243   : > { %v5773_v32 = vpop.eup %5772  ;;  %v2092_v33 = vadd.f32 %v5771_v28, %v1612_v26  ;;  %v1021_v34 = vmul.f32 1.442695, %v939_v27  ;;  %5784 = vlog2.f32 %v3195_v17  ;;  %v2714_v10 = vmax.f32 %v2666_v0, 1e-06  ;;  %v1231_v26 = vld [vmem:[%s6478_s18 + $0x990] sm:$0xff] }
 0x244   : > { %v5775_v36 = vpop.eup %5774  ;;  %5786 = vpow2.f32 %v541_v29  ;;  %v1501_v37 = vmul.f32 1.442695, %v1419_v30  ;;  %v1899_v38 = vmul.f32 %v1838_v22, %v6496_v24  ;;  %v2318_v40 = vmul.f32 0.6931472, %v5773_v32 }
 0x245   : > { %v5777_v41 = vpop.eup %5776  ;;  %5788 = vpow2.f32 %v1021_v34  ;;  %v2798_v42 = vmul.f32 0.6931472, %v5775_v36  ;;  %v3194_v11 = vmax.f32 %v3146_v1, 1e-06  ;;  %v3674_v18 = vmax.f32 %v3626_v8, 1e-06 }
 0x246   : > { %v5779_v45 = vpop.eup %5778  ;;  %v2572_v46 = vadd.f32 %v5777_v41, %v2092_v33  ;;  %5790 = vpow2.f32 %v1501_v37  ;;  %v1981_v47 = vmul.f32 1.442695, %v1899_v38  ;;  %v2379_v48 = vmul.f32 %v2318_v40, %v6496_v24 }
 0x247   : > { %v5781_v50 = vpop.eup %5780  ;;  %v2859_v51 = vmul.f32 %v2798_v42, %v6496_v24  ;;  %5792 = vlog2.f32 %v3675_v35  ;;  %v318_v28 = vmax.f32 %v270_v16, 1e-06  ;;  %v799_v34 = vmax.f32 %v751_v25, 1e-06  ;;  %v3631_v25 = vld [vmem:[%s6478_s18 + $0x9b8] sm:$0xff] }
 0x248   : > { %v5783_v39 = vpop.eup %5782  ;;  %v3052_v53 = vadd.f32 %v5779_v45, %v2572_v46  ;;  %5794 = vpow2.f32 %v1981_v47  ;;  %v2461_v54 = vmul.f32 1.442695, %v2379_v48  ;;  %v1279_v35 = vmax.f32 %v1231_v26, 1e-06  ;;  %v1711_v47 = vld [vmem:[%s6478_s18 + $0x998] sm:$0xff] }
 0x249   : > { %v5785_v57 = vpop.eup %5784  ;;  %v2941_v58 = vmul.f32 1.442695, %v2859_v51  ;;  %5796 = vlog2.f32 %v313_v43 }
 0x24a   : > { %v5787_v60 = vpop.eup %5786  ;;  %v3532_v61 = vadd.f32 %v5781_v50, %v3052_v53  ;;  %5798 = vpow2.f32 %v2461_v54  ;;  %v3278_v62 = vmul.f32 0.6931472, %v5785_v57 }
 0x24b   : > { %v5789_v2 = vpop.eup %5788  ;;  %5800 = vpow2.f32 %v2941_v58  ;;  %v1759_v58 = vmax.f32 %v1711_v47, 1e-06 }
 0x24c   : > { %v5791_v4 = vpop.eup %5790  ;;  %v4012_v5 = vadd.f32 %v5783_v39, %v3532_v61  ;;  %v1131_v6 = vadd.f32 %v5789_v2, %v5787_v60  ;;  %v3339_v7 = vmul.f32 %v3278_v62, %v6496_v24  ;;  %5802 = vlog2.f32 %v794_v55 }
 0x24d   : > { %v5793_v9 = vpop.eup %5792  ;;  %5804 = vlog2.f32 %v1274_v59 }
 0x24e   : > { %v5795_v12 = vpop.eup %5794  ;;  %4194 = vadd.xlane.f32.xlu2 %v4012_v5  ;;  %v1611_v13 = vadd.f32 %v5791_v4, %v1131_v6  ;;  %v3421_v14 = vmul.f32 1.442695, %v3339_v7  ;;  %v3758_v15 = vmul.f32 0.6931472, %v5793_v9  ;;  %5806 = vlog2.f32 %v1754_v63  ;;  %v2191_v63 = vld [vmem:[%s6478_s18 + $0x9a0] sm:$0xff]  ;;  %v2671_v7 = vld [vmem:[%s6478_s18 + $0x9a8] sm:$0xff] }
 0x24f   : > { %v5797_v17 = vpop.eup %5796  ;;  %5808 = vlog2.f32 %v2234_v3 }
 0x250   : > { %v5799_v19 = vpop.eup %5798  ;;  %v2091_v20 = vadd.f32 %v5795_v12, %v1611_v13  ;;  %5810 = vpow2.f32 %v3421_v14  ;;  %v3819_v21 = vmul.f32 %v3758_v15, %v6496_v24  ;;  %v395_v23 = vmul.f32 0.6931472, %v5797_v17 }
 0x251   : > { %v5801_v27 = vpop.eup %5800  ;;  %5812 = vlog2.f32 %v2714_v10  ;;  %v2239_v10 = vmax.f32 %v2191_v63, 1e-06  ;;  %v2719_v17 = vmax.f32 %v2671_v7, 1e-06 }
 0x252   : > { %v5803_v29 = vpop.eup %5802  ;;  %v2571_v30 = vadd.f32 %v5799_v19, %v2091_v20  ;;  %v3901_v22 = vmul.f32 1.442695, %v3819_v21  ;;  %v458_v31 = vmul.f32 %v6496_v24, %v395_v23  ;;  %5814 = vlog2.f32 %v3194_v11 }
 0x253   : > { %v5805_v32 = vpop.eup %5804  ;;  %v876_v33 = vmul.f32 0.6931472, %v5803_v29  ;;  %5816 = vlog2.f32 %v3674_v18  ;;  %v3151_v18 = vld [vmem:[%s6478_s18 + $0x9b0] sm:$0xff] }
 0x254   : > { %v5807_v36 = vpop.eup %5806  ;;  %v3051_v37 = vadd.f32 %v5801_v27, %v2571_v30  ;;  %5818 = vpow2.f32 %v3901_v22  ;;  %v539_v38 = vmul.f32 1.442695, %v458_v31  ;;  %v1356_v40 = vmul.f32 0.6931472, %v5805_v32  ;;  %v750_v32 = vld [vmem:[%s6478_s18 + $0x948] sm:$0xff] }
 0x255   : > { %v5809_v41 = vpop.eup %5808  ;;  %v938_v42 = vmul.f32 %v876_v33, %v6496_v24  ;;  %v1836_v43 = vmul.f32 0.6931472, %v5807_v36  ;;  %5820 = vlog2.f32 %v318_v28  ;;  %v269_v28 = vld [vmem:[%s6478_s18 + $0x940] sm:$0xff]  ;;  %v3199_v31 = vmax.f32 %v3151_v18, 1e-06 }
 0x256   : > { %v5811_v44 = vpop.eup %5810  ;;  %5822 = vpow2.f32 %v539_v38  ;;  %v1418_v45 = vmul.f32 %v1356_v40, %v6496_v24  ;;  %v2316_v46 = vmul.f32 0.6931472, %v5809_v41  ;;  %v317_v40 = vmax.f32 %v269_v28, 1e-06  ;;  %v1230_v41 = vld [vmem:[%s6478_s18 + $0x950] sm:$0xff] }
 0x257   : > { %v5813_v48 = vpop.eup %5812  ;;  %v3531_v49 = vadd.f32 %v5811_v44, %v3051_v37  ;;  %v1019_v50 = vmul.f32 1.442695, %v938_v42  ;;  %v1898_v51 = vmul.f32 %v1836_v43, %v6496_v24  ;;  %5824 = vlog2.f32 %v799_v34  ;;  %v1710_v42 = vld [vmem:[%s6478_s18 + $0x958] sm:$0xff] }
 0x258   : > { %v5815_v52 = vpop.eup %5814  ;;  %v1499_v39 = vmul.f32 1.442695, %v1418_v45  ;;  %v2378_v53 = vmul.f32 %v2316_v46, %v6496_v24  ;;  %v2796_v54 = vmul.f32 0.6931472, %v5813_v48  ;;  %5826 = vlog2.f32 %v1279_v35  ;;  %v2190_v48 = vld [vmem:[%s6478_s18 + $0x960] sm:$0xff] }
 0x259   : > { %v5817_v55 = vpop.eup %5816  ;;  %5828 = vpow2.f32 %v1019_v50  ;;  %v1979_v56 = vmul.f32 1.442695, %v1898_v51  ;;  %v3276_v57 = vmul.f32 0.6931472, %v5815_v52  ;;  %v3679_v35 = vmax.f32 %v3631_v25, 1e-06 }
 0x25a   : > { %v5819_v59 = vpop.eup %5818  ;;  %5830 = vpow2.f32 %v1499_v39  ;;  %v2459_v60 = vmul.f32 1.442695, %v2378_v53  ;;  %v2858_v61 = vmul.f32 %v2796_v54, %v6496_v24  ;;  %v3756_v62 = vmul.f32 0.6931472, %v5817_v55  ;;  %v2670_v55 = vld [vmem:[%s6478_s18 + $0x968] sm:$0xff] }
 0x25b   : > { %v5821_v0 = vpop.eup %5820  ;;  %v4011_v1 = vadd.f32 %v5819_v59, %v3531_v49  ;;  %5832 = vpow2.f32 %v1979_v56  ;;  %v3338_v2 = vmul.f32 %v3276_v57, %v6496_v24  ;;  %v798_v44 = vmax.f32 %v750_v32, 1e-06 }
 0x25c   : > { %v5823_v3 = vpop.eup %5822  ;;  %5834 = vpow2.f32 %v2459_v60  ;;  %v2939_v4 = vmul.f32 1.442695, %v2858_v61  ;;  %v3818_v5 = vmul.f32 %v3756_v62, %v6496_v24  ;;  %v405_v6 = vmul.f32 0.6931472, %v5821_v0  ;;  %v3150_v62 = vld [vmem:[%s6478_s18 + $0x970] sm:$0xff] }
 0x25d   : > { %v5825_v8 = vpop.eup %5824  ;;  %4192 = vadd.xlane.f32.xlu1 %v4011_v1  ;;  %v3419_v9 = vmul.f32 1.442695, %v3338_v2  ;;  %5836 = vlog2.f32 %v1759_v58  ;;  %v1278_v50 = vmax.f32 %v1230_v41, 1e-06  ;;  %v1758_v51 = vmax.f32 %v1710_v42, 1e-06 }
 0x25e   : > { %v5827_v11 = vpop.eup %5826  ;;  %5838 = vpow2.f32 %v2939_v4  ;;  %v3899_v12 = vmul.f32 1.442695, %v3818_v5  ;;  %v463_v13 = vmul.f32 %v6496_v24, %v405_v6  ;;  %v886_v14 = vmul.f32 0.6931472, %v5825_v8  ;;  %v3630_v2 = vld [vmem:[%s6478_s18 + $0x978] sm:$0xff] }
 0x25f   : > { %v5829_v15 = vpop.eup %5828  ;;  %5840 = vpow2.f32 %v3419_v9  ;;  %v1366_v16 = vmul.f32 0.6931472, %v5827_v11  ;;  %v2238_v57 = vmax.f32 %v2190_v48, 1e-06  ;;  %v2718_v1 = vmax.f32 %v2670_v55, 1e-06 }
 0x260   : > { %v5831_v19 = vpop.eup %5830  ;;  %v1130_v20 = vadd.f32 %v5829_v15, %v5823_v3  ;;  %5842 = vpow2.f32 %v3899_v12  ;;  %v549_v21 = vmul.f32 1.442695, %v463_v13  ;;  %v943_v23 = vmul.f32 %v886_v14, %v6496_v24  ;;  %v1229_v48 = vld [vmem:[%s6478_s18 + $0x910] sm:$0xff] }
 0x261   : > { %v5833_v26 = vpop.eup %5832  ;;  %v1423_v27 = vmul.f32 %v1366_v16, %v6496_v24  ;;  %5844 = vlog2.f32 %v2239_v10  ;;  %v3198_v10 = vmax.f32 %v3150_v62, 1e-06  ;;  %v3678_v14 = vmax.f32 %v3630_v2, 1e-06 }
 0x262   : > { %v5835_v29 = vpop.eup %5834  ;;  %v1610_v30 = vadd.f32 %v5831_v19, %v1130_v20  ;;  %5846 = vpow2.f32 %v549_v21  ;;  %v1029_v22 = vmul.f32 1.442695, %v943_v23  ;;  %v268_v21 = vld [vmem:[%s6478_s18 + $0x900] sm:$0xff] }
 0x263   : > { %v5837_v33 = vpop.eup %5836  ;;  %v1509_v34 = vmul.f32 1.442695, %v1423_v27  ;;  %5848 = vlog2.f32 %v2719_v17 }
 0x264   : > { %v5839_v36 = vpop.eup %5838  ;;  %v2090_v37 = vadd.f32 %v5833_v26, %v1610_v30  ;;  %5850 = vpow2.f32 %v1029_v22  ;;  %v1846_v38 = vmul.f32 0.6931472, %v5837_v33 }
 0x265   : > { %v5841_v43 = vpop.eup %5840  ;;  %5852 = vpow2.f32 %v1509_v34  ;;  %v316_v34 = vmax.f32 %v268_v21, 1e-06 }
 0x266   : > { %v5843_v45 = vpop.eup %5842  ;;  %v2570_v46 = vadd.f32 %v5835_v29, %v2090_v37  ;;  %v1903_v47 = vmul.f32 %v1846_v38, %v6496_v24  ;;  %5854 = vlog2.f32 %v3199_v31 }
 0x267   : > { %v5845_v49 = vpop.eup %5844  ;;  %5856 = vlog2.f32 %v3679_v35 }
 0x268   : > { %v5847_v52 = vpop.eup %5846  ;;  %v3050_v39 = vadd.f32 %v5839_v36, %v2570_v46  ;;  %v1989_v53 = vmul.f32 1.442695, %v1903_v47  ;;  %v2326_v54 = vmul.f32 0.6931472, %v5845_v49  ;;  %5858 = vlog2.f32 %v317_v40  ;;  %v749_v40 = vld [vmem:[%s6478_s18 + $0x908] sm:$0xff] }
 0x269   : > { %v5849_v56 = vpop.eup %5848  ;;  %5860 = vlog2.f32 %v798_v44 }
 0x26a   : > { %v5851_v58 = vpop.eup %5850  ;;  %v3530_v59 = vadd.f32 %v5841_v43, %v3050_v39  ;;  %5862 = vpow2.f32 %v1989_v53  ;;  %v2383_v60 = vmul.f32 %v2326_v54, %v6496_v24  ;;  %v2806_v61 = vmul.f32 0.6931472, %v5849_v56 }
 0x26b   : > { %v5853_v63 = vpop.eup %5852  ;;  %v1135_v0 = vadd.f32 %v5851_v58, %v5847_v52  ;;  %5864 = vlog2.f32 %v1278_v50  ;;  %v797_v52 = vmax.f32 %v749_v40, 1e-06  ;;  %v1277_v58 = vmax.f32 %v1229_v48, 1e-06  ;;  %v1714_v40 = vld [vmem:[%s6478_s18 + $0xa58] sm:$0xff] }
 0x26c   : > { %v5855_v3 = vpop.eup %5854  ;;  %v4010_v4 = vadd.f32 %v5843_v45, %v3530_v59  ;;  %v2469_v5 = vmul.f32 1.442695, %v2383_v60  ;;  %v2863_v6 = vmul.f32 %v2806_v61, %v6496_v24  ;;  %5866 = vlog2.f32 %v1758_v51  ;;  %v1709_v59 = vld [vmem:[%s6478_s18 + $0x918] sm:$0xff] }
 0x26d   : > { %v5857_v7 = vpop.eup %5856  ;;  %v1615_v8 = vadd.f32 %v5853_v63, %v1135_v0  ;;  %v3286_v9 = vmul.f32 0.6931472, %v5855_v3  ;;  %5868 = vlog2.f32 %v2238_v57  ;;  %v2189_v0 = vld [vmem:[%s6478_s18 + $0x920] sm:$0xff]  ;;  %v2669_v3 = vld [vmem:[%s6478_s18 + $0x928] sm:$0xff] }
 0x26e   : > { %v5859_v11 = vpop.eup %5858  ;;  %4190 = vadd.xlane.f32.xlu0 %v4010_v4  ;;  %5870 = vpow2.f32 %v2469_v5  ;;  %v2949_v12 = vmul.f32 1.442695, %v2863_v6  ;;  %v3766_v13 = vmul.f32 0.6931472, %v5857_v7  ;;  %v1757_v7 = vmax.f32 %v1709_v59, 1e-06 }
 0x26f   : > { %v5861_v15 = vpop.eup %5860  ;;  %v3343_v16 = vmul.f32 %v3286_v9, %v6496_v24  ;;  %v403_v17 = vmul.f32 0.6931472, %v5859_v11  ;;  %5872 = vlog2.f32 %v2718_v1 }
 0x270   : > { %v5863_v18 = vpop.eup %5862  ;;  %5874 = vpow2.f32 %v2949_v12  ;;  %v3823_v19 = vmul.f32 %v3766_v13, %v6496_v24  ;;  %v884_v20 = vmul.f32 0.6931472, %v5861_v15  ;;  %v2237_v12 = vmax.f32 %v2189_v0, 1e-06 }
 0x271   : > { %v5865_v23 = vpop.eup %5864  ;;  %v2095_v25 = vadd.f32 %v5863_v18, %v1615_v8  ;;  %v3429_v26 = vmul.f32 1.442695, %v3343_v16  ;;  %v462_v27 = vmul.f32 %v6496_v24, %v403_v17  ;;  %5876 = vlog2.f32 %v3198_v10  ;;  %v3149_v8 = vld [vmem:[%s6478_s18 + $0x930] sm:$0xff]  ;;  %v3629_v16 = vld [vmem:[%s6478_s18 + $0x938] sm:$0xff]  ;;  %v273_v17 = vld [vmem:[%s6478_s18 + $0xa40] sm:$0xff] }
 0x272   : > { %v5867_v28 = vpop.eup %5866  ;;  %v3909_v29 = vmul.f32 1.442695, %v3823_v19  ;;  %v942_v30 = vmul.f32 %v884_v20, %v6496_v24  ;;  %v1364_v22 = vmul.f32 0.6931472, %v5865_v23  ;;  %5878 = vlog2.f32 %v3678_v14 }
 0x273   : > { %v5869_v31 = vpop.eup %5868  ;;  %5880 = vpow2.f32 %v3429_v26  ;;  %v547_v32 = vmul.f32 1.442695, %v462_v27  ;;  %v1844_v33 = vmul.f32 0.6931472, %v5867_v28  ;;  %v2717_v15 = vmax.f32 %v2669_v3, 1e-06 }
 0x274   : > { %v5871_v35 = vpop.eup %5870  ;;  %5882 = vpow2.f32 %v3909_v29  ;;  %v1027_v36 = vmul.f32 1.442695, %v942_v30  ;;  %v1422_v37 = vmul.f32 %v1364_v22, %v6496_v24  ;;  %v2324_v38 = vmul.f32 0.6931472, %v5869_v31 }
 0x275   : > { %v5873_v41 = vpop.eup %5872  ;;  %v2575_v42 = vadd.f32 %v5871_v35, %v2095_v25  ;;  %5884 = vpow2.f32 %v547_v32  ;;  %v1902_v43 = vmul.f32 %v1844_v33, %v6496_v24  ;;  %v3197_v20 = vmax.f32 %v3149_v8, 1e-06  ;;  %v754_v25 = vld [vmem:[%s6478_s18 + $0xa48] sm:$0xff]  ;;  %v1234_v32 = vld [vmem:[%s6478_s18 + $0xa50] sm:$0xff] }
 0x276   : > { %v5875_v44 = vpop.eup %5874  ;;  %5886 = vpow2.f32 %v1027_v36  ;;  %v1507_v45 = vmul.f32 1.442695, %v1422_v37  ;;  %v2382_v46 = vmul.f32 %v2324_v38, %v6496_v24  ;;  %v2804_v47 = vmul.f32 0.6931472, %v5873_v41 }
 0x277   : > { %v5877_v49 = vpop.eup %5876  ;;  %v3055_v50 = vadd.f32 %v5875_v44, %v2575_v42  ;;  %v1987_v51 = vmul.f32 1.442695, %v1902_v43  ;;  %5888 = vlog2.f32 %v316_v34  ;;  %v3677_v28 = vmax.f32 %v3629_v16, 1e-06  ;;  %v2194_v44 = vld [vmem:[%s6478_s18 + $0xa60] sm:$0xff] }
 0x278   : > { %v5879_v39 = vpop.eup %5878  ;;  %5890 = vpow2.f32 %v1507_v45  ;;  %v2467_v53 = vmul.f32 1.442695, %v2382_v46  ;;  %v2862_v54 = vmul.f32 %v2804_v47, %v6496_v24  ;;  %v3284_v55 = vmul.f32 0.6931472, %v5877_v49 }
 0x279   : > { %v5881_v56 = vpop.eup %5880  ;;  %5892 = vpow2.f32 %v1987_v51  ;;  %v3764_v57 = vmul.f32 0.6931472, %v5879_v39  ;;  %v321_v29 = vmax.f32 %v273_v17, 1e-06  ;;  %v802_v35 = vmax.f32 %v754_v25, 1e-06 }
 0x27a   : > { %v5883_v60 = vpop.eup %5882  ;;  %v3535_v61 = vadd.f32 %v5881_v56, %v3055_v50  ;;  %5894 = vpow2.f32 %v2467_v53  ;;  %v2947_v62 = vmul.f32 1.442695, %v2862_v54  ;;  %v3342_v63 = vmul.f32 %v3284_v55, %v6496_v24 }
 0x27b   : > { %v5885_v1 = vpop.eup %5884  ;;  %v3822_v2 = vmul.f32 %v3764_v57, %v6496_v24  ;;  %5896 = vlog2.f32 %v797_v52  ;;  %v1282_v43 = vmax.f32 %v1234_v32, 1e-06  ;;  %v1762_v51 = vmax.f32 %v1714_v40, 1e-06 }
 0x27c   : > { %v5887_v4 = vpop.eup %5886  ;;  %v4015_v5 = vadd.f32 %v5883_v60, %v3535_v61  ;;  %5898 = vpow2.f32 %v2947_v62  ;;  %v3427_v6 = vmul.f32 1.442695, %v3342_v63  ;;  %v2242_v54 = vmax.f32 %v2194_v44, 1e-06  ;;  %v2674_v62 = vld [vmem:[%s6478_s18 + $0xa68] sm:$0xff]  ;;  %v1233_v44 = vld [vmem:[%s6478_s18 + $0xa10] sm:$0xff] }
 0x27d   : > { %v5889_v9 = vpop.eup %5888  ;;  %v1134_v10 = vadd.f32 %v5887_v4, %v5885_v1  ;;  %v3907_v11 = vmul.f32 1.442695, %v3822_v2  ;;  %5900 = vlog2.f32 %v1277_v58 }
 0x27e   : > { %v5891_v13 = vpop.eup %5890  ;;  %4200 = vadd.xlane.f32.xlu2 %v4015_v5  ;;  %5902 = vpow2.f32 %v3427_v6  ;;  %v401_v14 = vmul.f32 0.6931472, %v5889_v9  ;;  %v2722_v9 = vmax.f32 %v2674_v62, 1e-06 }
 0x27f   : > { %v5893_v18 = vpop.eup %5892  ;;  %v1614_v19 = vadd.f32 %v5891_v13, %v1134_v10  ;;  %5904 = vpow2.f32 %v3907_v11 }
 0x280   : > { %v5895_v21 = vpop.eup %5894  ;;  %v461_v23 = vmul.f32 %v6496_v24, %v401_v14  ;;  %5906 = vlog2.f32 %v1757_v7  ;;  %v3154_v14 = vld [vmem:[%s6478_s18 + $0xa70] sm:$0xff] }
 0x281   : > { %v5897_v26 = vpop.eup %5896  ;;  %v2094_v27 = vadd.f32 %v5893_v18, %v1614_v19  ;;  %5908 = vlog2.f32 %v2237_v12 }
 0x282   : > { %v5899_v30 = vpop.eup %5898  ;;  %v545_v22 = vmul.f32 1.442695, %v461_v23  ;;  %v882_v31 = vmul.f32 0.6931472, %v5897_v26  ;;  %5910 = vlog2.f32 %v2717_v15  ;;  %v3634_v23 = vld [vmem:[%s6478_s18 + $0xa78] sm:$0xff] }
 0x283   : > { %v5901_v33 = vpop.eup %5900  ;;  %v2574_v34 = vadd.f32 %v5895_v21, %v2094_v27  ;;  %5912 = vlog2.f32 %v3197_v20 }
 0x284   : > { %v5903_v36 = vpop.eup %5902  ;;  %5914 = vpow2.f32 %v545_v22  ;;  %v941_v37 = vmul.f32 %v882_v31, %v6496_v24  ;;  %v1362_v38 = vmul.f32 0.6931472, %v5901_v33 }
 0x285   : > { %v5905_v41 = vpop.eup %5904  ;;  %v3054_v42 = vadd.f32 %v5899_v30, %v2574_v34  ;;  %5916 = vlog2.f32 %v3677_v28  ;;  %v3202_v28 = vmax.f32 %v3154_v14, 1e-06  ;;  %v3682_v34 = vmax.f32 %v3634_v23, 1e-06 }
 0x286   : > { %v5907_v45 = vpop.eup %5906  ;;  %v1025_v46 = vmul.f32 1.442695, %v941_v37  ;;  %v1421_v47 = vmul.f32 %v1362_v38, %v6496_v24  ;;  %5918 = vlog2.f32 %v321_v29 }
 0x287   : > { %v5909_v48 = vpop.eup %5908  ;;  %v3534_v49 = vadd.f32 %v5903_v36, %v3054_v42  ;;  %v1842_v50 = vmul.f32 0.6931472, %v5907_v45  ;;  %5920 = vlog2.f32 %v802_v35  ;;  %v272_v35 = vld [vmem:[%s6478_s18 + $0xa00] sm:$0xff] }
 0x288   : > { %v5911_v52 = vpop.eup %5910  ;;  %5922 = vpow2.f32 %v1025_v46  ;;  %v1505_v39 = vmul.f32 1.442695, %v1421_v47  ;;  %v2322_v53 = vmul.f32 0.6931472, %v5909_v48  ;;  %v320_v48 = vmax.f32 %v272_v35, 1e-06 }
 0x289   : > { %v5913_v55 = vpop.eup %5912  ;;  %v4014_v56 = vadd.f32 %v5905_v41, %v3534_v49  ;;  %v1901_v57 = vmul.f32 %v1842_v50, %v6496_v24  ;;  %v2802_v58 = vmul.f32 0.6931472, %v5911_v52  ;;  %5924 = vlog2.f32 %v1282_v43  ;;  %v753_v41 = vld [vmem:[%s6478_s18 + $0xa08] sm:$0xff]  ;;  %v1713_v49 = vld [vmem:[%s6478_s18 + $0xa18] sm:$0xff] }
 0x28a   : > { %v5915_v59 = vpop.eup %5914  ;;  %5926 = vpow2.f32 %v1505_v39  ;;  %v2381_v60 = vmul.f32 %v2322_v53, %v6496_v24  ;;  %v3282_v61 = vmul.f32 0.6931472, %v5913_v55  ;;  %v801_v52 = vmax.f32 %v753_v41, 1e-06 }
 0x28b   : > { %v5917_v63 = vpop.eup %5916  ;;  %4198 = vadd.xlane.f32.xlu1 %v4014_v56  ;;  %v1985_v0 = vmul.f32 1.442695, %v1901_v57  ;;  %v2861_v1 = vmul.f32 %v2802_v58, %v6496_v24  ;;  %5928 = vlog2.f32 %v1762_v51  ;;  %v1281_v55 = vmax.f32 %v1233_v44, 1e-06  ;;  %v2193_v56 = vld [vmem:[%s6478_s18 + $0xa20] sm:$0xff]  ;;  %v2673_v57 = vld [vmem:[%s6478_s18 + $0xa28] sm:$0xff] }
 0x28c   : > { %v5919_v2 = vpop.eup %5918  ;;  %v2465_v3 = vmul.f32 1.442695, %v2381_v60  ;;  %v3341_v4 = vmul.f32 %v3282_v61, %v6496_v24  ;;  %v3762_v5 = vmul.f32 0.6931472, %v5917_v63  ;;  %5930 = vlog2.f32 %v2242_v54  ;;  %v3153_v63 = vld [vmem:[%s6478_s18 + $0xa30] sm:$0xff] }
 0x28d   : > { %v5921_v6 = vpop.eup %5920  ;;  %5932 = vpow2.f32 %v1985_v0  ;;  %v2945_v7 = vmul.f32 1.442695, %v2861_v1  ;;  %v411_v8 = vmul.f32 0.6931472, %v5919_v2  ;;  %v2241_v2 = vmax.f32 %v2193_v56, 1e-06 }
 0x28e   : > { %v5923_v10 = vpop.eup %5922  ;;  %5934 = vpow2.f32 %v2465_v3  ;;  %v3425_v11 = vmul.f32 1.442695, %v3341_v4  ;;  %v3821_v12 = vmul.f32 %v3762_v5, %v6496_v24  ;;  %v892_v13 = vmul.f32 0.6931472, %v5921_v6 }
 0x28f   : > { %v5925_v15 = vpop.eup %5924  ;;  %v1133_v16 = vadd.f32 %v5923_v10, %v5915_v59  ;;  %5936 = vpow2.f32 %v2945_v7  ;;  %v466_v17 = vmul.f32 %v6496_v24, %v411_v8  ;;  %v1761_v59 = vmax.f32 %v1713_v49, 1e-06  ;;  %v3633_v8 = vld [vmem:[%s6478_s18 + $0xa38] sm:$0xff] }
 0x290   : > { %v5927_v18 = vpop.eup %5926  ;;  %5938 = vpow2.f32 %v3425_v11  ;;  %v3905_v19 = vmul.f32 1.442695, %v3821_v12  ;;  %v946_v20 = vmul.f32 %v892_v13, %v6496_v24  ;;  %v1372_v21 = vmul.f32 0.6931472, %v5925_v15  ;;  %v271_v15 = vld [vmem:[%s6478_s18 + $0x9c0] sm:$0xff] }
 0x291   : > { %v5929_v25 = vpop.eup %5928  ;;  %v1613_v26 = vadd.f32 %v5927_v18, %v1133_v16  ;;  %v555_v27 = vmul.f32 1.442695, %v466_v17  ;;  %5940 = vlog2.f32 %v2722_v9  ;;  %v2721_v3 = vmax.f32 %v2673_v57, 1e-06 }
 0x292   : > { %v5931_v29 = vpop.eup %5930  ;;  %5942 = vpow2.f32 %v3905_v19  ;;  %v1035_v30 = vmul.f32 1.442695, %v946_v20  ;;  %v1426_v22 = vmul.f32 %v1372_v21, %v6496_v24  ;;  %v1852_v31 = vmul.f32 0.6931472, %v5929_v25  ;;  %v752_v19 = vld [vmem:[%s6478_s18 + $0x9c8] sm:$0xff] }
 0x293   : > { %v5933_v32 = vpop.eup %5932  ;;  %5944 = vpow2.f32 %v555_v27  ;;  %v2332_v33 = vmul.f32 0.6931472, %v5931_v29  ;;  %v3201_v11 = vmax.f32 %v3153_v63, 1e-06  ;;  %v3681_v18 = vmax.f32 %v3633_v8, 1e-06 }
 0x294   : > { %v5935_v36 = vpop.eup %5934  ;;  %v2093_v37 = vadd.f32 %v5933_v32, %v1613_v26  ;;  %5946 = vpow2.f32 %v1035_v30  ;;  %v1515_v38 = vmul.f32 1.442695, %v1426_v22  ;;  %v1906_v40 = vmul.f32 %v1852_v31, %v6496_v24  ;;  %v2192_v63 = vld [vmem:[%s6478_s18 + $0x9e0] sm:$0xff] }
 0x295   : > { %v5937_v42 = vpop.eup %5936  ;;  %v2386_v43 = vmul.f32 %v2332_v33, %v6496_v24  ;;  %5948 = vlog2.f32 %v3202_v28  ;;  %v319_v28 = vmax.f32 %v271_v15, 1e-06  ;;  %v800_v31 = vmax.f32 %v752_v19, 1e-06  ;;  %v3152_v15 = vld [vmem:[%s6478_s18 + $0x9f0] sm:$0xff]  ;;  %v3632_v19 = vld [vmem:[%s6478_s18 + $0x9f8] sm:$0xff] }
 0x296   : > { %v5939_v45 = vpop.eup %5938  ;;  %v2573_v46 = vadd.f32 %v5935_v36, %v2093_v37  ;;  %5950 = vpow2.f32 %v1515_v38  ;;  %v1995_v47 = vmul.f32 1.442695, %v1906_v40  ;;  %v1232_v38 = vld [vmem:[%s6478_s18 + $0x9d0] sm:$0xff] }
 0x297   : > { %v5941_v50 = vpop.eup %5940  ;;  %v2475_v51 = vmul.f32 1.442695, %v2386_v43  ;;  %5952 = vlog2.f32 %v3682_v34 }
 0x298   : > { %v5943_v39 = vpop.eup %5942  ;;  %v3053_v53 = vadd.f32 %v5937_v42, %v2573_v46  ;;  %5954 = vpow2.f32 %v1995_v47  ;;  %v2812_v54 = vmul.f32 0.6931472, %v5941_v50 }
 0x299   : > { %v5945_v58 = vpop.eup %5944  ;;  %5956 = vpow2.f32 %v2475_v51  ;;  %v1280_v51 = vmax.f32 %v1232_v38, 1e-06 }
 0x29a   : > { %v5947_v60 = vpop.eup %5946  ;;  %v3533_v61 = vadd.f32 %v5939_v45, %v3053_v53  ;;  %v2866_v62 = vmul.f32 %v2812_v54, %v6496_v24  ;;  %5958 = vlog2.f32 %v320_v48 }
 0x29b   : > { %v5949_v0 = vpop.eup %5948  ;;  %v1138_v1 = vadd.f32 %v5947_v60, %v5945_v58  ;;  %5960 = vlog2.f32 %v801_v52 }
 0x29c   : > { %v5951_v4 = vpop.eup %5950  ;;  %v4013_v5 = vadd.f32 %v5943_v39, %v3533_v61  ;;  %v2955_v6 = vmul.f32 1.442695, %v2866_v62  ;;  %v3292_v7 = vmul.f32 0.6931472, %v5949_v0  ;;  %5962 = vlog2.f32 %v1281_v55  ;;  %v1712_v55 = vld [vmem:[%s6478_s18 + $0x9d8] sm:$0xff] }
 0x29d   : > { %v5953_v9 = vpop.eup %5952  ;;  %v1618_v10 = vadd.f32 %v5951_v4, %v1138_v1  ;;  %5964 = vlog2.f32 %v1761_v59 }
 0x29e   : > { %v5955_v12 = vpop.eup %5954  ;;  %4196 = vadd.xlane.f32.xlu0 %v4013_v5  ;;  %5966 = vpow2.f32 %v2955_v6  ;;  %v3346_v13 = vmul.f32 %v3292_v7, %v6496_v24  ;;  %v3772_v14 = vmul.f32 0.6931472, %v5953_v9 }
 0x29f   : > { %v5957_v16 = vpop.eup %5956  ;;  %v2098_v17 = vadd.f32 %v5955_v12, %v1618_v10  ;;  %5968 = vlog2.f32 %v2241_v2  ;;  %v2240_v10 = vmax.f32 %v2192_v63, 1e-06 }
 0x2a0   : > { %v5959_v20 = vpop.eup %5958  ;;  %v3435_v21 = vmul.f32 1.442695, %v3346_v13  ;;  %v3826_v23 = vmul.f32 %v3772_v14, %v6496_v24  ;;  %5970 = vlog2.f32 %v2721_v3  ;;  %v1760_v3 = vmax.f32 %v1712_v55, 1e-06 }
 0x2a1   : > { %v5961_v25 = vpop.eup %5960  ;;  %v2578_v26 = vadd.f32 %v5957_v16, %v2098_v17  ;;  %v409_v27 = vmul.f32 0.6931472, %v5959_v20  ;;  %5972 = vlog2.f32 %v3201_v11  ;;  %v2672_v11 = vld [vmem:[%s6478_s18 + $0x9e8] sm:$0xff] }
 0x2a2   : > { %v5963_v29 = vpop.eup %5962  ;;  %5974 = vpow2.f32 %v3435_v21  ;;  %v3915_v30 = vmul.f32 1.442695, %v3826_v23  ;;  %v890_v22 = vmul.f32 0.6931472, %v5961_v25  ;;  %v2720_v23 = vmax.f32 %v2672_v11, 1e-06 }
 0x2a3   : > { %v5965_v32 = vpop.eup %5964  ;;  %v465_v33 = vmul.f32 %v6496_v24, %v409_v27  ;;  %v1370_v34 = vmul.f32 0.6931472, %v5963_v29  ;;  %5976 = vlog2.f32 %v3681_v18  ;;  %v276_v25 = vld [vmem:[%s6478_s18 + $0xb00] sm:$0xff]  ;;  %v3200_v29 = vmax.f32 %v3152_v15, 1e-06 }
 0x2a4   : > { %v5967_v35 = vpop.eup %5966  ;;  %5978 = vpow2.f32 %v3915_v30  ;;  %v945_v36 = vmul.f32 %v890_v22, %v6496_v24  ;;  %v1850_v37 = vmul.f32 0.6931472, %v5965_v32  ;;  %v757_v32 = vld [vmem:[%s6478_s18 + $0xb08] sm:$0xff] }
 0x2a5   : > { %v5969_v40 = vpop.eup %5968  ;;  %v3058_v41 = vadd.f32 %v5967_v35, %v2578_v26  ;;  %v553_v42 = vmul.f32 1.442695, %v465_v33  ;;  %v1425_v43 = vmul.f32 %v1370_v34, %v6496_v24  ;;  %5980 = vlog2.f32 %v319_v28  ;;  %v1237_v33 = vld [vmem:[%s6478_s18 + $0xb10] sm:$0xff] }
 0x2a6   : > { %v5971_v44 = vpop.eup %5970  ;;  %v1033_v45 = vmul.f32 1.442695, %v945_v36  ;;  %v1905_v46 = vmul.f32 %v1850_v37, %v6496_v24  ;;  %v2330_v47 = vmul.f32 0.6931472, %v5969_v40  ;;  %5982 = vlog2.f32 %v800_v31  ;;  %v1717_v40 = vld [vmem:[%s6478_s18 + $0xb18] sm:$0xff] }
 0x2a7   : > { %v5973_v48 = vpop.eup %5972  ;;  %5984 = vpow2.f32 %v553_v42  ;;  %v1513_v49 = vmul.f32 1.442695, %v1425_v43  ;;  %v2810_v50 = vmul.f32 0.6931472, %v5971_v44  ;;  %v3680_v31 = vmax.f32 %v3632_v19, 1e-06 }
 0x2a8   : > { %v5975_v52 = vpop.eup %5974  ;;  %5986 = vpow2.f32 %v1033_v45  ;;  %v1993_v39 = vmul.f32 1.442695, %v1905_v46  ;;  %v2385_v53 = vmul.f32 %v2330_v47, %v6496_v24  ;;  %v3290_v54 = vmul.f32 0.6931472, %v5973_v48  ;;  %v2197_v48 = vld [vmem:[%s6478_s18 + $0xb20] sm:$0xff] }
 0x2a9   : > { %v5977_v56 = vpop.eup %5976  ;;  %v3538_v57 = vadd.f32 %v5975_v52, %v3058_v41  ;;  %5988 = vpow2.f32 %v1513_v49  ;;  %v2865_v58 = vmul.f32 %v2810_v50, %v6496_v24  ;;  %v324_v36 = vmax.f32 %v276_v25, 1e-06  ;;  %v2677_v52 = vld [vmem:[%s6478_s18 + $0xb28] sm:$0xff] }
 0x2aa   : > { %v5979_v59 = vpop.eup %5978  ;;  %5990 = vpow2.f32 %v1993_v39  ;;  %v2473_v60 = vmul.f32 1.442695, %v2385_v53  ;;  %v3345_v61 = vmul.f32 %v3290_v54, %v6496_v24  ;;  %v3770_v62 = vmul.f32 0.6931472, %v5977_v56 }
 0x2ab   : > { %v5981_v0 = vpop.eup %5980  ;;  %v4018_v1 = vadd.f32 %v5979_v59, %v3538_v57  ;;  %v2953_v2 = vmul.f32 1.442695, %v2865_v58  ;;  %5992 = vlog2.f32 %v1280_v51  ;;  %v805_v43 = vmax.f32 %v757_v32, 1e-06  ;;  %v3157_v58 = vld [vmem:[%s6478_s18 + $0xb30] sm:$0xff] }
 0x2ac   : > { %v5983_v4 = vpop.eup %5982  ;;  %5994 = vpow2.f32 %v2473_v60  ;;  %v3433_v5 = vmul.f32 1.442695, %v3345_v61  ;;  %v3825_v6 = vmul.f32 %v3770_v62, %v6496_v24  ;;  %v407_v7 = vmul.f32 0.6931472, %v5981_v0 }
 0x2ad   : > { %v5985_v8 = vpop.eup %5984  ;;  %4206 = vadd.xlane.f32.xlu2 %v4018_v1  ;;  %5996 = vpow2.f32 %v2953_v2  ;;  %v888_v9 = vmul.f32 0.6931472, %v5983_v4  ;;  %v1285_v44 = vmax.f32 %v1237_v33, 1e-06  ;;  %v1765_v51 = vmax.f32 %v1717_v40, 1e-06 }
 0x2ae   : > { %v5987_v12 = vpop.eup %5986  ;;  %5998 = vpow2.f32 %v3433_v5  ;;  %v3913_v13 = vmul.f32 1.442695, %v3825_v6  ;;  %v464_v14 = vmul.f32 %v6496_v24, %v407_v7  ;;  %v2245_v57 = vmax.f32 %v2197_v48, 1e-06  ;;  %v756_v40 = vld [vmem:[%s6478_s18 + $0xac8] sm:$0xff] }
 0x2af   : > { %v5989_v16 = vpop.eup %5988  ;;  %v1137_v17 = vadd.f32 %v5987_v12, %v5985_v8  ;;  %v944_v18 = vmul.f32 %v888_v9, %v6496_v24  ;;  %6000 = vlog2.f32 %v1760_v3  ;;  %v2725_v62 = vmax.f32 %v2677_v52, 1e-06  ;;  %v1236_v52 = vld [vmem:[%s6478_s18 + $0xad0] sm:$0xff] }
 0x2b0   : > { %v5991_v20 = vpop.eup %5990  ;;  %6002 = vpow2.f32 %v3913_v13  ;;  %v551_v21 = vmul.f32 1.442695, %v464_v14  ;;  %v3205_v6 = vmax.f32 %v3157_v58, 1e-06  ;;  %v3637_v13 = vld [vmem:[%s6478_s18 + $0xb38] sm:$0xff] }
 0x2b1   : > { %v5993_v26 = vpop.eup %5992  ;;  %v1617_v27 = vadd.f32 %v5989_v16, %v1137_v17  ;;  %v1031_v28 = vmul.f32 1.442695, %v944_v18  ;;  %6004 = vlog2.f32 %v2240_v10 }
 0x2b2   : > { %v5995_v30 = vpop.eup %5994  ;;  %6006 = vpow2.f32 %v551_v21  ;;  %v1368_v22 = vmul.f32 0.6931472, %v5993_v26 }
 0x2b3   : > { %v5997_v34 = vpop.eup %5996  ;;  %v2097_v35 = vadd.f32 %v5991_v20, %v1617_v27  ;;  %6008 = vpow2.f32 %v1031_v28  ;;  %v3685_v27 = vmax.f32 %v3637_v13, 1e-06 }
 0x2b4   : > { %v5999_v37 = vpop.eup %5998  ;;  %v1424_v38 = vmul.f32 %v1368_v22, %v6496_v24  ;;  %6010 = vlog2.f32 %v2720_v23 }
 0x2b5   : > { %v6001_v41 = vpop.eup %6000  ;;  %v2577_v42 = vadd.f32 %v5995_v30, %v2097_v35  ;;  %6012 = vlog2.f32 %v3200_v29 }
 0x2b6   : > { %v6003_v45 = vpop.eup %6002  ;;  %v1511_v46 = vmul.f32 1.442695, %v1424_v38  ;;  %v1848_v47 = vmul.f32 0.6931472, %v6001_v41  ;;  %6014 = vlog2.f32 %v3680_v31  ;;  %v275_v31 = vld [vmem:[%s6478_s18 + $0xac0] sm:$0xff] }
 0x2b7   : > { %v6005_v49 = vpop.eup %6004  ;;  %v3057_v50 = vadd.f32 %v5997_v34, %v2577_v42  ;;  %6016 = vlog2.f32 %v324_v36 }
 0x2b8   : > { %v6007_v39 = vpop.eup %6006  ;;  %6018 = vpow2.f32 %v1511_v46  ;;  %v1904_v53 = vmul.f32 %v1848_v47, %v6496_v24  ;;  %v2328_v54 = vmul.f32 0.6931472, %v6005_v49 }
 0x2b9   : > { %v6009_v55 = vpop.eup %6008  ;;  %v3537_v56 = vadd.f32 %v5999_v37, %v3057_v50  ;;  %6020 = vlog2.f32 %v805_v43 }
 0x2ba   : > { %v6011_v59 = vpop.eup %6010  ;;  %v1991_v60 = vmul.f32 1.442695, %v1904_v53  ;;  %v2384_v61 = vmul.f32 %v2328_v54, %v6496_v24  ;;  %6022 = vlog2.f32 %v1285_v44  ;;  %v1136_v1 = vadd.f32 %v6009_v55, %v6007_v39 }
 0x2bb   : > { %v6013_v63 = vpop.eup %6012  ;;  %v4017_v0 = vadd.f32 %v6003_v45, %v3537_v56  ;;  %v2808_v2 = vmul.f32 0.6931472, %v6011_v59  ;;  %6024 = vlog2.f32 %v1765_v51  ;;  %v323_v44 = vmax.f32 %v275_v31, 1e-06  ;;  %v1716_v56 = vld [vmem:[%s6478_s18 + $0xad8] sm:$0xff]  ;;  %v2196_v59 = vld [vmem:[%s6478_s18 + $0xae0] sm:$0xff] }
 0x2bc   : > { %v6015_v3 = vpop.eup %6014  ;;  %6026 = vpow2.f32 %v1991_v60  ;;  %v2471_v4 = vmul.f32 1.442695, %v2384_v61  ;;  %v3288_v5 = vmul.f32 0.6931472, %v6013_v63  ;;  %v804_v51 = vmax.f32 %v756_v40, 1e-06 }
 0x2bd   : > { %v6017_v7 = vpop.eup %6016  ;;  %4204 = vadd.xlane.f32.xlu1 %v4017_v0  ;;  %v2864_v8 = vmul.f32 %v2808_v2, %v6496_v24  ;;  %v3768_v9 = vmul.f32 0.6931472, %v6015_v3  ;;  %6028 = vlog2.f32 %v2245_v57  ;;  %v1284_v63 = vmax.f32 %v1236_v52, 1e-06  ;;  %v2676_v0 = vld [vmem:[%s6478_s18 + $0xae8] sm:$0xff]  ;;  %v1235_v31 = vld [vmem:[%s6478_s18 + $0xa90] sm:$0xff] }
 0x2be   : > { %v6019_v10 = vpop.eup %6018  ;;  %6030 = vpow2.f32 %v2471_v4  ;;  %v3344_v11 = vmul.f32 %v3288_v5, %v6496_v24  ;;  %v417_v12 = vmul.f32 0.6931472, %v6017_v7  ;;  %v1764_v3 = vmax.f32 %v1716_v56, 1e-06 }
 0x2bf   : > { %v6021_v14 = vpop.eup %6020  ;;  %v1616_v15 = vadd.f32 %v6019_v10, %v1136_v1  ;;  %v2951_v16 = vmul.f32 1.442695, %v2864_v8  ;;  %v3824_v17 = vmul.f32 %v3768_v9, %v6496_v24  ;;  %6032 = vlog2.f32 %v2725_v62  ;;  %v3156_v8 = vld [vmem:[%s6478_s18 + $0xaf0] sm:$0xff] }
 0x2c0   : > { %v6023_v18 = vpop.eup %6022  ;;  %v3431_v19 = vmul.f32 1.442695, %v3344_v11  ;;  %v469_v20 = vmul.f32 %v6496_v24, %v417_v12  ;;  %v898_v21 = vmul.f32 0.6931472, %v6021_v14  ;;  %6034 = vlog2.f32 %v3205_v6  ;;  %v3636_v12 = vld [vmem:[%s6478_s18 + $0xaf8] sm:$0xff] }
 0x2c1   : > { %v6025_v23 = vpop.eup %6024  ;;  %6036 = vpow2.f32 %v2951_v16  ;;  %v3911_v25 = vmul.f32 1.442695, %v3824_v17  ;;  %v1378_v26 = vmul.f32 0.6931472, %v6023_v18  ;;  %v2244_v7 = vmax.f32 %v2196_v59, 1e-06 }
 0x2c2   : > { %v6027_v28 = vpop.eup %6026  ;;  %6038 = vpow2.f32 %v3431_v19  ;;  %v561_v29 = vmul.f32 1.442695, %v469_v20  ;;  %v949_v30 = vmul.f32 %v898_v21, %v6496_v24  ;;  %v1858_v22 = vmul.f32 0.6931472, %v6025_v23  ;;  %v755_v19 = vld [vmem:[%s6478_s18 + $0xa88] sm:$0xff] }
 0x2c3   : > { %v6029_v32 = vpop.eup %6028  ;;  %v2096_v33 = vadd.f32 %v6027_v28, %v1616_v15  ;;  %6040 = vpow2.f32 %v3911_v25  ;;  %v1429_v34 = vmul.f32 %v1378_v26, %v6496_v24  ;;  %v2724_v11 = vmax.f32 %v2676_v0, 1e-06  ;;  %v274_v15 = vld [vmem:[%s6478_s18 + $0xa80] sm:$0xff] }
 0x2c4   : > { %v6031_v35 = vpop.eup %6030  ;;  %6042 = vpow2.f32 %v561_v29  ;;  %v1041_v36 = vmul.f32 1.442695, %v949_v30  ;;  %v1909_v37 = vmul.f32 %v1858_v22, %v6496_v24  ;;  %v2338_v38 = vmul.f32 0.6931472, %v6029_v32 }
 0x2c5   : > { %v6033_v41 = vpop.eup %6032  ;;  %v2576_v42 = vadd.f32 %v6031_v35, %v2096_v33  ;;  %v1521_v43 = vmul.f32 1.442695, %v1429_v34  ;;  %6044 = vlog2.f32 %v3685_v27  ;;  %v3204_v18 = vmax.f32 %v3156_v8, 1e-06  ;;  %v1715_v35 = vld [vmem:[%s6478_s18 + $0xa98] sm:$0xff] }
 0x2c6   : > { %v6035_v45 = vpop.eup %6034  ;;  %6046 = vpow2.f32 %v1041_v36  ;;  %v2001_v46 = vmul.f32 1.442695, %v1909_v37  ;;  %v2389_v47 = vmul.f32 %v2338_v38, %v6496_v24  ;;  %v2818_v48 = vmul.f32 0.6931472, %v6033_v41 }
 0x2c7   : > { %v6037_v49 = vpop.eup %6036  ;;  %6048 = vpow2.f32 %v1521_v43  ;;  %v3298_v50 = vmul.f32 0.6931472, %v6035_v45  ;;  %v3684_v25 = vmax.f32 %v3636_v12, 1e-06  ;;  %v322_v28 = vmax.f32 %v274_v15, 1e-06 }
 0x2c8   : > { %v6039_v39 = vpop.eup %6038  ;;  %v3056_v53 = vadd.f32 %v6037_v49, %v2576_v42  ;;  %6050 = vpow2.f32 %v2001_v46  ;;  %v2481_v54 = vmul.f32 1.442695, %v2389_v47  ;;  %v2869_v55 = vmul.f32 %v2818_v48, %v6496_v24 }
 0x2c9   : > { %v6041_v57 = vpop.eup %6040  ;;  %v3349_v58 = vmul.f32 %v3298_v50, %v6496_v24  ;;  %6052 = vlog2.f32 %v323_v44  ;;  %v803_v34 = vmax.f32 %v755_v19, 1e-06  ;;  %v1283_v43 = vmax.f32 %v1235_v31, 1e-06 }
 0x2ca   : > { %v6043_v60 = vpop.eup %6042  ;;  %v3536_v61 = vadd.f32 %v6039_v39, %v3056_v53  ;;  %6054 = vpow2.f32 %v2481_v54  ;;  %v2961_v62 = vmul.f32 1.442695, %v2869_v55  ;;  %v1763_v47 = vmax.f32 %v1715_v35, 1e-06  ;;  %v2195_v54 = vld [vmem:[%s6478_s18 + $0xaa0] sm:$0xff]  ;;  %v4129_v35 = vpop.xlane.xlu1 %4128 }
 0x2cb   : > { %v6045_v1 = vpop.eup %6044  ;;  %v3441_v2 = vmul.f32 1.442695, %v3349_v58  ;;  %6056 = vlog2.f32 %v804_v51 }
 0x2cc   : > { %v6047_v4 = vpop.eup %6046  ;;  %v4016_v5 = vadd.f32 %v6041_v57, %v3536_v61  ;;  %6058 = vpow2.f32 %v2961_v62  ;;  %v3778_v6 = vmul.f32 0.6931472, %v6045_v1 }
 0x2cd   : > { %v6049_v9 = vpop.eup %6048  ;;  %v1141_v10 = vadd.f32 %v6047_v4, %v6043_v60  ;;  %6060 = vpow2.f32 %v3441_v2  ;;  %v2243_v2 = vmax.f32 %v2195_v54, 1e-06 }
 0x2ce   : > { %v6051_v13 = vpop.eup %6050  ;;  %4202 = vadd.xlane.f32.xlu0 %v4016_v5  ;;  %v3829_v14 = vmul.f32 %v3778_v6, %v6496_v24  ;;  %6062 = vlog2.f32 %v1284_v63 }
 0x2cf   : > { %v6053_v16 = vpop.eup %6052  ;;  %v1621_v17 = vadd.f32 %v6049_v9, %v1141_v10  ;;  %6064 = vlog2.f32 %v1764_v3 }
 0x2d0   : > { %v6055_v20 = vpop.eup %6054  ;;  %v3921_v21 = vmul.f32 1.442695, %v3829_v14  ;;  %v415_v23 = vmul.f32 0.6931472, %v6053_v16  ;;  %6066 = vlog2.f32 %v2244_v7  ;;  %v2675_v7 = vld [vmem:[%s6478_s18 + $0xaa8] sm:$0xff]  ;;  %v3155_v14 = vld [vmem:[%s6478_s18 + $0xab0] sm:$0xff] }
 0x2d1   : > { %v6057_v26 = vpop.eup %6056  ;;  %v2101_v27 = vadd.f32 %v6051_v13, %v1621_v17  ;;  %6068 = vlog2.f32 %v2724_v11 }
 0x2d2   : > { %v6059_v29 = vpop.eup %6058  ;;  %6070 = vpow2.f32 %v3921_v21  ;;  %v468_v30 = vmul.f32 %v6496_v24, %v415_v23  ;;  %v896_v22 = vmul.f32 0.6931472, %v6057_v26 }
 0x2d3   : > { %v6061_v32 = vpop.eup %6060  ;;  %v2581_v33 = vadd.f32 %v6055_v20, %v2101_v27  ;;  %6072 = vlog2.f32 %v3204_v18  ;;  %v2723_v18 = vmax.f32 %v2675_v7, 1e-06  ;;  %v3203_v27 = vmax.f32 %v3155_v14, 1e-06  ;;  %v2200_v7 = vld [vmem:[%s6478_s18 + $0xbe0] sm:$0xff] }
 0x2d4   : > { %v6063_v36 = vpop.eup %6062  ;;  %v559_v37 = vmul.f32 1.442695, %v468_v30  ;;  %v948_v38 = vmul.f32 %v896_v22, %v6496_v24  ;;  %6074 = vlog2.f32 %v3684_v25 }
 0x2d5   : > { %v6065_v40 = vpop.eup %6064  ;;  %v3061_v41 = vadd.f32 %v6059_v29, %v2581_v33  ;;  %v1376_v42 = vmul.f32 0.6931472, %v6063_v36  ;;  %6076 = vlog2.f32 %v322_v28  ;;  %v3635_v28 = vld [vmem:[%s6478_s18 + $0xab8] sm:$0xff] }
 0x2d6   : > { %v6067_v44 = vpop.eup %6066  ;;  %6078 = vpow2.f32 %v559_v37  ;;  %v1039_v45 = vmul.f32 1.442695, %v948_v38  ;;  %v1856_v46 = vmul.f32 0.6931472, %v6065_v40  ;;  %v3683_v40 = vmax.f32 %v3635_v28, 1e-06 }
 0x2d7   : > { %v6069_v48 = vpop.eup %6068  ;;  %v3541_v49 = vadd.f32 %v6061_v32, %v3061_v41  ;;  %v1428_v50 = vmul.f32 %v1376_v42, %v6496_v24  ;;  %v2336_v51 = vmul.f32 0.6931472, %v6067_v44  ;;  %6080 = vlog2.f32 %v803_v34  ;;  %v4133_v32 = vpop.xlane.xlu2 %4132  ;;  %v278_v28 = vld [vmem:[%s6478_s18 + $0xb80] sm:$0xff] }
 0x2d8   : > { %v6071_v52 = vpop.eup %6070  ;;  %6082 = vpow2.f32 %v1039_v45  ;;  %v1908_v39 = vmul.f32 %v1856_v46, %v6496_v24  ;;  %v2816_v53 = vmul.f32 0.6931472, %v6069_v48  ;;  %v4125_v41 = vpop.xlane.xlu0 %4124  ;;  %v4224_v44 = vmul.f32 0.0009765625, %v4133_v32 }
 0x2d9   : > { %v6073_v55 = vpop.eup %6072  ;;  %v4021_v56 = vadd.f32 %v6071_v52, %v3541_v49  ;;  %v1519_v57 = vmul.f32 1.442695, %v1428_v50  ;;  %v2388_v58 = vmul.f32 %v2336_v51, %v6496_v24  ;;  %6084 = vlog2.f32 %v1283_v43  ;;  %v279_v49 = vld [vmem:[%s6478_s18 + $0xbc0] sm:$0xff]  ;;  %v760_v50 = vld [vmem:[%s6478_s18 + $0xbc8] sm:$0xff] }
 0x2da   : > { %v6075_v59 = vpop.eup %6074  ;;  %v1999_v60 = vmul.f32 1.442695, %v1908_v39  ;;  %v2868_v61 = vmul.f32 %v2816_v53, %v6496_v24  ;;  %v3296_v62 = vmul.f32 0.6931472, %v6073_v55  ;;  %6086 = vlog2.f32 %v1763_v47  ;;  %v1240_v55 = vld [vmem:[%s6478_s18 + $0xbd0] sm:$0xff] }
 0x2db   : > { %v6077_v63 = vpop.eup %6076  ;;  %4212 = vadd.xlane.f32.xlu2 %v4021_v56  ;;  %6088 = vpow2.f32 %v1519_v57  ;;  %v2479_v0 = vmul.f32 1.442695, %v2388_v58  ;;  %v3776_v1 = vmul.f32 0.6931472, %v6075_v59  ;;  %v4222_v48 = vmul.f32 0.0009765625, %v4129_v35 }
 0x2dc   : > { %v6079_v3 = vpop.eup %6078  ;;  %6090 = vpow2.f32 %v1999_v60  ;;  %v2959_v4 = vmul.f32 1.442695, %v2868_v61  ;;  %v3348_v5 = vmul.f32 %v3296_v62, %v6496_v24  ;;  %v413_v6 = vmul.f32 0.6931472, %v6077_v63  ;;  %v1720_v63 = vld [vmem:[%s6478_s18 + $0xbd8] sm:$0xff] }
 0x2dd   : > { %v6081_v8 = vpop.eup %6080  ;;  %6092 = vpow2.f32 %v2479_v0  ;;  %v3828_v9 = vmul.f32 %v3776_v1, %v6496_v24  ;;  %v4220_v52 = vmul.f32 0.0009765625, %v4125_v41  ;;  %v327_v57 = vmax.f32 %v279_v49, 1e-06 }
 0x2de   : > { %v6083_v10 = vpop.eup %6082  ;;  %6094 = vpow2.f32 %v2959_v4  ;;  %v3439_v11 = vmul.f32 1.442695, %v3348_v5  ;;  %v467_v12 = vmul.f32 %v6496_v24, %v413_v6  ;;  %v894_v13 = vmul.f32 0.6931472, %v6081_v8 }
 0x2df   : > { %v6085_v15 = vpop.eup %6084  ;;  %v1140_v16 = vadd.f32 %v6083_v10, %v6079_v3  ;;  %v3919_v17 = vmul.f32 1.442695, %v3828_v9  ;;  %6096 = vlog2.f32 %v2243_v2  ;;  %v808_v58 = vmax.f32 %v760_v50, 1e-06 }
 0x2e0   : > { %v6087_v19 = vpop.eup %6086  ;;  %6098 = vpow2.f32 %v3439_v11  ;;  %v557_v20 = vmul.f32 1.442695, %v467_v12  ;;  %v947_v21 = vmul.f32 %v894_v13, %v6496_v24  ;;  %v1374_v23 = vmul.f32 0.6931472, %v6085_v15  ;;  %v2680_v11 = vld [vmem:[%s6478_s18 + $0xbe8] sm:$0xff] }
 0x2e1   : > { %v6089_v25 = vpop.eup %6088  ;;  %6100 = vpow2.f32 %v3919_v17  ;;  %v1854_v26 = vmul.f32 0.6931472, %v6087_v19  ;;  %v1288_v2 = vmax.f32 %v1240_v55, 1e-06  ;;  %v1768_v10 = vmax.f32 %v1720_v63, 1e-06 }
 0x2e2   : > { %v6091_v29 = vpop.eup %6090  ;;  %v1620_v30 = vadd.f32 %v6089_v25, %v1140_v16  ;;  %6102 = vpow2.f32 %v557_v20  ;;  %v1037_v22 = vmul.f32 1.442695, %v947_v21  ;;  %v1427_v31 = vmul.f32 %v1374_v23, %v6496_v24  ;;  %v3160_v19 = vld [vmem:[%s6478_s18 + $0xbf0] sm:$0xff]  ;;  %v3640_v25 = vld [vmem:[%s6478_s18 + $0xbf8] sm:$0xff] }
 0x2e3   : > { %v6093_v33 = vpop.eup %6092  ;;  %v1907_v34 = vmul.f32 %v1854_v26, %v6496_v24  ;;  %6104 = vlog2.f32 %v2723_v18  ;;  %v2248_v18 = vmax.f32 %v2200_v7, 1e-06  ;;  %v2728_v23 = vmax.f32 %v2680_v11, 1e-06 }
 0x2e4   : > { %v6095_v36 = vpop.eup %6094  ;;  %v2100_v37 = vadd.f32 %v6091_v29, %v1620_v30  ;;  %6106 = vpow2.f32 %v1037_v22  ;;  %v1517_v38 = vmul.f32 1.442695, %v1427_v31  ;;  %v3208_v30 = vmax.f32 %v3160_v19, 1e-06  ;;  %v759_v22 = vld [vmem:[%s6478_s18 + $0xb88] sm:$0xff] }
 0x2e5   : > { %v6097_v42 = vpop.eup %6096  ;;  %v1997_v43 = vmul.f32 1.442695, %v1907_v34  ;;  %6108 = vlog2.f32 %v3203_v27  ;;  %v3688_v34 = vmax.f32 %v3640_v25, 1e-06  ;;  %v807_v41 = vmax.f32 %v759_v22, 1e-06 }
 0x2e6   : > { %v6099_v45 = vpop.eup %6098  ;;  %v2580_v46 = vadd.f32 %v6093_v33, %v2100_v37  ;;  %6110 = vpow2.f32 %v1517_v38  ;;  %v2334_v47 = vmul.f32 0.6931472, %v6097_v42  ;;  %v326_v37 = vmax.f32 %v278_v28, 1e-06 }
 0x2e7   : > { %v6101_v51 = vpop.eup %6100  ;;  %6112 = vpow2.f32 %v1997_v43 }
 0x2e8   : > { %v6103_v39 = vpop.eup %6102  ;;  %v3060_v53 = vadd.f32 %v6095_v36, %v2580_v46  ;;  %v2387_v54 = vmul.f32 %v2334_v47, %v6496_v24  ;;  %6114 = vlog2.f32 %v3683_v40 }
 0x2e9   : > { %v6105_v56 = vpop.eup %6104  ;;  %6116 = vlog2.f32 %v4224_v44 }
 0x2ea   : > { %v6107_v59 = vpop.eup %6106  ;;  %v3540_v60 = vadd.f32 %v6099_v45, %v3060_v53  ;;  %v2477_v61 = vmul.f32 1.442695, %v2387_v54  ;;  %v2814_v62 = vmul.f32 0.6931472, %v6105_v56  ;;  %6118 = vlog2.f32 %v4222_v48  ;;  %v1239_v45 = vld [vmem:[%s6478_s18 + $0xb90] sm:$0xff] }
 0x2eb   : > { %v6109_v0 = vpop.eup %6108  ;;  %v1139_v1 = vadd.f32 %v6107_v59, %v6103_v39  ;;  %6120 = vlog2.f32 %v4220_v52  ;;  %v1719_v39 = vld [vmem:[%s6478_s18 + $0xb98] sm:$0xff]  ;;  %v1287_v56 = vmax.f32 %v1239_v45, 1e-06 }
 0x2ec   : > { %v6111_v3 = vpop.eup %6110  ;;  %v4020_v4 = vadd.f32 %v6101_v51, %v3540_v60  ;;  %6122 = vpow2.f32 %v2477_v61  ;;  %v2867_v5 = vmul.f32 %v2814_v62, %v6496_v24  ;;  %v3294_v6 = vmul.f32 0.6931472, %v6109_v0  ;;  %v2199_v0 = vld [vmem:[%s6478_s18 + $0xba0] sm:$0xff] }
 0x2ed   : > { %v6113_v8 = vpop.eup %6112  ;;  %v1619_v9 = vadd.f32 %v6111_v3, %v1139_v1  ;;  %6124 = vlog2.f32 %v327_v57  ;;  %v1767_v63 = vmax.f32 %v1719_v39, 1e-06  ;;  %v2247_v11 = vmax.f32 %v2199_v0, 1e-06  ;;  %v2198_v0 = vld [vmem:[%s6478_s18 + $0xb60] sm:$0xff] }
 0x2ee   : > { %v6115_v12 = vpop.eup %6114  ;;  %4210 = vadd.xlane.f32.xlu1 %v4020_v4  ;;  %v2957_v13 = vmul.f32 1.442695, %v2867_v5  ;;  %v3347_v14 = vmul.f32 %v3294_v6, %v6496_v24  ;;  %6126 = vlog2.f32 %v808_v58 }
 0x2ef   : > { %v7238_v15 = vpop.eup %6116  ;;  %v2099_v16 = vadd.f32 %v6113_v8, %v1619_v9  ;;  %v3774_v17 = vmul.f32 0.6931472, %v6115_v12  ;;  %6128 = vlog2.f32 %v1288_v2 }
 0x2f0   : > { %v7241_v20 = vpop.eup %6118  ;;  %6130 = vpow2.f32 %v2957_v13  ;;  %v3437_v21 = vmul.f32 1.442695, %v3347_v14 }
 0x2f1   : > { %v7244_v26 = vpop.eup %6120  ;;  %v3827_v27 = vmul.f32 %v3774_v17, %v6496_v24  ;;  %6132 = vlog2.f32 %v1768_v10 }
 0x2f2   : > { %v6123_v29 = vpop.eup %6122  ;;  %6134 = vpow2.f32 %v3437_v21  ;;  %v2679_v21 = vld [vmem:[%s6478_s18 + $0xba8] sm:$0xff] }
 0x2f3   : > { %v6125_v31 = vpop.eup %6124  ;;  %v2579_v32 = vadd.f32 %v6123_v29, %v2099_v16  ;;  %v3917_v33 = vmul.f32 1.442695, %v3827_v27  ;;  %6136 = vlog2.f32 %v2248_v18 }
 0x2f4   : > { %v6127_v35 = vpop.eup %6126  ;;  %v423_v36 = vmul.f32 0.6931472, %v6125_v31  ;;  %6138 = vlog2.f32 %v2728_v23  ;;  %v3159_v23 = vld [vmem:[%s6478_s18 + $0xbb0] sm:$0xff] }
 0x2f5   : > { %v6129_v38 = vpop.eup %6128  ;;  %6140 = vpow2.f32 %v3917_v33  ;;  %v904_v40 = vmul.f32 0.6931472, %v6127_v35  ;;  %v2727_v35 = vmax.f32 %v2679_v21, 1e-06 }
 0x2f6   : > { %v6131_v42 = vpop.eup %6130  ;;  %v472_v43 = vmul.f32 %v6496_v24, %v423_v36  ;;  %v1384_v44 = vmul.f32 0.6931472, %v6129_v38  ;;  %6142 = vlog2.f32 %v3208_v30  ;;  %v3207_v36 = vmax.f32 %v3159_v23, 1e-06  ;;  %v4135_v23 = vpop.xlane.xlu2 %4134 }
 0x2f7   : > { %v6133_v46 = vpop.eup %6132  ;;  %v3059_v47 = vadd.f32 %v6131_v42, %v2579_v32  ;;  %v952_v48 = vmul.f32 %v904_v40, %v6496_v24  ;;  %6144 = vlog2.f32 %v3688_v34  ;;  %v3639_v32 = vld [vmem:[%s6478_s18 + $0xbb8] sm:$0xff]  ;;  %v277_v42 = vld [vmem:[%s6478_s18 + $0xb40] sm:$0xff] }
 0x2f8   : > { %v6135_v49 = vpop.eup %6134  ;;  %v567_v50 = vmul.f32 1.442695, %v472_v43  ;;  %v1432_v51 = vmul.f32 %v1384_v44, %v6496_v24  ;;  %v1864_v52 = vmul.f32 0.6931472, %v6133_v46  ;;  %6146 = vlog2.f32 %v326_v37 }
 0x2f9   : > { %v6137_v53 = vpop.eup %6136  ;;  %v3539_v54 = vadd.f32 %v6135_v49, %v3059_v47  ;;  %v1047_v55 = vmul.f32 1.442695, %v952_v48  ;;  %6148 = vlog2.f32 %v807_v41  ;;  %v3687_v44 = vmax.f32 %v3639_v32, 1e-06  ;;  %v758_v49 = vld [vmem:[%s6478_s18 + $0xb48] sm:$0xff] }
 0x2fa   : > { %v6139_v57 = vpop.eup %6138  ;;  %6150 = vpow2.f32 %v567_v50  ;;  %v1527_v58 = vmul.f32 1.442695, %v1432_v51  ;;  %v1912_v59 = vmul.f32 %v1864_v52, %v6496_v24  ;;  %v2344_v60 = vmul.f32 0.6931472, %v6137_v53  ;;  %v1238_v52 = vld [vmem:[%s6478_s18 + $0xb50] sm:$0xff] }
 0x2fb   : > { %v6141_v61 = vpop.eup %6140  ;;  %6152 = vpow2.f32 %v1047_v55  ;;  %v2824_v62 = vmul.f32 0.6931472, %v6139_v57  ;;  %v325_v51 = vmax.f32 %v277_v42, 1e-06 }
 0x2fc   : > { %v6143_v1 = vpop.eup %6142  ;;  %v4019_v2 = vadd.f32 %v6141_v61, %v3539_v54  ;;  %6154 = vpow2.f32 %v1527_v58  ;;  %v2007_v3 = vmul.f32 1.442695, %v1912_v59  ;;  %v2392_v4 = vmul.f32 %v2344_v60, %v6496_v24  ;;  %v1718_v59 = vld [vmem:[%s6478_s18 + $0xb58] sm:$0xff] }
 0x2fd   : > { %v6145_v5 = vpop.eup %6144  ;;  %v2872_v6 = vmul.f32 %v2824_v62, %v6496_v24  ;;  %v3304_v7 = vmul.f32 0.6931472, %v6143_v1  ;;  %6156 = vlog2.f32 %v1287_v56  ;;  %v806_v58 = vmax.f32 %v758_v49, 1e-06 }
 0x2fe   : > { %v6147_v8 = vpop.eup %6146  ;;  %4208 = vadd.xlane.f32.xlu0 %v4019_v2  ;;  %6158 = vpow2.f32 %v2007_v3  ;;  %v2487_v9 = vmul.f32 1.442695, %v2392_v4  ;;  %v3784_v10 = vmul.f32 0.6931472, %v6145_v5  ;;  %v2678_v3 = vld [vmem:[%s6478_s18 + $0xb68] sm:$0xff]  ;;  %v7287_v49 = vstv %s4657_s20 }
 0x2ff   : > { %v6149_v12 = vpop.eup %6148  ;;  %v2967_v13 = vmul.f32 1.442695, %v2872_v6  ;;  %v3352_v14 = vmul.f32 %v3304_v7, %v6496_v24  ;;  %v421_v16 = vmul.f32 0.6931472, %v6147_v8  ;;  %6160 = vlog2.f32 %v1767_v63  ;;  %v3158_v7 = vld [vmem:[%s6478_s18 + $0xb70] sm:$0xff] }
 0x300   : > { %v6151_v17 = vpop.eup %6150  ;;  %6162 = vpow2.f32 %v2487_v9  ;;  %v3832_v18 = vmul.f32 %v3784_v10, %v6496_v24  ;;  %v902_v19 = vmul.f32 0.6931472, %v6149_v12  ;;  %v1286_v63 = vmax.f32 %v1238_v52, 1e-06 }
 0x301   : > { %v6153_v25 = vpop.eup %6152  ;;  %6164 = vpow2.f32 %v2967_v13  ;;  %v3447_v27 = vmul.f32 1.442695, %v3352_v14  ;;  %v471_v28 = vmul.f32 %v6496_v24, %v421_v16  ;;  %v1766_v6 = vmax.f32 %v1718_v59, 1e-06 }
 0x302   : > { %v6155_v29 = vpop.eup %6154  ;;  %v1144_v30 = vadd.f32 %v6153_v25, %v6151_v17  ;;  %v3927_v22 = vmul.f32 1.442695, %v3832_v18  ;;  %v951_v31 = vmul.f32 %v902_v19, %v6496_v24  ;;  %6166 = vlog2.f32 %v2247_v11 }
 0x303   : > { %v6157_v33 = vpop.eup %6156  ;;  %6168 = vpow2.f32 %v3447_v27  ;;  %v565_v34 = vmul.f32 1.442695, %v471_v28  ;;  %v2246_v11 = vmax.f32 %v2198_v0, 1e-06  ;;  %v2726_v16 = vmax.f32 %v2678_v3, 1e-06 }
 0x304   : > { %v6159_v37 = vpop.eup %6158  ;;  %v1624_v38 = vadd.f32 %v6155_v29, %v1144_v30  ;;  %6170 = vpow2.f32 %v3927_v22  ;;  %v1045_v40 = vmul.f32 1.442695, %v951_v31  ;;  %v1382_v41 = vmul.f32 0.6931472, %v6157_v33  ;;  %v3638_v30 = vld [vmem:[%s6478_s18 + $0xb78] sm:$0xff]  ;;  %v4131_v22 = vpop.xlane.xlu1 %4130 }
 0x305   : > { %v6161_v43 = vpop.eup %6160  ;;  %6172 = vpow2.f32 %v565_v34  ;;  %v7276_v18 = vmul.f32 0.6931472, %v7238_v15  ;;  %v3206_v21 = vmax.f32 %v3158_v7, 1e-06  ;;  %v4273_v27 = vmul.f32 0.6931472, %v7241_v20  ;;  %v7281_v31 = vpop.xlane.xlu0 %4126 }
 0x306   : > { %v6163_v45 = vpop.eup %6162  ;;  %v2104_v46 = vadd.f32 %v6159_v37, %v1624_v38  ;;  %6174 = vpow2.f32 %v1045_v40  ;;  %v1431_v47 = vmul.f32 %v1382_v41, %v6496_v24  ;;  %v1862_v48 = vmul.f32 0.6931472, %v6161_v43 }
 0x307   : > { %v6165_v50 = vpop.eup %6164  ;;  %6176 = vlog2.f32 %v2727_v35  ;;  %v4269_v15 = vmul.f32 0.6931472, %v7244_v26  ;;  %v3686_v42 = vmax.f32 %v3638_v30, 1e-06 }
 0x308   : > { %v6167_v39 = vpop.eup %6166  ;;  %v2584_v53 = vadd.f32 %v6163_v45, %v2104_v46  ;;  %v1525_v54 = vmul.f32 1.442695, %v1431_v47  ;;  %v1911_v55 = vmul.f32 %v1862_v48, %v6496_v24  ;;  %6178 = vlog2.f32 %v3207_v36 }
 0x309   : > { %v6169_v56 = vpop.eup %6168  ;;  %v2342_v57 = vmul.f32 0.6931472, %v6167_v39  ;;  %6180 = vlog2.f32 %v3687_v44  ;;  %v4225_v48 = vmul.f32 0.0009765625, %v4135_v23  ;;  %v4223_v39 = vmul.f32 0.0009765625, %v4131_v22 }
 0x30a   : > { %v6171_v60 = vpop.eup %6170  ;;  %v3064_v61 = vadd.f32 %v6165_v50, %v2584_v53  ;;  %6182 = vpow2.f32 %v1525_v54  ;;  %v2005_v62 = vmul.f32 1.442695, %v1911_v55  ;;  %v4385_v23 = vmul.f32 %v7287_v49, %v7276_v18 }
 0x30b   : > { %v6173_v1 = vpop.eup %6172  ;;  %v2391_v2 = vmul.f32 %v2342_v57, %v6496_v24  ;;  %6184 = vlog2.f32 %v325_v51  ;;  %v4141_v57 = vpop.xlane.xlu2 %4140 }
 0x30c   : > { %v6175_v4 = vpop.eup %6174  ;;  %v3544_v5 = vadd.f32 %v6169_v56, %v3064_v61  ;;  %6186 = vpow2.f32 %v2005_v62  ;;  %v4381_v61 = vmul.f32 %v7287_v49, %v4269_v15  ;;  %v4437_v18 = vmul.f32 1.442695, %v4385_v23 }
 0x30d   : > { %v6177_v8 = vpop.eup %6176  ;;  %v1143_v9 = vadd.f32 %v6175_v4, %v6173_v1  ;;  %v2485_v10 = vmul.f32 1.442695, %v2391_v2  ;;  %6188 = vlog2.f32 %v806_v58  ;;  %v4137_v7 = vpop.xlane.xlu0 %4136 }
 0x30e   : > { %v6179_v12 = vpop.eup %6178  ;;  %v4024_v13 = vadd.f32 %v6171_v60, %v3544_v5  ;;  %v2822_v14 = vmul.f32 0.6931472, %v6177_v8  ;;  %6190 = vlog2.f32 %v1286_v63  ;;  %v4383_v5 = vmul.f32 %v7287_v49, %v4273_v27 }
 0x30f   : > { %v6181_v17 = vpop.eup %6180  ;;  %6192 = vpow2.f32 %v2485_v10  ;;  %v3302_v19 = vmul.f32 0.6931472, %v6179_v12 }
 0x310   : > { %v6183_v25 = vpop.eup %6182  ;;  %4218 = vadd.xlane.f32.xlu2 %v4024_v13  ;;  %v2871_v28 = vmul.f32 %v2822_v14, %v6496_v24  ;;  %v3782_v29 = vmul.f32 0.6931472, %v6181_v17  ;;  %6194 = vlog2.f32 %v1766_v6  ;;  %v4139_v6 = vpop.xlane.xlu1 %4138 }
 0x311   : > { %v6185_v32 = vpop.eup %6184  ;;  %v1623_v33 = vadd.f32 %v6183_v25, %v1143_v9  ;;  %v3351_v34 = vmul.f32 %v3302_v19, %v6496_v24  ;;  %6196 = vlog2.f32 %v2246_v11 }
 0x312   : > { %v6187_v35 = vpop.eup %6186  ;;  %v2965_v36 = vmul.f32 1.442695, %v2871_v28  ;;  %v3831_v20 = vmul.f32 %v3782_v29, %v6496_v24  ;;  %v419_v37 = vmul.f32 0.6931472, %v6185_v32  ;;  %6198 = vlog2.f32 %v2726_v16 }
 0x313   : > { %v6189_v38 = vpop.eup %6188  ;;  %v2103_v40 = vadd.f32 %v6187_v35, %v1623_v33  ;;  %v3445_v41 = vmul.f32 1.442695, %v3351_v34  ;;  %6200 = vlog2.f32 %v3206_v21  ;;  %v4221_v16 = vmul.f32 0.0009765625, %v7281_v31  ;;  %v4147_v15 = vpop.xlane.xlu2 %4146 }
 0x314   : > { %v6191_v43 = vpop.eup %6190  ;;  %6202 = vpow2.f32 %v2965_v36  ;;  %v3925_v44 = vmul.f32 1.442695, %v3831_v20  ;;  %v470_v26 = vmul.f32 %v6496_v24, %v419_v37  ;;  %v900_v45 = vmul.f32 0.6931472, %v6189_v38 }
 0x315   : > { %v6193_v46 = vpop.eup %6192  ;;  %6204 = vpow2.f32 %v3445_v41  ;;  %v1380_v47 = vmul.f32 0.6931472, %v6191_v43  ;;  %v4429_v29 = vmul.f32 1.442695, %v4381_v61  ;;  %v4433_v32 = vmul.f32 1.442695, %v4383_v5  ;;  %v4143_v41 = vpop.xlane.xlu0 %4142 }
 0x316   : > { %v6195_v50 = vpop.eup %6194  ;;  %6206 = vpow2.f32 %v3925_v44  ;;  %v563_v51 = vmul.f32 1.442695, %v470_v26  ;;  %v950_v52 = vmul.f32 %v900_v45, %v6496_v24  ;;  %v2583_v54 = vadd.f32 %v6193_v46, %v2103_v40 }
 0x317   : > { %v6197_v53 = vpop.eup %6196  ;;  %v1430_v55 = vmul.f32 %v1380_v47, %v6496_v24  ;;  %v1860_v56 = vmul.f32 0.6931472, %v6195_v50  ;;  %6208 = vlog2.f32 %v3686_v42  ;;  %v4227_v46 = vmul.f32 0.0009765625, %v4139_v6 }
 0x318   : > { %v6199_v58 = vpop.eup %6198  ;;  %6210 = vpow2.f32 %v563_v51  ;;  %v1043_v59 = vmul.f32 1.442695, %v950_v52  ;;  %v2340_v60 = vmul.f32 0.6931472, %v6197_v53  ;;  %v4145_v40 = vpop.xlane.xlu1 %4144  ;;  %v4226_v52 = vmul.f32 0.0009765625, %v4137_v7 }
 0x319   : > { %v6201_v62 = vpop.eup %6200  ;;  %v1523_v63 = vmul.f32 1.442695, %v1430_v55  ;;  %v1910_v0 = vmul.f32 %v1860_v56, %v6496_v24  ;;  %v2820_v1 = vmul.f32 0.6931472, %v6199_v58  ;;  %6212 = vlog2.f32 %v4225_v48 }
 0x31a   : > { %v6203_v2 = vpop.eup %6202  ;;  %6214 = vpow2.f32 %v1043_v59  ;;  %v2390_v3 = vmul.f32 %v2340_v60, %v6496_v24  ;;  %v3300_v4 = vmul.f32 0.6931472, %v6201_v62  ;;  %v4231_v55 = vmul.f32 0.0009765625, %v4147_v15 }
 0x31b   : > { %v6205_v8 = vpop.eup %6204  ;;  %v3063_v9 = vadd.f32 %v6203_v2, %v2583_v54  ;;  %6216 = vpow2.f32 %v1523_v63  ;;  %v2003_v10 = vmul.f32 1.442695, %v1910_v0  ;;  %v2870_v11 = vmul.f32 %v2820_v1, %v6496_v24  ;;  %v4153_v56 = vpop.xlane.xlu2 %4152 }
 0x31c   : > { %v6207_v12 = vpop.eup %6206  ;;  %v2483_v13 = vmul.f32 1.442695, %v2390_v3  ;;  %v3350_v14 = vmul.f32 %v3300_v4, %v6496_v24  ;;  %6218 = vlog2.f32 %v4223_v39  ;;  %v4230_v59 = vmul.f32 0.0009765625, %v4145_v40 }
 0x31d   : > { %v6209_v17 = vpop.eup %6208  ;;  %v3543_v19 = vadd.f32 %v6205_v8, %v3063_v9  ;;  %6220 = vpow2.f32 %v2003_v10  ;;  %v2963_v21 = vmul.f32 1.442695, %v2870_v11  ;;  %v4229_v62 = vmul.f32 0.0009765625, %v4143_v41  ;;  %v4149_v2 = vpop.xlane.xlu0 %4148 }
 0x31e   : > { %v6211_v25 = vpop.eup %6210  ;;  %6222 = vpow2.f32 %v2483_v13  ;;  %v3443_v27 = vmul.f32 1.442695, %v3350_v14  ;;  %v3780_v28 = vmul.f32 0.6931472, %v6209_v17  ;;  %v4234_v5 = vmul.f32 0.0009765625, %v4153_v56 }
 0x31f   : > { %v6213_v30 = vpop.eup %6212  ;;  %v4023_v22 = vadd.f32 %v6207_v12, %v3543_v19  ;;  %6224 = vpow2.f32 %v2963_v21  ;;  %v4232_v11 = vmul.f32 0.0009765625, %v4149_v2 }
 0x320   : > { %v6215_v33 = vpop.eup %6214  ;;  %6226 = vpow2.f32 %v3443_v27  ;;  %v3830_v31 = vmul.f32 %v3780_v28, %v6496_v24  ;;  %v4279_v34 = vmul.f32 0.6931472, %v6213_v30  ;;  %v4228_v24 = vmul.f32 0.0009765625, %v4141_v57  ;;  %v4151_v1 = vpop.xlane.xlu1 %4150 }
 0x321   : > { %v6217_v35 = vpop.eup %6216  ;;  %4216 = vadd.xlane.f32.xlu1 %v4023_v22  ;;  %v1142_v36 = vadd.f32 %v6215_v33, %v6211_v25  ;;  %6228 = vlog2.f32 %v4221_v16  ;;  %v4233_v8 = vmul.f32 0.0009765625, %v4151_v1 }
 0x322   : > { %v6219_v20 = vpop.eup %6218  ;;  %v3923_v37 = vmul.f32 1.442695, %v3830_v31  ;;  %v4386_v38 = vmul.f32 %v7287_v49, %v4279_v34  ;;  %6230 = vpow2.f32 %v4429_v29 }
 0x323   : > { %v6221_v42 = vpop.eup %6220  ;;  %v1622_v43 = vadd.f32 %v6217_v35, %v1142_v36  ;;  %v4275_v44 = vmul.f32 0.6931472, %v6219_v20  ;;  %6232 = vpow2.f32 %v4433_v32  ;;  %v4159_v17 = vpop.xlane.xlu2 %4158 }
 0x324   : > { %v6223_v26 = vpop.eup %6222  ;;  %6234 = vpow2.f32 %v3923_v37  ;;  %v4439_v45 = vmul.f32 1.442695, %v4386_v38  ;;  %v4237_v23 = vmul.f32 0.0009765625, %v4159_v17 }
 0x325   : > { %v6225_v47 = vpop.eup %6224  ;;  %v2102_v48 = vadd.f32 %v6221_v42, %v1622_v43  ;;  %v4384_v50 = vmul.f32 %v7287_v49, %v4275_v44  ;;  %6236 = vpow2.f32 %v4437_v18  ;;  %v4155_v15 = vpop.xlane.xlu0 %4154 }
 0x326   : > { %v6227_v51 = vpop.eup %6226  ;;  %6238 = vpow2.f32 %v4439_v45 }
 0x327   : > { %v6229_v39 = vpop.eup %6228  ;;  %v2582_v53 = vadd.f32 %v6223_v26, %v2102_v48  ;;  %v4435_v54 = vmul.f32 1.442695, %v4384_v50  ;;  %6240 = vlog2.f32 %v4228_v24 }
 0x328   : > { %v6231_v57 = vpop.eup %6230  ;;  %v4271_v58 = vmul.f32 0.6931472, %v6229_v39  ;;  %6242 = vlog2.f32 %v4227_v46  ;;  %v4157_v32 = vpop.xlane.xlu1 %4156 }
 0x329   : > { %v6233_v60 = vpop.eup %6232  ;;  %v3062_v61 = vadd.f32 %v6225_v47, %v2582_v53  ;;  %6244 = vpow2.f32 %v4435_v54  ;;  %4526 = vst.msk [vmem:[%s7307_s24] sm:$0xff] %vm4525_vm4, %v6231_v57  ;;  %v4236_v36 = vmul.f32 0.0009765625, %v4157_v32  ;;  %v4235_v47 = vmul.f32 0.0009765625, %v4155_v15 }
 0x32a   : > { %v6235_v63 = vpop.eup %6234  ;;  %v4382_v0 = vmul.f32 %v7287_v49, %v4271_v58  ;;  %4528 = vst.msk [vmem:[%s7307_s24 + $0x10] sm:$0xff] %vm4525_vm4, %v6233_v60  ;;  %6246 = vlog2.f32 %v4226_v52 }
 0x32b   : > { %v6237_v3 = vpop.eup %6236  ;;  %v3542_v4 = vadd.f32 %v6227_v51, %v3062_v61  ;;  %6248 = vlog2.f32 %v4231_v55  ;;  %v4165_v48 = vpop.xlane.xlu2 %4164 }
 0x32c   : > { %v6239_v6 = vpop.eup %6238  ;;  %v4431_v7 = vmul.f32 1.442695, %v4382_v0  ;;  %4530 = vst.msk [vmem:[%s7307_s24 + $0x20] sm:$0xff] %vm4525_vm4, %v6237_v3  ;;  %6250 = vlog2.f32 %v4230_v59  ;;  %v4240_v1 = vmul.f32 0.0009765625, %v4165_v48 }
 0x32d   : > { %v6241_v9 = vpop.eup %6240  ;;  %v4022_v10 = vadd.f32 %v6235_v63, %v3542_v4  ;;  %4531 = vst.msk [vmem:[%s7307_s24 + $0x28] sm:$0xff] %vm4525_vm4, %v6239_v6  ;;  %6252 = vlog2.f32 %v4229_v62  ;;  %v4161_v59 = vpop.xlane.xlu0 %4160 }
 0x32e   : > { %v6243_v12 = vpop.eup %6242  ;;  %6254 = vpow2.f32 %v4431_v7  ;;  %v4285_v13 = vmul.f32 0.6931472, %v6241_v9  ;;  %v4238_v7 = vmul.f32 0.0009765625, %v4161_v59 }
 0x32f   : > { %v6245_v14 = vpop.eup %6244  ;;  %4214 = vadd.xlane.f32.xlu0 %v4022_v10  ;;  %v4283_v16 = vmul.f32 0.6931472, %v6243_v12  ;;  %6256 = vlog2.f32 %v4234_v5 }
 0x330   : > { %v6247_v19 = vpop.eup %6246  ;;  %4529 = vst.msk [vmem:[%s7307_s24 + $0x18] sm:$0xff] %vm4525_vm4, %v6245_v14  ;;  %v4389_v21 = vmul.f32 %v7287_v49, %v4285_v13  ;;  %6258 = vlog2.f32 %v4233_v8  ;;  %v4163_v58 = vpop.xlane.xlu1 %4162 }
 0x331   : > { %v6249_v25 = vpop.eup %6248  ;;  %v4388_v27 = vmul.f32 %v7287_v49, %v4283_v16  ;;  %v4281_v28 = vmul.f32 0.6931472, %v6247_v19  ;;  %6260 = vlog2.f32 %v4232_v11  ;;  %v4239_v5 = vmul.f32 0.0009765625, %v4163_v58 }
 0x332   : > { %v6251_v29 = vpop.eup %6250  ;;  %v4445_v30 = vmul.f32 1.442695, %v4389_v21  ;;  %v4291_v22 = vmul.f32 0.6931472, %v6249_v25  ;;  %6262 = vlog2.f32 %v4237_v23 }
 0x333   : > { %v6253_v33 = vpop.eup %6252  ;;  %v4443_v31 = vmul.f32 1.442695, %v4388_v27  ;;  %v4387_v34 = vmul.f32 %v7287_v49, %v4281_v28  ;;  %v4289_v35 = vmul.f32 0.6931472, %v6251_v29  ;;  %v4171_v10 = vpop.xlane.xlu2 %4170 }
 0x334   : > { %v6255_v18 = vpop.eup %6254  ;;  %6264 = vpow2.f32 %v4445_v30  ;;  %v4392_v20 = vmul.f32 %v7287_v49, %v4291_v22  ;;  %v4287_v37 = vmul.f32 0.6931472, %v6253_v33  ;;  %v4243_v12 = vmul.f32 0.0009765625, %v4171_v10 }
 0x335   : > { %v6257_v38 = vpop.eup %6256  ;;  %4527 = vst.msk [vmem:[%s7307_s24 + $0x8] sm:$0xff] %vm4525_vm4, %v6255_v18  ;;  %6266 = vpow2.f32 %v4443_v31  ;;  %v4441_v40 = vmul.f32 1.442695, %v4387_v34  ;;  %v4391_v41 = vmul.f32 %v7287_v49, %v4289_v35  ;;  %v4167_v21 = vpop.xlane.xlu0 %4166 }
 0x336   : > { %v6259_v42 = vpop.eup %6258  ;;  %v4451_v43 = vmul.f32 1.442695, %v4392_v20  ;;  %v4390_v44 = vmul.f32 %v7287_v49, %v4287_v37  ;;  %v4297_v24 = vmul.f32 0.6931472, %v6257_v38  ;;  %6268 = vlog2.f32 %v4236_v36 }
 0x337   : > { %v6261_v26 = vpop.eup %6260  ;;  %6270 = vpow2.f32 %v4441_v40  ;;  %v4449_v45 = vmul.f32 1.442695, %v4391_v41  ;;  %v4295_v46 = vmul.f32 0.6931472, %v6259_v42  ;;  %v4241_v27 = vmul.f32 0.0009765625, %v4167_v21 }
 0x338   : > { %v6263_v50 = vpop.eup %6262  ;;  %6272 = vpow2.f32 %v4451_v43  ;;  %v4447_v51 = vmul.f32 1.442695, %v4390_v44  ;;  %v4395_v52 = vmul.f32 %v7287_v49, %v4297_v24  ;;  %v4293_v39 = vmul.f32 0.6931472, %v6261_v26  ;;  %v4169_v19 = vpop.xlane.xlu1 %4168 }
 0x339   : > { %6274 = vpow2.f32 %v4449_v45  ;;  %v4394_v53 = vmul.f32 %v7287_v49, %v4295_v46  ;;  %v4303_v54 = vmul.f32 0.6931472, %v6263_v50  ;;  %v4242_v25 = vmul.f32 0.0009765625, %v4169_v19 }
 0x33a   : > { %v6265_v55 = vpop.eup %6264  ;;  %6276 = vpow2.f32 %v4447_v51  ;;  %v4457_v56 = vmul.f32 1.442695, %v4395_v52  ;;  %v4393_v57 = vmul.f32 %v7287_v49, %v4293_v39 }
 0x33b   : > { %v6267_v60 = vpop.eup %6266  ;;  %4534 = vst.msk [vmem:[%s7307_s24 + $0x40] sm:$0xff] %vm4525_vm4, %v6265_v55  ;;  %v4455_v61 = vmul.f32 1.442695, %v4394_v53  ;;  %v4398_v62 = vmul.f32 %v7287_v49, %v4303_v54  ;;  %6278 = vlog2.f32 %v4235_v47  ;;  %v4177_v31 = vpop.xlane.xlu2 %4176 }
 0x33c   : > { %v6269_v63 = vpop.eup %6268  ;;  %4533 = vst.msk [vmem:[%s7307_s24 + $0x38] sm:$0xff] %vm4525_vm4, %v6267_v60  ;;  %6280 = vpow2.f32 %v4457_v56  ;;  %v4453_v0 = vmul.f32 1.442695, %v4393_v57  ;;  %v4246_v36 = vmul.f32 0.0009765625, %v4177_v31 }
 0x33d   : > { %v6271_v2 = vpop.eup %6270  ;;  %6282 = vpow2.f32 %v4455_v61  ;;  %v4463_v3 = vmul.f32 1.442695, %v4398_v62  ;;  %v4301_v4 = vmul.f32 0.6931472, %v6269_v63  ;;  %v4173_v42 = vpop.xlane.xlu0 %4172 }
 0x33e   : > { %v6273_v6 = vpop.eup %6272  ;;  %4532 = vst.msk [vmem:[%s7307_s24 + $0x30] sm:$0xff] %vm4525_vm4, %v6271_v2  ;;  %6284 = vpow2.f32 %v4453_v0  ;;  %v4244_v59 = vmul.f32 0.0009765625, %v4173_v42 }
 0x33f   : > { %v6275_v8 = vpop.eup %6274  ;;  %4537 = vst.msk [vmem:[%s7307_s24 + $0x58] sm:$0xff] %vm4525_vm4, %v6273_v6  ;;  %6286 = vpow2.f32 %v4463_v3  ;;  %v4397_v9 = vmul.f32 %v7287_v49, %v4301_v4 }
 0x340   : > { %v6277_v11 = vpop.eup %6276  ;;  %4536 = vst.msk [vmem:[%s7307_s24 + $0x50] sm:$0xff] %vm4525_vm4, %v6275_v8  ;;  %6288 = vlog2.f32 %v4240_v1  ;;  %v4175_v41 = vpop.xlane.xlu1 %4174 }
 0x341   : > { %v6279_v13 = vpop.eup %6278  ;;  %4535 = vst.msk [vmem:[%s7307_s24 + $0x48] sm:$0xff] %vm4525_vm4, %v6277_v11  ;;  %v4461_v14 = vmul.f32 1.442695, %v4397_v9  ;;  %6290 = vlog2.f32 %v4239_v5  ;;  %v4245_v48 = vmul.f32 0.0009765625, %v4175_v41 }
 0x342   : > { %v6281_v16 = vpop.eup %6280  ;;  %v4299_v17 = vmul.f32 0.6931472, %v6279_v13  ;;  %6292 = vlog2.f32 %v4238_v7 }
 0x343   : > { %v6283_v23 = vpop.eup %6282  ;;  %4540 = vst.msk [vmem:[%s7307_s24 + $0x70] sm:$0xff] %vm4525_vm4, %v6281_v16  ;;  %6294 = vpow2.f32 %v4461_v14  ;;  %v4183_v56 = vpop.xlane.xlu2 %4182 }
 0x344   : > { %v6285_v28 = vpop.eup %6284  ;;  %4539 = vst.msk [vmem:[%s7307_s24 + $0x68] sm:$0xff] %vm4525_vm4, %v6283_v23  ;;  %v4396_v29 = vmul.f32 %v7287_v49, %v4299_v17  ;;  %6296 = vlog2.f32 %v4243_v12  ;;  %v4249_v62 = vmul.f32 0.0009765625, %v4183_v56 }
 0x345   : > { %v6287_v30 = vpop.eup %6286  ;;  %4538 = vst.msk [vmem:[%s7307_s24 + $0x60] sm:$0xff] %vm4525_vm4, %v6285_v28  ;;  %6298 = vlog2.f32 %v4242_v25  ;;  %v4179_v0 = vpop.xlane.xlu0 %4178 }
 0x346   : > { %v6289_v22 = vpop.eup %6288  ;;  %4543 = vst.msk [vmem:[%s7307_s24 + $0x88] sm:$0xff] %vm4525_vm4, %v6287_v30  ;;  %v4459_v32 = vmul.f32 1.442695, %v4396_v29  ;;  %6300 = vlog2.f32 %v4241_v27  ;;  %v4247_v5 = vmul.f32 0.0009765625, %v4179_v0 }
 0x347   : > { %v6291_v15 = vpop.eup %6290  ;;  %v4309_v33 = vmul.f32 0.6931472, %v6289_v22 }
 0x348   : > { %v6293_v34 = vpop.eup %6292  ;;  %6302 = vpow2.f32 %v4459_v32  ;;  %v4307_v35 = vmul.f32 0.6931472, %v6291_v15  ;;  %v4181_v63 = vpop.xlane.xlu1 %4180 }
 0x349   : > { %v6295_v18 = vpop.eup %6294  ;;  %v4401_v20 = vmul.f32 %v7287_v49, %v4309_v33  ;;  %v4305_v37 = vmul.f32 0.6931472, %v6293_v34  ;;  %6304 = vlog2.f32 %v4246_v36  ;;  %v4248_v3 = vmul.f32 0.0009765625, %v4181_v63 }
 0x34a   : > { %v6297_v38 = vpop.eup %6296  ;;  %4542 = vst.msk [vmem:[%s7307_s24 + $0x80] sm:$0xff] %vm4525_vm4, %v6295_v18  ;;  %v4400_v40 = vmul.f32 %v7287_v49, %v4307_v35 }
 0x34b   : > { %v6299_v43 = vpop.eup %6298  ;;  %v4469_v44 = vmul.f32 1.442695, %v4401_v20  ;;  %v4399_v24 = vmul.f32 %v7287_v49, %v4305_v37  ;;  %v4315_v26 = vmul.f32 0.6931472, %v6297_v38  ;;  %v4189_v11 = vpop.xlane.xlu2 %4188 }
 0x34c   : > { %v6301_v45 = vpop.eup %6300  ;;  %v4467_v46 = vmul.f32 1.442695, %v4400_v40  ;;  %v4313_v47 = vmul.f32 0.6931472, %v6299_v43  ;;  %v4252_v13 = vmul.f32 0.0009765625, %v4189_v11 }
 0x34d   : > { %6306 = vpow2.f32 %v4469_v44  ;;  %v4465_v50 = vmul.f32 1.442695, %v4399_v24  ;;  %v4404_v51 = vmul.f32 %v7287_v49, %v4315_v26  ;;  %v4311_v52 = vmul.f32 0.6931472, %v6301_v45  ;;  %v4185_v21 = vpop.xlane.xlu0 %4184 }
 0x34e   : > { %v6303_v39 = vpop.eup %6302  ;;  %6308 = vpow2.f32 %v4467_v46  ;;  %v4403_v53 = vmul.f32 %v7287_v49, %v4313_v47  ;;  %v4250_v29 = vmul.f32 0.0009765625, %v4185_v21 }
 0x34f   : > { %4541 = vst.msk [vmem:[%s7307_s24 + $0x78] sm:$0xff] %vm4525_vm4, %v6303_v39  ;;  %6310 = vpow2.f32 %v4465_v50  ;;  %v4475_v54 = vmul.f32 1.442695, %v4404_v51  ;;  %v4402_v55 = vmul.f32 %v7287_v49, %v4311_v52  ;;  %v6305_v57 = vpop.eup %6304 }
 0x350   : > { %v4473_v58 = vmul.f32 1.442695, %v4403_v53  ;;  %6312 = vlog2.f32 %v4245_v48  ;;  %v4321_v61 = vmul.f32 0.6931472, %v6305_v57  ;;  %v4187_v19 = vpop.xlane.xlu1 %4186 }
 0x351   : > { %6314 = vpow2.f32 %v4475_v54  ;;  %v4471_v60 = vmul.f32 1.442695, %v4402_v55  ;;  %v4251_v28 = vmul.f32 0.0009765625, %v4187_v19 }
 0x352   : > { %6316 = vpow2.f32 %v4473_v58  ;;  %v4407_v2 = vmul.f32 %v7287_v49, %v4321_v61 }
 0x353   : > { %v6307_v1 = vpop.eup %6306  ;;  %6318 = vpow2.f32 %v4471_v60  ;;  %v4195_v20 = vpop.xlane.xlu2 %4194 }
 0x354   : > { %v6309_v4 = vpop.eup %6308  ;;  %4546 = vst.msk [vmem:[%s7307_s24 + $0xa0] sm:$0xff] %vm4525_vm4, %v6307_v1  ;;  %6320 = vlog2.f32 %v4244_v59  ;;  %v4481_v7 = vmul.f32 1.442695, %v4407_v2  ;;  %v4255_v40 = vmul.f32 0.0009765625, %v4195_v20 }
 0x355   : > { %v6311_v6 = vpop.eup %6310  ;;  %4545 = vst.msk [vmem:[%s7307_s24 + $0x98] sm:$0xff] %vm4525_vm4, %v6309_v4  ;;  %6322 = vlog2.f32 %v4249_v62  ;;  %v4191_v24 = vpop.xlane.xlu0 %4190 }
 0x356   : > { %v6313_v8 = vpop.eup %6312  ;;  %4544 = vst.msk [vmem:[%s7307_s24 + $0x90] sm:$0xff] %vm4525_vm4, %v6311_v6  ;;  %6324 = vlog2.f32 %v4248_v3  ;;  %v4253_v50 = vmul.f32 0.0009765625, %v4191_v24 }
 0x357   : > { %v6315_v9 = vpop.eup %6314  ;;  %6326 = vpow2.f32 %v4481_v7  ;;  %v4319_v10 = vmul.f32 0.6931472, %v6313_v8 }
 0x358   : > { %v6317_v12 = vpop.eup %6316  ;;  %4549 = vst.msk [vmem:[%s7307_s24 + $0xb8] sm:$0xff] %vm4525_vm4, %v6315_v9  ;;  %6328 = vlog2.f32 %v4247_v5  ;;  %v4193_v44 = vpop.xlane.xlu1 %4192 }
 0x359   : > { %v6319_v14 = vpop.eup %6318  ;;  %4548 = vst.msk [vmem:[%s7307_s24 + $0xb0] sm:$0xff] %vm4525_vm4, %v6317_v12  ;;  %v4406_v16 = vmul.f32 %v7287_v49, %v4319_v10  ;;  %6330 = vlog2.f32 %v4252_v13  ;;  %v4254_v47 = vmul.f32 0.0009765625, %v4193_v44 }
 0x35a   : > { %v6321_v17 = vpop.eup %6320  ;;  %4547 = vst.msk [vmem:[%s7307_s24 + $0xa8] sm:$0xff] %vm4525_vm4, %v6319_v14 }
 0x35b   : > { %v6323_v23 = vpop.eup %6322  ;;  %v4479_v25 = vmul.f32 1.442695, %v4406_v16  ;;  %v4317_v27 = vmul.f32 0.6931472, %v6321_v17  ;;  %v4201_v56 = vpop.xlane.xlu2 %4200 }
 0x35c   : > { %v6325_v30 = vpop.eup %6324  ;;  %v4327_v22 = vmul.f32 0.6931472, %v6323_v23  ;;  %v4258_v59 = vmul.f32 0.0009765625, %v4201_v56 }
 0x35d   : > { %v6327_v32 = vpop.eup %6326  ;;  %6332 = vpow2.f32 %v4479_v25  ;;  %v4405_v15 = vmul.f32 %v7287_v49, %v4317_v27  ;;  %v4325_v33 = vmul.f32 0.6931472, %v6325_v30  ;;  %v4197_v1 = vpop.xlane.xlu0 %4196 }
 0x35e   : > { %v6329_v31 = vpop.eup %6328  ;;  %4552 = vst.msk [vmem:[%s7307_s24 + $0xd0] sm:$0xff] %vm4525_vm4, %v6327_v32  ;;  %v4410_v34 = vmul.f32 %v7287_v49, %v4327_v22  ;;  %6334 = vlog2.f32 %v4251_v28  ;;  %v4256_v5 = vmul.f32 0.0009765625, %v4197_v1 }
 0x35f   : > { %v4477_v35 = vmul.f32 1.442695, %v4405_v15  ;;  %v4409_v36 = vmul.f32 %v7287_v49, %v4325_v33  ;;  %v4323_v18 = vmul.f32 0.6931472, %v6329_v31  ;;  %6336 = vlog2.f32 %v4250_v29  ;;  %v6331_v37 = vpop.eup %6330 }
 0x360   : > { %v4487_v38 = vmul.f32 1.442695, %v4410_v34  ;;  %v4333_v43 = vmul.f32 0.6931472, %v6331_v37  ;;  %v4199_v0 = vpop.xlane.xlu1 %4198 }
 0x361   : > { %6338 = vpow2.f32 %v4477_v35  ;;  %v4485_v41 = vmul.f32 1.442695, %v4409_v36  ;;  %v4408_v42 = vmul.f32 %v7287_v49, %v4323_v18  ;;  %v4257_v4 = vmul.f32 0.0009765625, %v4199_v0 }
 0x362   : > { %6340 = vpow2.f32 %v4487_v38  ;;  %v4413_v46 = vmul.f32 %v7287_v49, %v4333_v43 }
 0x363   : > { %v6333_v26 = vpop.eup %6332  ;;  %6342 = vpow2.f32 %v4485_v41  ;;  %v4483_v45 = vmul.f32 1.442695, %v4408_v42  ;;  %v4207_v14 = vpop.xlane.xlu2 %4206 }
 0x364   : > { %v6335_v48 = vpop.eup %6334  ;;  %4551 = vst.msk [vmem:[%s7307_s24 + $0xc8] sm:$0xff] %vm4525_vm4, %v6333_v26  ;;  %6344 = vlog2.f32 %v4255_v40  ;;  %v4493_v52 = vmul.f32 1.442695, %v4413_v46  ;;  %v4261_v17 = vmul.f32 0.0009765625, %v4207_v14 }
 0x365   : > { %v6337_v51 = vpop.eup %6336  ;;  %6346 = vpow2.f32 %v4483_v45  ;;  %v4331_v39 = vmul.f32 0.6931472, %v6335_v48  ;;  %v4203_v29 = vpop.xlane.xlu0 %4202 }
 0x366   : > { %v4329_v53 = vmul.f32 0.6931472, %v6337_v51  ;;  %6348 = vlog2.f32 %v4254_v47  ;;  %v4259_v34 = vmul.f32 0.0009765625, %v4203_v29 }
 0x367   : > { %v6339_v54 = vpop.eup %6338  ;;  %6350 = vpow2.f32 %v4493_v52  ;;  %v4412_v55 = vmul.f32 %v7287_v49, %v4331_v39 }
 0x368   : > { %v6341_v57 = vpop.eup %6340  ;;  %4550 = vst.msk [vmem:[%s7307_s24 + $0xc0] sm:$0xff] %vm4525_vm4, %v6339_v54  ;;  %v4411_v58 = vmul.f32 %v7287_v49, %v4329_v53  ;;  %6352 = vlog2.f32 %v4253_v50  ;;  %v4205_v28 = vpop.xlane.xlu1 %4204 }
 0x369   : > { %v6343_v60 = vpop.eup %6342  ;;  %4555 = vst.msk [vmem:[%s7307_s24 + $0xe8] sm:$0xff] %vm4525_vm4, %v6341_v57  ;;  %v4491_v61 = vmul.f32 1.442695, %v4412_v55  ;;  %6354 = vlog2.f32 %v4258_v59  ;;  %v4260_v15 = vmul.f32 0.0009765625, %v4205_v28 }
 0x36a   : > { %v6345_v62 = vpop.eup %6344  ;;  %4554 = vst.msk [vmem:[%s7307_s24 + $0xe0] sm:$0xff] %vm4525_vm4, %v6343_v60  ;;  %v4489_v63 = vmul.f32 1.442695, %v4411_v58 }
 0x36b   : > { %v6347_v2 = vpop.eup %6346  ;;  %6356 = vpow2.f32 %v4491_v61  ;;  %v4339_v3 = vmul.f32 0.6931472, %v6345_v62  ;;  %v4213_v38 = vpop.xlane.xlu2 %4212 }
 0x36c   : > { %v6349_v6 = vpop.eup %6348  ;;  %4553 = vst.msk [vmem:[%s7307_s24 + $0xd8] sm:$0xff] %vm4525_vm4, %v6347_v2  ;;  %6358 = vpow2.f32 %v4489_v63  ;;  %v4264_v42 = vmul.f32 0.0009765625, %v4213_v38 }
 0x36d   : > { %v6351_v7 = vpop.eup %6350  ;;  %v4416_v8 = vmul.f32 %v7287_v49, %v4339_v3  ;;  %v4337_v9 = vmul.f32 0.6931472, %v6349_v6  ;;  %6360 = vlog2.f32 %v4257_v4 }
 0x36e   : > { %v6353_v10 = vpop.eup %6352  ;;  %4558 = vst.msk [vmem:[%s7307_s24 + $0x100] sm:$0xff] %vm4525_vm4, %v6351_v7  ;;  %6362 = vlog2.f32 %v4256_v5 }
 0x36f   : > { %v4499_v11 = vmul.f32 1.442695, %v4416_v8  ;;  %v4415_v12 = vmul.f32 %v7287_v49, %v4337_v9  ;;  %v4335_v13 = vmul.f32 0.6931472, %v6353_v10  ;;  %v6355_v16 = vpop.eup %6354 }
 0x370   : > { %v4345_v25 = vmul.f32 0.6931472, %v6355_v16  ;;  %v4211_v26 = vpop.xlane.xlu1 %4210 }
 0x371   : > { %v6357_v19 = vpop.eup %6356  ;;  %6364 = vpow2.f32 %v4499_v11  ;;  %v4497_v21 = vmul.f32 1.442695, %v4415_v12  ;;  %v4414_v23 = vmul.f32 %v7287_v49, %v4335_v13  ;;  %v4209_v45 = vpop.xlane.xlu0 %4208  ;;  %v4263_v48 = vmul.f32 0.0009765625, %v4211_v26 }
 0x372   : > { %v6359_v27 = vpop.eup %6358  ;;  %4557 = vst.msk [vmem:[%s7307_s24 + $0xf8] sm:$0xff] %vm4525_vm4, %v6357_v19  ;;  %6366 = vlog2.f32 %v4261_v17  ;;  %v4419_v32 = vmul.f32 %v7287_v49, %v4345_v25  ;;  %v4262_v50 = vmul.f32 0.0009765625, %v4209_v45 }
 0x373   : > { %v6361_v30 = vpop.eup %6360  ;;  %4556 = vst.msk [vmem:[%s7307_s24 + $0xf0] sm:$0xff] %vm4525_vm4, %v6359_v27  ;;  %6368 = vpow2.f32 %v4497_v21  ;;  %v4495_v22 = vmul.f32 1.442695, %v4414_v23 }
 0x374   : > { %v6363_v33 = vpop.eup %6362  ;;  %v4343_v31 = vmul.f32 0.6931472, %v6361_v30  ;;  %v4505_v35 = vmul.f32 1.442695, %v4419_v32 }
 0x375   : > { %6370 = vpow2.f32 %v4495_v22  ;;  %v4341_v36 = vmul.f32 0.6931472, %v6363_v33 }
 0x376   : > { %v4418_v18 = vmul.f32 %v7287_v49, %v4343_v31  ;;  %6372 = vlog2.f32 %v4260_v15 }
 0x377   : > { %v6365_v20 = vpop.eup %6364  ;;  %6374 = vpow2.f32 %v4505_v35  ;;  %v4417_v37 = vmul.f32 %v7287_v49, %v4341_v36 }
 0x378   : > { %v6367_v40 = vpop.eup %6366  ;;  %4561 = vst.msk [vmem:[%s7307_s24 + $0x118] sm:$0xff] %vm4525_vm4, %v6365_v20  ;;  %v4503_v41 = vmul.f32 1.442695, %v4418_v18  ;;  %6376 = vlog2.f32 %v4259_v34 }
 0x379   : > { %v6369_v43 = vpop.eup %6368  ;;  %v4501_v44 = vmul.f32 1.442695, %v4417_v37  ;;  %v4351_v24 = vmul.f32 0.6931472, %v6367_v40 }
 0x37a   : > { %4560 = vst.msk [vmem:[%s7307_s24 + $0x110] sm:$0xff] %vm4525_vm4, %v6369_v43  ;;  %6378 = vpow2.f32 %v4503_v41 }
 0x37b   : > { %v6371_v46 = vpop.eup %6370  ;;  %6380 = vpow2.f32 %v4501_v44  ;;  %v4422_v47 = vmul.f32 %v7287_v49, %v4351_v24 }
 0x37c   : > { %v6373_v51 = vpop.eup %6372  ;;  %4559 = vst.msk [vmem:[%s7307_s24 + $0x108] sm:$0xff] %vm4525_vm4, %v6371_v46  ;;  %6382 = vlog2.f32 %v4264_v42 }
 0x37d   : > { %v6375_v52 = vpop.eup %6374  ;;  %v4511_v39 = vmul.f32 1.442695, %v4422_v47  ;;  %v4349_v53 = vmul.f32 0.6931472, %v6373_v51  ;;  %6384 = vlog2.f32 %v4263_v48 }
 0x37e   : > { %v6377_v54 = vpop.eup %6376  ;;  %4564 = vst.msk [vmem:[%s7307_s24 + $0x130] sm:$0xff] %vm4525_vm4, %v6375_v52  ;;  %6386 = vlog2.f32 %v4262_v50 }
 0x37f   : > { %6388 = vpow2.f32 %v4511_v39  ;;  %v4421_v55 = vmul.f32 %v7287_v49, %v4349_v53  ;;  %v4347_v56 = vmul.f32 0.6931472, %v6377_v54 }
 0x380   : > { %v6379_v57 = vpop.eup %6378 }
 0x381   : > { %v6381_v58 = vpop.eup %6380  ;;  %4563 = vst.msk [vmem:[%s7307_s24 + $0x128] sm:$0xff] %vm4525_vm4, %v6379_v57  ;;  %v4509_v59 = vmul.f32 1.442695, %v4421_v55  ;;  %v4420_v60 = vmul.f32 %v7287_v49, %v4347_v56 }
 0x382   : > { %v6383_v61 = vpop.eup %6382  ;;  %4562 = vst.msk [vmem:[%s7307_s24 + $0x120] sm:$0xff] %vm4525_vm4, %v6381_v58 }
 0x383   : > { %v6385_v62 = vpop.eup %6384  ;;  %6390 = vpow2.f32 %v4509_v59  ;;  %v4507_v63 = vmul.f32 1.442695, %v4420_v60  ;;  %v4357_v0 = vmul.f32 0.6931472, %v6383_v61  ;;  %v4219_v1 = vpop.xlane.xlu2 %4218 }
 0x384   : > { %v6387_v2 = vpop.eup %6386  ;;  %v4355_v3 = vmul.f32 0.6931472, %v6385_v62  ;;  %v4267_v4 = vmul.f32 0.0009765625, %v4219_v1 }
 0x385   : > { %v6389_v5 = vpop.eup %6388  ;;  %6392 = vpow2.f32 %v4507_v63  ;;  %v4425_v6 = vmul.f32 %v7287_v49, %v4357_v0  ;;  %v4353_v7 = vmul.f32 0.6931472, %v6387_v2 }
 0x386   : > { %4567 = vst.msk [vmem:[%s7307_s24 + $0x148] sm:$0xff] %vm4525_vm4, %v6389_v5  ;;  %v4424_v8 = vmul.f32 %v7287_v49, %v4355_v3  ;;  %6394 = vlog2.f32 %v4267_v4 }
 0x387   : > { %v4517_v9 = vmul.f32 1.442695, %v4425_v6  ;;  %v4423_v10 = vmul.f32 %v7287_v49, %v4353_v7 }
 0x388   : > { %v4515_v11 = vmul.f32 1.442695, %v4424_v8 }
 0x389   : > { %v6391_v12 = vpop.eup %6390  ;;  %6396 = vpow2.f32 %v4517_v9  ;;  %v4513_v13 = vmul.f32 1.442695, %v4423_v10 }
 0x38a   : > { %4566 = vst.msk [vmem:[%s7307_s24 + $0x140] sm:$0xff] %vm4525_vm4, %v6391_v12  ;;  %6398 = vpow2.f32 %v4515_v11 }
 0x38b   : > { %v6393_v14 = vpop.eup %6392  ;;  %6400 = vpow2.f32 %v4513_v13 }
 0x38c   : > { %v6395_v16 = vpop.eup %6394  ;;  %4565 = vst.msk [vmem:[%s7307_s24 + $0x138] sm:$0xff] %vm4525_vm4, %v6393_v14 }
 0x38d   : > { %v4363_v17 = vmul.f32 0.6931472, %v6395_v16 }
 0x38f   : > { %v6397_v19 = vpop.eup %6396  ;;  %v4428_v21 = vmul.f32 %v7287_v49, %v4363_v17 }
 0x390   : > { %v6399_v23 = vpop.eup %6398  ;;  %4570 = vst.msk [vmem:[%s7307_s24 + $0x160] sm:$0xff] %vm4525_vm4, %v6397_v19 }
 0x391   : > { %v6401_v25 = vpop.eup %6400  ;;  %4569 = vst.msk [vmem:[%s7307_s24 + $0x158] sm:$0xff] %vm4525_vm4, %v6399_v23  ;;  %v4523_v27 = vmul.f32 1.442695, %v4428_v21 }
 0x392   : > { %4568 = vst.msk [vmem:[%s7307_s24 + $0x150] sm:$0xff] %vm4525_vm4, %v6401_v25 }
 0x393   : > { %6402 = vpow2.f32 %v4523_v27 }
 0x394   : > { %v4217_v28 = vpop.xlane.xlu1 %4216 }
 0x395   : > { %v4266_v29 = vmul.f32 0.0009765625, %v4217_v28 }
 0x397   : > { %6404 = vlog2.f32 %v4266_v29 }
 0x399   : > { %v6403_v30 = vpop.eup %6402 }
 0x39a   : > { %4573 = vst.msk [vmem:[%s7307_s24 + $0x178] sm:$0xff] %vm4525_vm4, %v6403_v30 }
 0x39d   : > { %v6405_v22 = vpop.eup %6404 }
 0x39e   : > { %v4361_v32 = vmul.f32 0.6931472, %v6405_v22 }
 0x3a0   : > { %v4427_v15 = vmul.f32 %v7287_v49, %v4361_v32 }
 0x3a2   : > { %v4521_v33 = vmul.f32 1.442695, %v4427_v15  ;;  %v4215_v31 = vpop.xlane.xlu0 %4214 }
 0x3a3   : > { %v4265_v34 = vmul.f32 0.0009765625, %v4215_v31 }
 0x3a4   : > { %6406 = vpow2.f32 %v4521_v33 }
 0x3a5   : > { %6408 = vlog2.f32 %v4265_v34 }
 0x3aa   : > { %v6407_v35 = vpop.eup %6406 }
 0x3ab   : > { %v6409_v36 = vpop.eup %6408  ;;  %4572 = vst.msk [vmem:[%s7307_s24 + $0x170] sm:$0xff] %vm4525_vm4, %v6407_v35 }
 0x3ac   : > { %v4359_v18 = vmul.f32 0.6931472, %v6409_v36 }
 0x3ae   : > { %v4426_v20 = vmul.f32 %v7287_v49, %v4359_v18 }
 0x3b0   : > { %v4519_v37 = vmul.f32 1.442695, %v4426_v20 }
 0x3b2   : > { %6410 = vpow2.f32 %v4519_v37 }
 0x3b8   : > { %v6411_v38 = vpop.eup %6410 }
 0x3b9   : > { %4571 = vst.msk [vmem:[%s7307_s24 + $0x168] sm:$0xff] %vm4525_vm4, %v6411_v38 }
 0x3ba PF: > { %s13_s13 = sadd.s32 1, %s6434_s13   ;;  %s7464_s11 = smov %s6430_s12 }
 0x3bb   : > { %p10_p5 = scmp.ge.s32.totalorder %s13_s13, 4   ;;  %s7465_s12 = smov %s7467_s0 }
 0x3bd   :  { %12 = sbr.rel (!%p10_p5) target bundleno = 2 (0x2), region = 66 }

</bundles_post_ra>
